<compile_context>
chip_gen: v7x
topology: tpu7x:2x2x1
jax: 0.10.0
libtpu: 0.0.40
codegen_flags: <defaults>
</compile_context>

<pallas_src>
import jax
import jax.numpy as jnp
from jax.experimental import pallas as pl
from jax.experimental.pallas import tpu as pltpu


# ------------------------------ host-side helper ----------------------------- #

def _im2col_3x3(x_nhwc):
    """Layer-1 im2col on the host (XLA), tap order t = dy*3 + dx.

    Cin=3 on the TPU lane axis is ~2% lane occupancy, so the patch matrix is
    built outside the kernel; column index = t*Cin + c matches the reshaped
    (9*Cin, Cout) layer-1 weight.
    """
    B, H, W, C = x_nhwc.shape
    xp = jnp.pad(x_nhwc, ((0, 0), (1, 1), (1, 1), (0, 0)))
    cols = [xp[:, dy:dy + H, dx:dx + W, :].reshape(B, H * W, C)
            for dy in range(3) for dx in range(3)]
    return jnp.concatenate(cols, axis=-1)                    # (B, H*W, 9*C)


# -------------------------------- fused kernel ------------------------------- #

def _make_kernel(BB, H, W):
    H2, W2 = H // 2, W // 2
    H4, W4 = H // 4, W // 4

    def _maxpool2x2(y, h, w, c):
        """(BB*h*w, c) raster-per-image -> (BB*(h//2)*(w//2), c), channel minor."""
        y = y.reshape(BB * (h // 2), 2, w // 2, 2, c)
        y = jnp.max(jnp.max(y, axis=3), axis=1)              # one reshape, 2 reduces
        return y.reshape(BB * (h // 2) * (w // 2), c)

    def _conv3x3_bn_relu(pad_ref, x4, w_ref, s_ref, b_ref):
        """3x3 conv (stride 1, pad 1) as 9 accumulated tap matmuls + BN + ReLU.

        pad_ref: (BB, h+2, w+2, Cin) f32 VMEM scratch (zero halo)
        x4     : (BB, h, w, Cin) f32
        w_ref  : (9, Cin, Cout) bf16, tap t = dy*3 + dx
        returns: (BB*h*w, Cout) f32
        """
        _, hp2, wp2, cin = pad_ref.shape
        h, w = hp2 - 2, wp2 - 2
        cout = w_ref.shape[2]
        # Zero only the halo strips (interior is overwritten); re-done every step
        # because each TensorCore owns a private scratch under "parallel" grids.
        pad_ref[:, 0:1, :, :] = jnp.zeros((BB, 1, wp2, cin), jnp.float32)
        pad_ref[:, h + 1:h + 2, :, :] = jnp.zeros((BB, 1, wp2, cin), jnp.float32)
        pad_ref[:, 1:h + 1, 0:1, :] = jnp.zeros((BB, h, 1, cin), jnp.float32)
        pad_ref[:, 1:h + 1, w + 1:w + 2, :] = jnp.zeros((BB, h, 1, cin), jnp.float32)
        pad_ref[:, 1:h + 1, 1:w + 1, :] = x4

        acc = jnp.zeros((BB * h * w, cout), jnp.float32)
        for t in range(9):                                   # static unrolled taps
            dy, dx = t // 3, t % 3
            xt = pad_ref[:, dy:dy + h, dx:dx + w, :].reshape(BB * h * w, cin)
            acc = acc + jnp.dot(xt.astype(jnp.bfloat16), w_ref[t],
                                preferred_element_type=jnp.float32)
        y = acc * s_ref[...] + b_ref[...]                    # folded inference BN
        return jnp.maximum(y, 0.0)                           # ReLU

    def kernel(p1_ref, w1_ref, s1_ref, b1_ref,
               w2_ref, s2_ref, b2_ref,
               w3_ref, s3_ref, b3_ref,
               o_ref, pad2_ref, pad3_ref):
        c1 = w1_ref.shape[1]
        c2 = w2_ref.shape[2]
        c3 = w3_ref.shape[2]

        # layer 1: relu(bn1(conv1(x))) as ONE (BB*H*W, 27)x(27, 32) matmul + pool
        patches = p1_ref[...].reshape(BB * H * W, p1_ref.shape[2])     # bf16
        y = jnp.dot(patches, w1_ref[...], preferred_element_type=jnp.float32)
        y = jnp.maximum(y * s1_ref[...] + b1_ref[...], 0.0)            # (BB*H*W, 32)
        p = _maxpool2x2(y, H, W, c1)                                   # (BB*H2*W2, 32)
        # dropout(0.3): identity at inference
        # TODO(synk): training-mode dropout / batch-statistic BN are not reproduced.

        # layer 2: relu(bn2(conv2(.))) + pool
        y = _conv3x3_bn_relu(pad2_ref, p.reshape(BB, H2, W2, c1),
                             w2_ref, s2_ref, b2_ref)                   # (BB*H2*W2, 64)
        p = _maxpool2x2(y, H2, W2, c2)                                 # (BB*H4*W4, 64)

        # layer 3: relu(bn3(conv3(.))) + fused global average pool
        y = _conv3x3_bn_relu(pad3_ref, p.reshape(BB, H4, W4, c2),
                             w3_ref, s3_ref, b3_ref)                   # (BB*H4*W4, 64)
        gap = jnp.sum(y.reshape(BB, H4 * W4, c3), axis=1) * (1.0 / (H4 * W4))
        o_ref[...] = gap.reshape(1, BB, c3)

    return kernel


# ---------------------------------- wrapper ---------------------------------- #

def cnn_extractor_pallas(x_nhwc, params, *, images_per_step=None):
    B, H, W, Cin = x_nhwc.shape
    assert H % 4 == 0 and W % 4 == 0, "two exact 2x2 pools require H, W % 4 == 0"
    w1, s1, b1 = params["layer1"]          # (9*Cin, 32) bf16, (1,32) f32, (1,32) f32
    w2, s2, b2 = params["layer2"]          # (9, 32, 64) bf16, ...
    w3, s3, b3 = params["layer3"]          # (9, 64, 64) bf16, ...
    C1, C3 = w1.shape[1], w3.shape[2]

    # Images per grid step: fold images into the matmul M dim, but keep >= 2 grid
    # steps (v7x megacore) when B >= 2. Per-image VMEM footprint is ~0.3 MiB, so
    # BB <= 16 stays far under every generation's scoped VMEM limit.
    if images_per_step is None:
        BB = 1 if B <= 1 else max(1, min(B // 2, 16))
    else:
        BB = int(images_per_step)
    G = pl.cdiv(B, BB)
    Bp = G * BB

    # layer-1 im2col on the host; bf16 halves the input DMA bytes.
    patches = _im2col_3x3(x_nhwc.astype(jnp.float32)).astype(jnp.bfloat16)
    if Bp != B:
        pad_rows = jnp.zeros((Bp - B,) + patches.shape[1:], patches.dtype)
        patches = jnp.concatenate([patches, pad_rows], axis=0)

    kernel = _make_kernel(BB, H, W)

    def full(arr):  # whole-array block, same (VMEM-resident) block every step
        return pl.BlockSpec(arr.shape, lambda i, _nd=arr.ndim: (0,) * _nd)

    out = pl.pallas_call(
        kernel,
        out_shape=jax.ShapeDtypeStruct((G, BB, C3), jnp.float32),
        grid=(G,),
        in_specs=[
            pl.BlockSpec((BB, H * W, 9 * Cin), lambda i: (i, 0, 0)),
            full(w1), full(s1), full(b1),
            full(w2), full(s2), full(b2),
            full(w3), full(s3), full(b3),
        ],
        out_specs=pl.BlockSpec((1, BB, C3), lambda i: (i, 0, 0)),
        scratch_shapes=[
            pltpu.VMEM((BB, H // 2 + 2, W // 2 + 2, C1), jnp.float32),    # conv2 pad
            pltpu.VMEM((BB, H // 4 + 2, W // 4 + 2, w2.shape[2]), jnp.float32),  # conv3 pad
        ],
        compiler_params=pltpu.CompilerParams(
            dimension_semantics=("parallel",)),
    )(patches, w1, s1, b1, w2, s2, b2, w3, s3, b3)
    return out.reshape(Bp, C3)[:B]


@jax.jit
def cnn_extractor_forward(x_nchw, params):
    x = jnp.transpose(x_nchw, (0, 2, 3, 1)).astype(jnp.float32)   # NCHW -> NHWC
    return cnn_extractor_pallas(x, params)


# --------------------------- deterministic parameters ------------------------ #

def _make_layer(key, cin, cout):
    kw, kb, kg, kbe, km, kv = jax.random.split(key, 6)
    # conv weight in tap layout (9, Cin, Cout), t = dy*3 + dx, fan-in scaling
    w = jax.random.normal(kw, (9, cin, cout), jnp.float32) / (3.0 * (cin ** 0.5))
    conv_b = jax.random.normal(kb, (cout,), jnp.float32) * 0.05
    # BatchNorm (inference): gamma, beta, running_mean, running_var
    gamma = jax.random.uniform(kg, (cout,), jnp.float32, 0.5, 1.5)
    beta = jax.random.normal(kbe, (cout,), jnp.float32) * 0.1
    mean = jax.random.normal(km, (cout,), jnp.float32) * 0.1
    var = jax.random.uniform(kv, (cout,), jnp.float32, 0.5, 1.5)
    eps = 1e-5
    scale = gamma / jnp.sqrt(var + eps)
    bias = beta + scale * (conv_b - mean)      # absorbs conv bias + BN shift
    return w, scale.reshape(1, cout), bias.reshape(1, cout)


def init_params(key):
    k1, k2, k3 = jax.random.split(key, 3)
    w1, s1, b1 = _make_layer(k1, 3, 32)        # conv1 / bn1
    w2, s2, b2 = _make_layer(k2, 32, 64)       # conv2 / bn2
    w3, s3, b3 = _make_layer(k3, 64, 64)       # conv3 / bn3
    return {
        "layer1": (w1.reshape(9 * 3, 32).astype(jnp.bfloat16), s1, b1),  # im2col weight
        "layer2": (w2.astype(jnp.bfloat16), s2, b2),                     # per-tap weights
        "layer3": (w3.astype(jnp.bfloat16), s3, b3),
        # conv4/conv5/bn4/bn5 exist in __init__ but are unused in forward()
    }


# ------------------------------------ main ----------------------------------- #

if __name__ == "__main__":
    key = jax.random.PRNGKey(0)
    kx, kp = jax.random.split(key)
    # PyTorch-style NCHW input: batch=2, channels=3 (conv1 expects 3), 16x16
    x = jax.random.normal(kx, (2, 3, 16, 16), jnp.float32)
    params = init_params(kp)

    out = cnn_extractor_forward(x, params)
    out = jax.block_until_ready(out)
    assert out.shape == (2, 64), out.shape
    print("KERNEL_OK")
</pallas_src>

<mosaic_0001>
module attributes {stable_mosaic.version = 11 : i64} {
  func.func @kernel(%arg0: i32, %arg1: memref<1x256x27xbf16, #tpu.memory_space<vmem>>, %arg2: memref<27x32xbf16, #tpu.memory_space<vmem>>, %arg3: memref<1x32xf32, #tpu.memory_space<vmem>>, %arg4: memref<1x32xf32, #tpu.memory_space<vmem>>, %arg5: memref<9x32x64xbf16, #tpu.memory_space<vmem>>, %arg6: memref<1x64xf32, #tpu.memory_space<vmem>>, %arg7: memref<1x64xf32, #tpu.memory_space<vmem>>, %arg8: memref<9x64x64xbf16, #tpu.memory_space<vmem>>, %arg9: memref<1x64xf32, #tpu.memory_space<vmem>>, %arg10: memref<1x64xf32, #tpu.memory_space<vmem>>, %arg11: memref<1x1x64xf32, #tpu.memory_space<vmem>>, %arg12: memref<1x10x10x32xf32, #tpu.memory_space<vmem>>, %arg13: memref<1x6x6x64xf32, #tpu.memory_space<vmem>>) attributes {dimension_semantics = [#tpu.dimension_semantics<parallel>], iteration_bounds = array<i64: 2>, scalar_prefetch = 0 : i64, scratch_operands = 2 : i64, tpu.core_type = #tpu.core_type<tc>, window_params = [{transform_indices = @transform_0, window_bounds = array<i64: 1, 256, 27>}, {pipeline_mode = #tpu.pipeline_mode<synchronous>, transform_indices = @transform_1, window_bounds = array<i64: 27, 32>}, {pipeline_mode = #tpu.pipeline_mode<synchronous>, transform_indices = @transform_2, window_bounds = array<i64: 1, 32>}, {pipeline_mode = #tpu.pipeline_mode<synchronous>, transform_indices = @transform_3, window_bounds = array<i64: 1, 32>}, {pipeline_mode = #tpu.pipeline_mode<synchronous>, transform_indices = @transform_4, window_bounds = array<i64: 9, 32, 64>}, {pipeline_mode = #tpu.pipeline_mode<synchronous>, transform_indices = @transform_5, window_bounds = array<i64: 1, 64>}, {pipeline_mode = #tpu.pipeline_mode<synchronous>, transform_indices = @transform_6, window_bounds = array<i64: 1, 64>}, {pipeline_mode = #tpu.pipeline_mode<synchronous>, transform_indices = @transform_7, window_bounds = array<i64: 9, 64, 64>}, {pipeline_mode = #tpu.pipeline_mode<synchronous>, transform_indices = @transform_8, window_bounds = array<i64: 1, 64>}, {pipeline_mode = #tpu.pipeline_mode<synchronous>, transform_indices = @transform_9, window_bounds = array<i64: 1, 64>}, {transform_indices = @transform_10, window_bounds = array<i64: 1, 1, 64>}]} {
    %c0 = arith.constant 0 : index
    %c0_0 = arith.constant 0 : index
    %c0_1 = arith.constant 0 : index
    %0 = vector.load %arg1[%c0, %c0_0, %c0_1] : memref<1x256x27xbf16, #tpu.memory_space<vmem>>, vector<1x256x27xbf16>
    %1 = vector.shape_cast %0 : vector<1x256x27xbf16> to vector<256x27xbf16>
    %c0_2 = arith.constant 0 : index
    %c0_3 = arith.constant 0 : index
    %2 = vector.load %arg2[%c0_2, %c0_3] : memref<27x32xbf16, #tpu.memory_space<vmem>>, vector<27x32xbf16>
    %cst = arith.constant dense<0.000000e+00> : vector<256x32xf32>
    %3 = tpu.matmul %1, %2, %cst {dimension_numbers = #tpu.dot_dimension_numbers<[1], [0], [0], [1], [0, 0, 1, 1], [], []>} : vector<256x27xbf16>, vector<27x32xbf16>, vector<256x32xf32> -> vector<256x32xf32>
    %c0_4 = arith.constant 0 : index
    %c0_5 = arith.constant 0 : index
    %4 = vector.load %arg3[%c0_4, %c0_5] : memref<1x32xf32, #tpu.memory_space<vmem>>, vector<1x32xf32>
    %5 = vector.broadcast %4 : vector<1x32xf32> to vector<256x32xf32>
    %6 = arith.mulf %3, %5 : vector<256x32xf32>
    %c0_6 = arith.constant 0 : index
    %c0_7 = arith.constant 0 : index
    %7 = vector.load %arg4[%c0_6, %c0_7] : memref<1x32xf32, #tpu.memory_space<vmem>>, vector<1x32xf32>
    %8 = vector.broadcast %7 : vector<1x32xf32> to vector<256x32xf32>
    %9 = arith.addf %6, %8 : vector<256x32xf32>
    %cst_8 = arith.constant 0.000000e+00 : f32
    %10 = vector.broadcast %cst_8 : f32 to vector<256x32xf32>
    %11 = arith.maximumf %9, %10 : vector<256x32xf32>
    %12 = vector.shape_cast %11 : vector<256x32xf32> to vector<8x2x8x2x32xf32>
    %cst_9 = arith.constant dense<0xFF800000> : vector<8x2x8x32xf32>
    %13 = vector.multi_reduction <maximumf>, %12, %cst_9 [3] : vector<8x2x8x2x32xf32> to vector<8x2x8x32xf32>
    %cst_10 = arith.constant dense<0xFF800000> : vector<8x8x32xf32>
    %14 = vector.multi_reduction <maximumf>, %13, %cst_10 [1] : vector<8x2x8x32xf32> to vector<8x8x32xf32>
    %15 = vector.shape_cast %14 : vector<8x8x32xf32> to vector<64x32xf32>
    %16 = vector.shape_cast %15 : vector<64x32xf32> to vector<1x8x8x32xf32>
    %cst_11 = arith.constant 0.000000e+00 : f32
    %17 = vector.broadcast %cst_11 : f32 to vector<1x1x10x32xf32>
    %c0_12 = arith.constant 0 : index
    %c0_13 = arith.constant 0 : index
    %c0_14 = arith.constant 0 : index
    %c0_15 = arith.constant 0 : index
    %18 = vector.load %arg12[%c0_12, %c0_13, %c0_14, %c0_15] : memref<1x10x10x32xf32, #tpu.memory_space<vmem>>, vector<1x1x10x32xf32>
    tpu.vector_store %arg12[%c0_12, %c0_13, %c0_14, %c0_15], %17 {strides = array<i32>} : memref<1x10x10x32xf32, #tpu.memory_space<vmem>>, vector<1x1x10x32xf32>,
    %cst_16 = arith.constant 0.000000e+00 : f32
    %19 = vector.broadcast %cst_16 : f32 to vector<1x1x10x32xf32>
    %c0_17 = arith.constant 0 : index
    %c9 = arith.constant 9 : index
    %c0_18 = arith.constant 0 : index
    %c0_19 = arith.constant 0 : index
    %20 = vector.load %arg12[%c0_17, %c9, %c0_18, %c0_19] : memref<1x10x10x32xf32, #tpu.memory_space<vmem>>, vector<1x1x10x32xf32>
    tpu.vector_store %arg12[%c0_17, %c9, %c0_18, %c0_19], %19 {strides = array<i32>} : memref<1x10x10x32xf32, #tpu.memory_space<vmem>>, vector<1x1x10x32xf32>,
    %cst_20 = arith.constant 0.000000e+00 : f32
    %21 = vector.broadcast %cst_20 : f32 to vector<1x8x1x32xf32>
    %c0_21 = arith.constant 0 : index
    %c1 = arith.constant 1 : index
    %c0_22 = arith.constant 0 : index
    %c0_23 = arith.constant 0 : index
    %22 = vector.load %arg12[%c0_21, %c1, %c0_22, %c0_23] : memref<1x10x10x32xf32, #tpu.memory_space<vmem>>, vector<1x8x1x32xf32>
    tpu.vector_store %arg12[%c0_21, %c1, %c0_22, %c0_23], %21 {strides = array<i32>} : memref<1x10x10x32xf32, #tpu.memory_space<vmem>>, vector<1x8x1x32xf32>,
    %cst_24 = arith.constant 0.000000e+00 : f32
    %23 = vector.broadcast %cst_24 : f32 to vector<1x8x1x32xf32>
    %c0_25 = arith.constant 0 : index
    %c1_26 = arith.constant 1 : index
    %c9_27 = arith.constant 9 : index
    %c0_28 = arith.constant 0 : index
    %24 = vector.load %arg12[%c0_25, %c1_26, %c9_27, %c0_28] : memref<1x10x10x32xf32, #tpu.memory_space<vmem>>, vector<1x8x1x32xf32>
    tpu.vector_store %arg12[%c0_25, %c1_26, %c9_27, %c0_28], %23 {strides = array<i32>} : memref<1x10x10x32xf32, #tpu.memory_space<vmem>>, vector<1x8x1x32xf32>,
    %c0_29 = arith.constant 0 : index
    %c1_30 = arith.constant 1 : index
    %c1_31 = arith.constant 1 : index
    %c0_32 = arith.constant 0 : index
    %25 = vector.load %arg12[%c0_29, %c1_30, %c1_31, %c0_32] : memref<1x10x10x32xf32, #tpu.memory_space<vmem>>, vector<1x8x8x32xf32>
    tpu.vector_store %arg12[%c0_29, %c1_30, %c1_31, %c0_32], %16 {strides = array<i32>} : memref<1x10x10x32xf32, #tpu.memory_space<vmem>>, vector<1x8x8x32xf32>,
    %cst_33 = arith.constant 0.000000e+00 : f32
    %26 = vector.broadcast %cst_33 : f32 to vector<64x64xf32>
    %c0_34 = arith.constant 0 : index
    %c0_35 = arith.constant 0 : index
    %c0_36 = arith.constant 0 : index
    %c0_37 = arith.constant 0 : index
    %27 = vector.load %arg12[%c0_34, %c0_35, %c0_36, %c0_37] : memref<1x10x10x32xf32, #tpu.memory_space<vmem>>, vector<1x8x8x32xf32>
    %28 = vector.shape_cast %27 : vector<1x8x8x32xf32> to vector<64x32xf32>
    %29 = arith.truncf %28 : vector<64x32xf32> to vector<64x32xbf16>
    %c0_38 = arith.constant 0 : index
    %c0_39 = arith.constant 0 : index
    %c0_40 = arith.constant 0 : index
    %30 = vector.load %arg5[%c0_38, %c0_39, %c0_40] : memref<9x32x64xbf16, #tpu.memory_space<vmem>>, vector<1x32x64xbf16>
    %31 = vector.shape_cast %30 : vector<1x32x64xbf16> to vector<32x64xbf16>
    %cst_41 = arith.constant dense<0.000000e+00> : vector<64x64xf32>
    %32 = tpu.matmul %29, %31, %cst_41 {dimension_numbers = #tpu.dot_dimension_numbers<[1], [0], [0], [1], [0, 0, 1, 1], [], []>} : vector<64x32xbf16>, vector<32x64xbf16>, vector<64x64xf32> -> vector<64x64xf32>
    %33 = arith.addf %26, %32 : vector<64x64xf32>
    %c0_42 = arith.constant 0 : index
    %c0_43 = arith.constant 0 : index
    %c1_44 = arith.constant 1 : index
    %c0_45 = arith.constant 0 : index
    %34 = vector.load %arg12[%c0_42, %c0_43, %c1_44, %c0_45] : memref<1x10x10x32xf32, #tpu.memory_space<vmem>>, vector<1x8x8x32xf32>
    %35 = vector.shape_cast %34 : vector<1x8x8x32xf32> to vector<64x32xf32>
    %36 = arith.truncf %35 : vector<64x32xf32> to vector<64x32xbf16>
    %c1_46 = arith.constant 1 : index
    %c0_47 = arith.constant 0 : index
    %c0_48 = arith.constant 0 : index
    %37 = vector.load %arg5[%c1_46, %c0_47, %c0_48] : memref<9x32x64xbf16, #tpu.memory_space<vmem>>, vector<1x32x64xbf16>
    %38 = vector.shape_cast %37 : vector<1x32x64xbf16> to vector<32x64xbf16>
    %cst_49 = arith.constant dense<0.000000e+00> : vector<64x64xf32>
    %39 = tpu.matmul %36, %38, %cst_49 {dimension_numbers = #tpu.dot_dimension_numbers<[1], [0], [0], [1], [0, 0, 1, 1], [], []>} : vector<64x32xbf16>, vector<32x64xbf16>, vector<64x64xf32> -> vector<64x64xf32>
    %40 = arith.addf %33, %39 : vector<64x64xf32>
    %c0_50 = arith.constant 0 : index
    %c0_51 = arith.constant 0 : index
    %c2 = arith.constant 2 : index
    %c0_52 = arith.constant 0 : index
    %41 = vector.load %arg12[%c0_50, %c0_51, %c2, %c0_52] : memref<1x10x10x32xf32, #tpu.memory_space<vmem>>, vector<1x8x8x32xf32>
    %42 = vector.shape_cast %41 : vector<1x8x8x32xf32> to vector<64x32xf32>
    %43 = arith.truncf %42 : vector<64x32xf32> to vector<64x32xbf16>
    %c2_53 = arith.constant 2 : index
    %c0_54 = arith.constant 0 : index
    %c0_55 = arith.constant 0 : index
    %44 = vector.load %arg5[%c2_53, %c0_54, %c0_55] : memref<9x32x64xbf16, #tpu.memory_space<vmem>>, vector<1x32x64xbf16>
    %45 = vector.shape_cast %44 : vector<1x32x64xbf16> to vector<32x64xbf16>
    %cst_56 = arith.constant dense<0.000000e+00> : vector<64x64xf32>
    %46 = tpu.matmul %43, %45, %cst_56 {dimension_numbers = #tpu.dot_dimension_numbers<[1], [0], [0], [1], [0, 0, 1, 1], [], []>} : vector<64x32xbf16>, vector<32x64xbf16>, vector<64x64xf32> -> vector<64x64xf32>
    %47 = arith.addf %40, %46 : vector<64x64xf32>
    %c0_57 = arith.constant 0 : index
    %c1_58 = arith.constant 1 : index
    %c0_59 = arith.constant 0 : index
    %c0_60 = arith.constant 0 : index
    %48 = vector.load %arg12[%c0_57, %c1_58, %c0_59, %c0_60] : memref<1x10x10x32xf32, #tpu.memory_space<vmem>>, vector<1x8x8x32xf32>
    %49 = vector.shape_cast %48 : vector<1x8x8x32xf32> to vector<64x32xf32>
    %50 = arith.truncf %49 : vector<64x32xf32> to vector<64x32xbf16>
    %c3 = arith.constant 3 : index
    %c0_61 = arith.constant 0 : index
    %c0_62 = arith.constant 0 : index
    %51 = vector.load %arg5[%c3, %c0_61, %c0_62] : memref<9x32x64xbf16, #tpu.memory_space<vmem>>, vector<1x32x64xbf16>
    %52 = vector.shape_cast %51 : vector<1x32x64xbf16> to vector<32x64xbf16>
    %cst_63 = arith.constant dense<0.000000e+00> : vector<64x64xf32>
    %53 = tpu.matmul %50, %52, %cst_63 {dimension_numbers = #tpu.dot_dimension_numbers<[1], [0], [0], [1], [0, 0, 1, 1], [], []>} : vector<64x32xbf16>, vector<32x64xbf16>, vector<64x64xf32> -> vector<64x64xf32>
    %54 = arith.addf %47, %53 : vector<64x64xf32>
    %c0_64 = arith.constant 0 : index
    %c1_65 = arith.constant 1 : index
    %c1_66 = arith.constant 1 : index
    %c0_67 = arith.constant 0 : index
    %55 = vector.load %arg12[%c0_64, %c1_65, %c1_66, %c0_67] : memref<1x10x10x32xf32, #tpu.memory_space<vmem>>, vector<1x8x8x32xf32>
    %56 = vector.shape_cast %55 : vector<1x8x8x32xf32> to vector<64x32xf32>
    %57 = arith.truncf %56 : vector<64x32xf32> to vector<64x32xbf16>
    %c4 = arith.constant 4 : index
    %c0_68 = arith.constant 0 : index
    %c0_69 = arith.constant 0 : index
    %58 = vector.load %arg5[%c4, %c0_68, %c0_69] : memref<9x32x64xbf16, #tpu.memory_space<vmem>>, vector<1x32x64xbf16>
    %59 = vector.shape_cast %58 : vector<1x32x64xbf16> to vector<32x64xbf16>
    %cst_70 = arith.constant dense<0.000000e+00> : vector<64x64xf32>
    %60 = tpu.matmul %57, %59, %cst_70 {dimension_numbers = #tpu.dot_dimension_numbers<[1], [0], [0], [1], [0, 0, 1, 1], [], []>} : vector<64x32xbf16>, vector<32x64xbf16>, vector<64x64xf32> -> vector<64x64xf32>
    %61 = arith.addf %54, %60 : vector<64x64xf32>
    %c0_71 = arith.constant 0 : index
    %c1_72 = arith.constant 1 : index
    %c2_73 = arith.constant 2 : index
    %c0_74 = arith.constant 0 : index
    %62 = vector.load %arg12[%c0_71, %c1_72, %c2_73, %c0_74] : memref<1x10x10x32xf32, #tpu.memory_space<vmem>>, vector<1x8x8x32xf32>
    %63 = vector.shape_cast %62 : vector<1x8x8x32xf32> to vector<64x32xf32>
    %64 = arith.truncf %63 : vector<64x32xf32> to vector<64x32xbf16>
    %c5 = arith.constant 5 : index
    %c0_75 = arith.constant 0 : index
    %c0_76 = arith.constant 0 : index
    %65 = vector.load %arg5[%c5, %c0_75, %c0_76] : memref<9x32x64xbf16, #tpu.memory_space<vmem>>, vector<1x32x64xbf16>
    %66 = vector.shape_cast %65 : vector<1x32x64xbf16> to vector<32x64xbf16>
    %cst_77 = arith.constant dense<0.000000e+00> : vector<64x64xf32>
    %67 = tpu.matmul %64, %66, %cst_77 {dimension_numbers = #tpu.dot_dimension_numbers<[1], [0], [0], [1], [0, 0, 1, 1], [], []>} : vector<64x32xbf16>, vector<32x64xbf16>, vector<64x64xf32> -> vector<64x64xf32>
    %68 = arith.addf %61, %67 : vector<64x64xf32>
    %c0_78 = arith.constant 0 : index
    %c2_79 = arith.constant 2 : index
    %c0_80 = arith.constant 0 : index
    %c0_81 = arith.constant 0 : index
    %69 = vector.load %arg12[%c0_78, %c2_79, %c0_80, %c0_81] : memref<1x10x10x32xf32, #tpu.memory_space<vmem>>, vector<1x8x8x32xf32>
    %70 = vector.shape_cast %69 : vector<1x8x8x32xf32> to vector<64x32xf32>
    %71 = arith.truncf %70 : vector<64x32xf32> to vector<64x32xbf16>
    %c6 = arith.constant 6 : index
    %c0_82 = arith.constant 0 : index
    %c0_83 = arith.constant 0 : index
    %72 = vector.load %arg5[%c6, %c0_82, %c0_83] : memref<9x32x64xbf16, #tpu.memory_space<vmem>>, vector<1x32x64xbf16>
    %73 = vector.shape_cast %72 : vector<1x32x64xbf16> to vector<32x64xbf16>
    %cst_84 = arith.constant dense<0.000000e+00> : vector<64x64xf32>
    %74 = tpu.matmul %71, %73, %cst_84 {dimension_numbers = #tpu.dot_dimension_numbers<[1], [0], [0], [1], [0, 0, 1, 1], [], []>} : vector<64x32xbf16>, vector<32x64xbf16>, vector<64x64xf32> -> vector<64x64xf32>
    %75 = arith.addf %68, %74 : vector<64x64xf32>
    %c0_85 = arith.constant 0 : index
    %c2_86 = arith.constant 2 : index
    %c1_87 = arith.constant 1 : index
    %c0_88 = arith.constant 0 : index
    %76 = vector.load %arg12[%c0_85, %c2_86, %c1_87, %c0_88] : memref<1x10x10x32xf32, #tpu.memory_space<vmem>>, vector<1x8x8x32xf32>
    %77 = vector.shape_cast %76 : vector<1x8x8x32xf32> to vector<64x32xf32>
    %78 = arith.truncf %77 : vector<64x32xf32> to vector<64x32xbf16>
    %c7 = arith.constant 7 : index
    %c0_89 = arith.constant 0 : index
    %c0_90 = arith.constant 0 : index
    %79 = vector.load %arg5[%c7, %c0_89, %c0_90] : memref<9x32x64xbf16, #tpu.memory_space<vmem>>, vector<1x32x64xbf16>
    %80 = vector.shape_cast %79 : vector<1x32x64xbf16> to vector<32x64xbf16>
    %cst_91 = arith.constant dense<0.000000e+00> : vector<64x64xf32>
    %81 = tpu.matmul %78, %80, %cst_91 {dimension_numbers = #tpu.dot_dimension_numbers<[1], [0], [0], [1], [0, 0, 1, 1], [], []>} : vector<64x32xbf16>, vector<32x64xbf16>, vector<64x64xf32> -> vector<64x64xf32>
    %82 = arith.addf %75, %81 : vector<64x64xf32>
    %c0_92 = arith.constant 0 : index
    %c2_93 = arith.constant 2 : index
    %c2_94 = arith.constant 2 : index
    %c0_95 = arith.constant 0 : index
    %83 = vector.load %arg12[%c0_92, %c2_93, %c2_94, %c0_95] : memref<1x10x10x32xf32, #tpu.memory_space<vmem>>, vector<1x8x8x32xf32>
    %84 = vector.shape_cast %83 : vector<1x8x8x32xf32> to vector<64x32xf32>
    %85 = arith.truncf %84 : vector<64x32xf32> to vector<64x32xbf16>
    %c8 = arith.constant 8 : index
    %c0_96 = arith.constant 0 : index
    %c0_97 = arith.constant 0 : index
    %86 = vector.load %arg5[%c8, %c0_96, %c0_97] : memref<9x32x64xbf16, #tpu.memory_space<vmem>>, vector<1x32x64xbf16>
    %87 = vector.shape_cast %86 : vector<1x32x64xbf16> to vector<32x64xbf16>
    %cst_98 = arith.constant dense<0.000000e+00> : vector<64x64xf32>
    %88 = tpu.matmul %85, %87, %cst_98 {dimension_numbers = #tpu.dot_dimension_numbers<[1], [0], [0], [1], [0, 0, 1, 1], [], []>} : vector<64x32xbf16>, vector<32x64xbf16>, vector<64x64xf32> -> vector<64x64xf32>
    %89 = arith.addf %82, %88 : vector<64x64xf32>
    %c0_99 = arith.constant 0 : index
    %c0_100 = arith.constant 0 : index
    %90 = vector.load %arg6[%c0_99, %c0_100] : memref<1x64xf32, #tpu.memory_space<vmem>>, vector<1x64xf32>
    %91 = vector.broadcast %90 : vector<1x64xf32> to vector<64x64xf32>
    %92 = arith.mulf %89, %91 : vector<64x64xf32>
    %c0_101 = arith.constant 0 : index
    %c0_102 = arith.constant 0 : index
    %93 = vector.load %arg7[%c0_101, %c0_102] : memref<1x64xf32, #tpu.memory_space<vmem>>, vector<1x64xf32>
    %94 = vector.broadcast %93 : vector<1x64xf32> to vector<64x64xf32>
    %95 = arith.addf %92, %94 : vector<64x64xf32>
    %cst_103 = arith.constant 0.000000e+00 : f32
    %96 = vector.broadcast %cst_103 : f32 to vector<64x64xf32>
    %97 = arith.maximumf %95, %96 : vector<64x64xf32>
    %98 = vector.shape_cast %97 : vector<64x64xf32> to vector<4x2x4x2x64xf32>
    %cst_104 = arith.constant dense<0xFF800000> : vector<4x2x4x64xf32>
    %99 = vector.multi_reduction <maximumf>, %98, %cst_104 [3] : vector<4x2x4x2x64xf32> to vector<4x2x4x64xf32>
    %cst_105 = arith.constant dense<0xFF800000> : vector<4x4x64xf32>
    %100 = vector.multi_reduction <maximumf>, %99, %cst_105 [1] : vector<4x2x4x64xf32> to vector<4x4x64xf32>
    %101 = vector.shape_cast %100 : vector<4x4x64xf32> to vector<16x64xf32>
    %102 = vector.shape_cast %101 : vector<16x64xf32> to vector<1x4x4x64xf32>
    %cst_106 = arith.constant 0.000000e+00 : f32
    %103 = vector.broadcast %cst_106 : f32 to vector<1x1x6x64xf32>
    %c0_107 = arith.constant 0 : index
    %c0_108 = arith.constant 0 : index
    %c0_109 = arith.constant 0 : index
    %c0_110 = arith.constant 0 : index
    %104 = vector.load %arg13[%c0_107, %c0_108, %c0_109, %c0_110] : memref<1x6x6x64xf32, #tpu.memory_space<vmem>>, vector<1x1x6x64xf32>
    tpu.vector_store %arg13[%c0_107, %c0_108, %c0_109, %c0_110], %103 {strides = array<i32>} : memref<1x6x6x64xf32, #tpu.memory_space<vmem>>, vector<1x1x6x64xf32>,
    %cst_111 = arith.constant 0.000000e+00 : f32
    %105 = vector.broadcast %cst_111 : f32 to vector<1x1x6x64xf32>
    %c0_112 = arith.constant 0 : index
    %c5_113 = arith.constant 5 : index
    %c0_114 = arith.constant 0 : index
    %c0_115 = arith.constant 0 : index
    %106 = vector.load %arg13[%c0_112, %c5_113, %c0_114, %c0_115] : memref<1x6x6x64xf32, #tpu.memory_space<vmem>>, vector<1x1x6x64xf32>
    tpu.vector_store %arg13[%c0_112, %c5_113, %c0_114, %c0_115], %105 {strides = array<i32>} : memref<1x6x6x64xf32, #tpu.memory_space<vmem>>, vector<1x1x6x64xf32>,
    %cst_116 = arith.constant 0.000000e+00 : f32
    %107 = vector.broadcast %cst_116 : f32 to vector<1x4x1x64xf32>
    %c0_117 = arith.constant 0 : index
    %c1_118 = arith.constant 1 : index
    %c0_119 = arith.constant 0 : index
    %c0_120 = arith.constant 0 : index
    %108 = vector.load %arg13[%c0_117, %c1_118, %c0_119, %c0_120] : memref<1x6x6x64xf32, #tpu.memory_space<vmem>>, vector<1x4x1x64xf32>
    tpu.vector_store %arg13[%c0_117, %c1_118, %c0_119, %c0_120], %107 {strides = array<i32>} : memref<1x6x6x64xf32, #tpu.memory_space<vmem>>, vector<1x4x1x64xf32>,
    %cst_121 = arith.constant 0.000000e+00 : f32
    %109 = vector.broadcast %cst_121 : f32 to vector<1x4x1x64xf32>
    %c0_122 = arith.constant 0 : index
    %c1_123 = arith.constant 1 : index
    %c5_124 = arith.constant 5 : index
    %c0_125 = arith.constant 0 : index
    %110 = vector.load %arg13[%c0_122, %c1_123, %c5_124, %c0_125] : memref<1x6x6x64xf32, #tpu.memory_space<vmem>>, vector<1x4x1x64xf32>
    tpu.vector_store %arg13[%c0_122, %c1_123, %c5_124, %c0_125], %109 {strides = array<i32>} : memref<1x6x6x64xf32, #tpu.memory_space<vmem>>, vector<1x4x1x64xf32>,
    %c0_126 = arith.constant 0 : index
    %c1_127 = arith.constant 1 : index
    %c1_128 = arith.constant 1 : index
    %c0_129 = arith.constant 0 : index
    %111 = vector.load %arg13[%c0_126, %c1_127, %c1_128, %c0_129] : memref<1x6x6x64xf32, #tpu.memory_space<vmem>>, vector<1x4x4x64xf32>
    tpu.vector_store %arg13[%c0_126, %c1_127, %c1_128, %c0_129], %102 {strides = array<i32>} : memref<1x6x6x64xf32, #tpu.memory_space<vmem>>, vector<1x4x4x64xf32>,
    %cst_130 = arith.constant 0.000000e+00 : f32
    %112 = vector.broadcast %cst_130 : f32 to vector<16x64xf32>
    %c0_131 = arith.constant 0 : index
    %c0_132 = arith.constant 0 : index
    %c0_133 = arith.constant 0 : index
    %c0_134 = arith.constant 0 : index
    %113 = vector.load %arg13[%c0_131, %c0_132, %c0_133, %c0_134] : memref<1x6x6x64xf32, #tpu.memory_space<vmem>>, vector<1x4x4x64xf32>
    %114 = vector.shape_cast %113 : vector<1x4x4x64xf32> to vector<16x64xf32>
    %115 = arith.truncf %114 : vector<16x64xf32> to vector<16x64xbf16>
    %c0_135 = arith.constant 0 : index
    %c0_136 = arith.constant 0 : index
    %c0_137 = arith.constant 0 : index
    %116 = vector.load %arg8[%c0_135, %c0_136, %c0_137] : memref<9x64x64xbf16, #tpu.memory_space<vmem>>, vector<1x64x64xbf16>
    %117 = vector.shape_cast %116 : vector<1x64x64xbf16> to vector<64x64xbf16>
    %cst_138 = arith.constant dense<0.000000e+00> : vector<16x64xf32>
    %118 = tpu.matmul %115, %117, %cst_138 {dimension_numbers = #tpu.dot_dimension_numbers<[1], [0], [0], [1], [0, 0, 1, 1], [], []>} : vector<16x64xbf16>, vector<64x64xbf16>, vector<16x64xf32> -> vector<16x64xf32>
    %119 = arith.addf %112, %118 : vector<16x64xf32>
    %c0_139 = arith.constant 0 : index
    %c0_140 = arith.constant 0 : index
    %c1_141 = arith.constant 1 : index
    %c0_142 = arith.constant 0 : index
    %120 = vector.load %arg13[%c0_139, %c0_140, %c1_141, %c0_142] : memref<1x6x6x64xf32, #tpu.memory_space<vmem>>, vector<1x4x4x64xf32>
    %121 = vector.shape_cast %120 : vector<1x4x4x64xf32> to vector<16x64xf32>
    %122 = arith.truncf %121 : vector<16x64xf32> to vector<16x64xbf16>
    %c1_143 = arith.constant 1 : index
    %c0_144 = arith.constant 0 : index
    %c0_145 = arith.constant 0 : index
    %123 = vector.load %arg8[%c1_143, %c0_144, %c0_145] : memref<9x64x64xbf16, #tpu.memory_space<vmem>>, vector<1x64x64xbf16>
    %124 = vector.shape_cast %123 : vector<1x64x64xbf16> to vector<64x64xbf16>
    %cst_146 = arith.constant dense<0.000000e+00> : vector<16x64xf32>
    %125 = tpu.matmul %122, %124, %cst_146 {dimension_numbers = #tpu.dot_dimension_numbers<[1], [0], [0], [1], [0, 0, 1, 1], [], []>} : vector<16x64xbf16>, vector<64x64xbf16>, vector<16x64xf32> -> vector<16x64xf32>
    %126 = arith.addf %119, %125 : vector<16x64xf32>
    %c0_147 = arith.constant 0 : index
    %c0_148 = arith.constant 0 : index
    %c2_149 = arith.constant 2 : index
    %c0_150 = arith.constant 0 : index
    %127 = vector.load %arg13[%c0_147, %c0_148, %c2_149, %c0_150] : memref<1x6x6x64xf32, #tpu.memory_space<vmem>>, vector<1x4x4x64xf32>
    %128 = vector.shape_cast %127 : vector<1x4x4x64xf32> to vector<16x64xf32>
    %129 = arith.truncf %128 : vector<16x64xf32> to vector<16x64xbf16>
    %c2_151 = arith.constant 2 : index
    %c0_152 = arith.constant 0 : index
    %c0_153 = arith.constant 0 : index
    %130 = vector.load %arg8[%c2_151, %c0_152, %c0_153] : memref<9x64x64xbf16, #tpu.memory_space<vmem>>, vector<1x64x64xbf16>
    %131 = vector.shape_cast %130 : vector<1x64x64xbf16> to vector<64x64xbf16>
    %cst_154 = arith.constant dense<0.000000e+00> : vector<16x64xf32>
    %132 = tpu.matmul %129, %131, %cst_154 {dimension_numbers = #tpu.dot_dimension_numbers<[1], [0], [0], [1], [0, 0, 1, 1], [], []>} : vector<16x64xbf16>, vector<64x64xbf16>, vector<16x64xf32> -> vector<16x64xf32>
    %133 = arith.addf %126, %132 : vector<16x64xf32>
    %c0_155 = arith.constant 0 : index
    %c1_156 = arith.constant 1 : index
    %c0_157 = arith.constant 0 : index
    %c0_158 = arith.constant 0 : index
    %134 = vector.load %arg13[%c0_155, %c1_156, %c0_157, %c0_158] : memref<1x6x6x64xf32, #tpu.memory_space<vmem>>, vector<1x4x4x64xf32>
    %135 = vector.shape_cast %134 : vector<1x4x4x64xf32> to vector<16x64xf32>
    %136 = arith.truncf %135 : vector<16x64xf32> to vector<16x64xbf16>
    %c3_159 = arith.constant 3 : index
    %c0_160 = arith.constant 0 : index
    %c0_161 = arith.constant 0 : index
    %137 = vector.load %arg8[%c3_159, %c0_160, %c0_161] : memref<9x64x64xbf16, #tpu.memory_space<vmem>>, vector<1x64x64xbf16>
    %138 = vector.shape_cast %137 : vector<1x64x64xbf16> to vector<64x64xbf16>
    %cst_162 = arith.constant dense<0.000000e+00> : vector<16x64xf32>
    %139 = tpu.matmul %136, %138, %cst_162 {dimension_numbers = #tpu.dot_dimension_numbers<[1], [0], [0], [1], [0, 0, 1, 1], [], []>} : vector<16x64xbf16>, vector<64x64xbf16>, vector<16x64xf32> -> vector<16x64xf32>
    %140 = arith.addf %133, %139 : vector<16x64xf32>
    %c0_163 = arith.constant 0 : index
    %c1_164 = arith.constant 1 : index
    %c1_165 = arith.constant 1 : index
    %c0_166 = arith.constant 0 : index
    %141 = vector.load %arg13[%c0_163, %c1_164, %c1_165, %c0_166] : memref<1x6x6x64xf32, #tpu.memory_space<vmem>>, vector<1x4x4x64xf32>
    %142 = vector.shape_cast %141 : vector<1x4x4x64xf32> to vector<16x64xf32>
    %143 = arith.truncf %142 : vector<16x64xf32> to vector<16x64xbf16>
    %c4_167 = arith.constant 4 : index
    %c0_168 = arith.constant 0 : index
    %c0_169 = arith.constant 0 : index
    %144 = vector.load %arg8[%c4_167, %c0_168, %c0_169] : memref<9x64x64xbf16, #tpu.memory_space<vmem>>, vector<1x64x64xbf16>
    %145 = vector.shape_cast %144 : vector<1x64x64xbf16> to vector<64x64xbf16>
    %cst_170 = arith.constant dense<0.000000e+00> : vector<16x64xf32>
    %146 = tpu.matmul %143, %145, %cst_170 {dimension_numbers = #tpu.dot_dimension_numbers<[1], [0], [0], [1], [0, 0, 1, 1], [], []>} : vector<16x64xbf16>, vector<64x64xbf16>, vector<16x64xf32> -> vector<16x64xf32>
    %147 = arith.addf %140, %146 : vector<16x64xf32>
    %c0_171 = arith.constant 0 : index
    %c1_172 = arith.constant 1 : index
    %c2_173 = arith.constant 2 : index
    %c0_174 = arith.constant 0 : index
    %148 = vector.load %arg13[%c0_171, %c1_172, %c2_173, %c0_174] : memref<1x6x6x64xf32, #tpu.memory_space<vmem>>, vector<1x4x4x64xf32>
    %149 = vector.shape_cast %148 : vector<1x4x4x64xf32> to vector<16x64xf32>
    %150 = arith.truncf %149 : vector<16x64xf32> to vector<16x64xbf16>
    %c5_175 = arith.constant 5 : index
    %c0_176 = arith.constant 0 : index
    %c0_177 = arith.constant 0 : index
    %151 = vector.load %arg8[%c5_175, %c0_176, %c0_177] : memref<9x64x64xbf16, #tpu.memory_space<vmem>>, vector<1x64x64xbf16>
    %152 = vector.shape_cast %151 : vector<1x64x64xbf16> to vector<64x64xbf16>
    %cst_178 = arith.constant dense<0.000000e+00> : vector<16x64xf32>
    %153 = tpu.matmul %150, %152, %cst_178 {dimension_numbers = #tpu.dot_dimension_numbers<[1], [0], [0], [1], [0, 0, 1, 1], [], []>} : vector<16x64xbf16>, vector<64x64xbf16>, vector<16x64xf32> -> vector<16x64xf32>
    %154 = arith.addf %147, %153 : vector<16x64xf32>
    %c0_179 = arith.constant 0 : index
    %c2_180 = arith.constant 2 : index
    %c0_181 = arith.constant 0 : index
    %c0_182 = arith.constant 0 : index
    %155 = vector.load %arg13[%c0_179, %c2_180, %c0_181, %c0_182] : memref<1x6x6x64xf32, #tpu.memory_space<vmem>>, vector<1x4x4x64xf32>
    %156 = vector.shape_cast %155 : vector<1x4x4x64xf32> to vector<16x64xf32>
    %157 = arith.truncf %156 : vector<16x64xf32> to vector<16x64xbf16>
    %c6_183 = arith.constant 6 : index
    %c0_184 = arith.constant 0 : index
    %c0_185 = arith.constant 0 : index
    %158 = vector.load %arg8[%c6_183, %c0_184, %c0_185] : memref<9x64x64xbf16, #tpu.memory_space<vmem>>, vector<1x64x64xbf16>
    %159 = vector.shape_cast %158 : vector<1x64x64xbf16> to vector<64x64xbf16>
    %cst_186 = arith.constant dense<0.000000e+00> : vector<16x64xf32>
    %160 = tpu.matmul %157, %159, %cst_186 {dimension_numbers = #tpu.dot_dimension_numbers<[1], [0], [0], [1], [0, 0, 1, 1], [], []>} : vector<16x64xbf16>, vector<64x64xbf16>, vector<16x64xf32> -> vector<16x64xf32>
    %161 = arith.addf %154, %160 : vector<16x64xf32>
    %c0_187 = arith.constant 0 : index
    %c2_188 = arith.constant 2 : index
    %c1_189 = arith.constant 1 : index
    %c0_190 = arith.constant 0 : index
    %162 = vector.load %arg13[%c0_187, %c2_188, %c1_189, %c0_190] : memref<1x6x6x64xf32, #tpu.memory_space<vmem>>, vector<1x4x4x64xf32>
    %163 = vector.shape_cast %162 : vector<1x4x4x64xf32> to vector<16x64xf32>
    %164 = arith.truncf %163 : vector<16x64xf32> to vector<16x64xbf16>
    %c7_191 = arith.constant 7 : index
    %c0_192 = arith.constant 0 : index
    %c0_193 = arith.constant 0 : index
    %165 = vector.load %arg8[%c7_191, %c0_192, %c0_193] : memref<9x64x64xbf16, #tpu.memory_space<vmem>>, vector<1x64x64xbf16>
    %166 = vector.shape_cast %165 : vector<1x64x64xbf16> to vector<64x64xbf16>
    %cst_194 = arith.constant dense<0.000000e+00> : vector<16x64xf32>
    %167 = tpu.matmul %164, %166, %cst_194 {dimension_numbers = #tpu.dot_dimension_numbers<[1], [0], [0], [1], [0, 0, 1, 1], [], []>} : vector<16x64xbf16>, vector<64x64xbf16>, vector<16x64xf32> -> vector<16x64xf32>
    %168 = arith.addf %161, %167 : vector<16x64xf32>
    %c0_195 = arith.constant 0 : index
    %c2_196 = arith.constant 2 : index
    %c2_197 = arith.constant 2 : index
    %c0_198 = arith.constant 0 : index
    %169 = vector.load %arg13[%c0_195, %c2_196, %c2_197, %c0_198] : memref<1x6x6x64xf32, #tpu.memory_space<vmem>>, vector<1x4x4x64xf32>
    %170 = vector.shape_cast %169 : vector<1x4x4x64xf32> to vector<16x64xf32>
    %171 = arith.truncf %170 : vector<16x64xf32> to vector<16x64xbf16>
    %c8_199 = arith.constant 8 : index
    %c0_200 = arith.constant 0 : index
    %c0_201 = arith.constant 0 : index
    %172 = vector.load %arg8[%c8_199, %c0_200, %c0_201] : memref<9x64x64xbf16, #tpu.memory_space<vmem>>, vector<1x64x64xbf16>
    %173 = vector.shape_cast %172 : vector<1x64x64xbf16> to vector<64x64xbf16>
    %cst_202 = arith.constant dense<0.000000e+00> : vector<16x64xf32>
    %174 = tpu.matmul %171, %173, %cst_202 {dimension_numbers = #tpu.dot_dimension_numbers<[1], [0], [0], [1], [0, 0, 1, 1], [], []>} : vector<16x64xbf16>, vector<64x64xbf16>, vector<16x64xf32> -> vector<16x64xf32>
    %175 = arith.addf %168, %174 : vector<16x64xf32>
    %c0_203 = arith.constant 0 : index
    %c0_204 = arith.constant 0 : index
    %176 = vector.load %arg9[%c0_203, %c0_204] : memref<1x64xf32, #tpu.memory_space<vmem>>, vector<1x64xf32>
    %177 = vector.broadcast %176 : vector<1x64xf32> to vector<16x64xf32>
    %178 = arith.mulf %175, %177 : vector<16x64xf32>
    %c0_205 = arith.constant 0 : index
    %c0_206 = arith.constant 0 : index
    %179 = vector.load %arg10[%c0_205, %c0_206] : memref<1x64xf32, #tpu.memory_space<vmem>>, vector<1x64xf32>
    %180 = vector.broadcast %179 : vector<1x64xf32> to vector<16x64xf32>
    %181 = arith.addf %178, %180 : vector<16x64xf32>
    %cst_207 = arith.constant 0.000000e+00 : f32
    %182 = vector.broadcast %cst_207 : f32 to vector<16x64xf32>
    %183 = arith.maximumf %181, %182 : vector<16x64xf32>
    %184 = vector.shape_cast %183 : vector<16x64xf32> to vector<1x16x64xf32>
    %cst_208 = arith.constant dense<0.000000e+00> : vector<1x64xf32>
    %185 = vector.multi_reduction <add>, %184, %cst_208 [1] : vector<1x16x64xf32> to vector<1x64xf32>
    %cst_209 = arith.constant 6.250000e-02 : f32
    %186 = vector.broadcast %cst_209 : f32 to vector<1x64xf32>
    %187 = arith.mulf %185, %186 : vector<1x64xf32>
    %188 = vector.shape_cast %187 : vector<1x64xf32> to vector<1x1x64xf32>
    %c0_210 = arith.constant 0 : index
    %c0_211 = arith.constant 0 : index
    %c0_212 = arith.constant 0 : index
    %189 = vector.load %arg11[%c0_210, %c0_211, %c0_212] : memref<1x1x64xf32, #tpu.memory_space<vmem>>, vector<1x1x64xf32>
    tpu.vector_store %arg11[%c0_210, %c0_211, %c0_212], %188 {strides = array<i32>} : memref<1x1x64xf32, #tpu.memory_space<vmem>>, vector<1x1x64xf32>,
    return
  }
  func.func @transform_0(%arg0: i32) -> (i32, i32, i32) {
    %c0_i32 = arith.constant 0 : i32
    %c0_i32_0 = arith.constant 0 : i32
    %c0_i32_1 = arith.constant 0 : i32
    return %arg0, %c0_i32, %c0_i32_0 : i32, i32, i32
  }
  func.func @transform_1(%arg0: i32) -> (i32, i32) {
    %c0_i32 = arith.constant 0 : i32
    %c0_i32_0 = arith.constant 0 : i32
    %c0_i32_1 = arith.constant 0 : i32
    return %c0_i32, %c0_i32_0 : i32, i32
  }
  func.func @transform_2(%arg0: i32) -> (i32, i32) {
    %c0_i32 = arith.constant 0 : i32
    %c0_i32_0 = arith.constant 0 : i32
    %c0_i32_1 = arith.constant 0 : i32
    return %c0_i32, %c0_i32_0 : i32, i32
  }
  func.func @transform_3(%arg0: i32) -> (i32, i32) {
    %c0_i32 = arith.constant 0 : i32
    %c0_i32_0 = arith.constant 0 : i32
    %c0_i32_1 = arith.constant 0 : i32
    return %c0_i32, %c0_i32_0 : i32, i32
  }
  func.func @transform_4(%arg0: i32) -> (i32, i32, i32) {
    %c0_i32 = arith.constant 0 : i32
    %c0_i32_0 = arith.constant 0 : i32
    %c0_i32_1 = arith.constant 0 : i32
    %c0_i32_2 = arith.constant 0 : i32
    return %c0_i32, %c0_i32_0, %c0_i32_1 : i32, i32, i32
  }
  func.func @transform_5(%arg0: i32) -> (i32, i32) {
    %c0_i32 = arith.constant 0 : i32
    %c0_i32_0 = arith.constant 0 : i32
    %c0_i32_1 = arith.constant 0 : i32
    return %c0_i32, %c0_i32_0 : i32, i32
  }
  func.func @transform_6(%arg0: i32) -> (i32, i32) {
    %c0_i32 = arith.constant 0 : i32
    %c0_i32_0 = arith.constant 0 : i32
    %c0_i32_1 = arith.constant 0 : i32
    return %c0_i32, %c0_i32_0 : i32, i32
  }
  func.func @transform_7(%arg0: i32) -> (i32, i32, i32) {
    %c0_i32 = arith.constant 0 : i32
    %c0_i32_0 = arith.constant 0 : i32
    %c0_i32_1 = arith.constant 0 : i32
    %c0_i32_2 = arith.constant 0 : i32
    return %c0_i32, %c0_i32_0, %c0_i32_1 : i32, i32, i32
  }
  func.func @transform_8(%arg0: i32) -> (i32, i32) {
    %c0_i32 = arith.constant 0 : i32
    %c0_i32_0 = arith.constant 0 : i32
    %c0_i32_1 = arith.constant 0 : i32
    return %c0_i32, %c0_i32_0 : i32, i32
  }
  func.func @transform_9(%arg0: i32) -> (i32, i32) {
    %c0_i32 = arith.constant 0 : i32
    %c0_i32_0 = arith.constant 0 : i32
    %c0_i32_1 = arith.constant 0 : i32
    return %c0_i32, %c0_i32_0 : i32, i32
  }
  func.func @transform_10(%arg0: i32) -> (i32, i32, i32) {
    %c0_i32 = arith.constant 0 : i32
    %c0_i32_0 = arith.constant 0 : i32
    %c0_i32_1 = arith.constant 0 : i32
    return %arg0, %c0_i32, %c0_i32_0 : i32, i32, i32
  }
}

</mosaic_0001>

<bundles_post_ra>
// kernel: cnn_extractor_forward.1
= control target key start
LH: loop header
LB: loop body
LE: loop exit
PB: predicated region body
PF: predicated region fallthrough
CT: control target
= control target key end

     0   :  { %15 = vsyncpa [#allocation5], 0  ;;  %s7727_s0 = inlined_call_operand.vmem [shape: bf16[2,256,27], index: 0, kind: input, shape index: {}]   ;;  %s7728_s1 = inlined_call_operand.vmem [shape: bf16[27,32], index: 1, kind: input, shape index: {}]   ;;  %s7729_s2 = inlined_call_operand.vmem [shape: f32[1,32], index: 2, kind: input, shape index: {}]   ;;  %s7730_s3 = inlined_call_operand.vmem [shape: f32[1,32], index: 3, kind: input, shape index: {}]   ;;  %s7731_s4 = inlined_call_operand.vmem [shape: bf16[9,32,64], index: 4, kind: input, shape index: {}]   ;;  %s7732_s5 = inlined_call_operand.vmem [shape: f32[1,64], index: 5, kind: input, shape index: {}]   ;;  %s7733_s6 = inlined_call_operand.vmem [shape: f32[1,64], index: 6, kind: input, shape index: {}]   ;;  %s7734_s7 = inlined_call_operand.vmem [shape: bf16[9,64,64], index: 7, kind: input, shape index: {}]   ;;  %s7735_s8 = inlined_call_operand.vmem [shape: f32[1,64], index: 8, kind: input, shape index: {}]   ;;  %s7736_s9 = inlined_call_operand.vmem [shape: f32[1,64], index: 9, kind: input, shape index: {}]   ;;  %s7737_s10 = inlined_call_operand.hbm [shape: f32[2,1,64], index: 10, kind: output, shape index: {}]  }
   0x1   :  { %17 = vsyncpa [#allocation5 + $0x1], 0  ;;  %s6219_s13 = smov 0   ;;  %s6221_s14 = smov 0  }
   0x2   :  { %s6223_s15 = smov 0   ;;  %s6225_s16 = smov 0  }
   0x3 LB: > { %s6240_s17 = sadd.s32 4294967295, %s6157_s16   ;;  %s5244_s18 = sadd.s32 4294967294, %s6157_s16   ;;  %s6157_s16 = sphi %s6225_s16, %s7743_s16   ;;  %s6153_s15 = sphi %s6223_s15, %s7742_s15   ;;  %s6149_s14 = sphi %s6221_s14, %s7741_s14   ;;  %s6145_s13 = sphi %s6219_s13, %s7740_s13  }
   0x4   : > { %s6244_s19 = sadd.s32 1, %s6157_s16   ;;  %s245_s20 = sadd.s32 1, %s6153_s15 }
   0x5   : > { %s242_s21 = ssub.s32 %s6157_s16, %s6244_s19  ;;  %p255_p0 = scmp.ne.s32.totalorder %s6153_s15, %s6149_s14 }
   0x6   : > { %p243_p1 = scmp.eq.s32.totalorder %s242_s21, 0  ;;  %p256_p2 = scmp.eq.s32.totalorder %s6240_s17, 1 }
   0x7   : > { %p261_p3 = scmp.ne.s32.totalorder %s6149_s14, %s6145_s13  ;;  %p262_p4 = scmp.eq.s32.totalorder %s5244_s18, 1 }
   0x8   : > { %s6255_s22 = scalar_select %p243_p1, %s6153_s15, %s245_s20  }
   0x9   : > { %p6257_p5 = por %p256_p2, %p255_p0  ;;  %p6261_p6 = por %p262_p4, %p261_p3 }
   0xa   : > { %p5247_p7 = scmp.ge.s32.totalorder %s6157_s16, 1  ;;  %p315_p8 = scmp.lt.s32.totalorder %s6157_s16, 3 }
   0xc   : > { %p316_p9 = pnand %p5247_p7, %p315_p8 }
   0xd   : > { %v6001_v0 = vld [vmem:[%s7728_s1] sm:$0xff] (!%p316_p9)   ;;  %vm534_vm0 = vcmask (!%p316_p9), 1044480   ;;  %v6002_v1 = vld [vmem:[%s7728_s1 + $0x8] sm:$0x3f] (!%p316_p9)   ;;  %vm535_vm1 = vcmask (!%p316_p9), 1045504   ;;  %p352_p10 = scmp.lt.s32.totalorder (!%p316_p9), %s6240_s17, 1  ;;  %v848_v24 = vlaneseq (!%p316_p9) }
   0xe   : > { %319 = sbr.rel (%p316_p9) target bundleno = 1428 (0x594), region = 60  ;;  %5606 = vmatprep.subr.bf16.mxu0 (!%p316_p9), %v6001_v0  ;;  %5858 = vmatprep.subr.bf16.mxu1 (!%p316_p9), %v6001_v0  ;;  %v6159_v2 = vmov (!%p316_p9), 65535   ;;  %vm485_vm2 = vcmask (!%p316_p9), 220160   ;;  %v6160_v22 = vmov (!%p316_p9), 1983009808   ;;  %vm1516_vm3 = vcmask (!%p316_p9), 254976  }
   0xf   : > { %5607 = vmatpush3.bf16.msra.mxu0 (!%p316_p9), %v6001_v0  ;;  %v536_v3 = vsel (!%p316_p9), %vm534_vm0, 4294967295, %v6159_v2  ;;  %5860 = vmatpush3.bf16.msra.mxu1 (!%p316_p9), %v6001_v0  ;;  %v846_v23 = vunpack.c.l.s4 (!%p316_p9), %v6160_v22  ;;  %v6315_v25 = vld [vmem:[%s7729_s2] ss:$0 sm:$0xff] (!%p316_p9)  ;;  %v849_v27 = vshrl.u32 (!%p316_p9), %v848_v24, 7  ;;  %vm2413_vm4 = vcmask (!%p316_p9), 261120   ;;  %s5485_s11 = sshll.u32 (!%p316_p9), %s6240_s17, 4 }
  0x10   : > { %v537_v4 = vsel (!%p316_p9), %vm535_vm1, %v536_v3, 0  ;;  %v6320_v29 = vld [vmem:[%s7730_s3] ss:$0 sm:$0xff] (!%p316_p9)  ;;  %vm2693_vm5 = vcmask (!%p316_p9), 1041409   ;;  %vm2695_vm6 = vcmask (!%p316_p9), 1042434   ;;  %vm2697_vm7 = vcmask (!%p316_p9), 1043459   ;;  %s7684_s25 = scalar_lea.hbm (!%p316_p9), %s7737_s10, %s5485_s11 }
  0x11   : > { %v539_v5 = vand.u32 (!%p316_p9), %v6002_v1, %v537_v4  ;;  %v847_v26 = vunpack.c.0.s8 (!%p316_p9), %v846_v23  ;;  %vm2699_vm8 = vcmask (!%p316_p9), 1044484   ;;  %vm2701_vm9 = vcmask (!%p316_p9), 1045509  }
  0x12   : > { %vm2703_vm10 = vcmask (!%p316_p9), 1046534   ;;  %vm2705_vm11 = vcmask (!%p316_p9), 1047559   ;;  %vm2612_vm12 = vcmask (!%p316_p9), 253952   ;;  %vm4270_vm13 = vcmask (!%p316_p9), 521216  }
  0x13   : > { %5608 = vmatprep.subr.bf16.mxu0 (!%p316_p9), %v539_v5  ;;  %5859 = vmatprep.subr.bf16.mxu1 (!%p316_p9), %v539_v5  ;;  %v6325_v36 = vsub.s32 (!%p316_p9), %v847_v26, %v849_v27  ;;  %vm4275_vm14 = vcmask (!%p316_p9), 516096   ;;  %vm6162_vm15 = vmmov (!%p316_p9), 0   ;;  %vm3996_vm0 = vcmask (!%p316_p9), 517120  }
  0x14   : > { %5609 = vmatpush3.bf16.msra.mxu0 (!%p316_p9), %v539_v5  ;;  %5861 = vmatpush3.bf16.msra.mxu1 (!%p316_p9), %v539_v5  ;;  %vm4221_vm1 = vcmask (!%p316_p9), 523264  }
  0x15   : > { %s353_s29 = scalar_select %p352_p10, %s6240_s17, 1 }
  0x16   : > { %s6163_s17 = smov [#allocation4]  }
  0x17   : > { %s5488_s30 = sshll.u32 %s353_s29, 7  ;;  %s6099_s28 = sshll.u32 %s6163_s17, 4  ;;  %s6100_s28 = int_to_ptr.vmem [resolvable:$false] %s6099_s28 }
  0x18   : > { %s6278_s18 = scalar_lea.vmem %s7727_s0, %s5488_s30  ;;  %s350_s30 = sand.u32 1, %s6149_s14  }
  0x19   : > { %v6003_v6 = vld [vmem:[%s6278_s18] sm:$0xff]   ;;  %v6004_v7 = vld [vmem:[%s6278_s18 + $0x8] sm:$0xff]   ;;  %v6005_v8 = vld [vmem:[%s6278_s18 + $0x50] sm:$0xff]   ;;  %s351_s12 = scalar_lea.vmem [#allocation4], %s350_s30  ;;  %s5177_s26 = scalar_lea.sflag [#allocation5], %s350_s30 }
  0x1a   : > { %5610 = vmatprep.mubr.msk.bf16.mxu0 %vm485_vm2, %v6003_v6  ;;  %v6006_v9 = vld [vmem:[%s6278_s18 + $0x58] sm:$0xff]   ;;  %5630 = vmatprep.mubr.msk.bf16.mxu1 %vm485_vm2, %v6005_v8  ;;  %v6007_v10 = vld [vmem:[%s6278_s18 + $0x10] sm:$0xff]   ;;  %v6009_v11 = vld [vmem:[%s6278_s18 + $0x60] sm:$0xff]   ;;  %s6101_s29 = scalar_lea.vmem %s6100_s28, 32 }
  0x1b   : > { %5611 = vmatmul.mubr.msk.bf16.vlgmr.msra.gmra.mrb[0].mxu0 %vm485_vm2, %v6004_v7  ;;  %5631 = vmatmul.mubr.msk.bf16.vlgmr.msra.gmra.mrb[0].mxu1 %vm485_vm2, %v6006_v9  ;;  %v6008_v12 = vld [vmem:[%s6278_s18 + $0x18] sm:$0xff]   ;;  %v6011_v13 = vld [vmem:[%s6278_s18 + $0x20] sm:$0xff]   ;;  %v6010_v14 = vld [vmem:[%s6278_s18 + $0x68] sm:$0xff]  }
  0x1c   : > { %5614 = vmatprep.mubr.msk.bf16.mxu0 %vm485_vm2, %v6007_v10  ;;  %5634 = vmatprep.mubr.msk.bf16.mxu1 %vm485_vm2, %v6009_v11  ;;  %v6013_v15 = vld [vmem:[%s6278_s18 + $0x70] sm:$0xff]   ;;  %v6012_v16 = vld [vmem:[%s6278_s18 + $0x28] sm:$0xff]   ;;  %v6014_v17 = vld [vmem:[%s6278_s18 + $0x78] sm:$0xff]  }
  0x1d   : > { %v6015_v18 = vld [vmem:[%s6278_s18 + $0x30] sm:$0xff]   ;;  %v6016_v19 = vld [vmem:[%s6278_s18 + $0x38] sm:$0xff]   ;;  %v6017_v20 = vld [vmem:[%s6278_s18 + $0x40] sm:$0xff]  }
  0x1e   : > { %v6018_v21 = vld [vmem:[%s6278_s18 + $0x48] sm:$0xff]   ;;  %s5189_s18 = sshll.u32 %s351_s12, 4  ;;  %s7686_s18 = int_to_ptr.vmem [resolvable:$true] %s5189_s18 }
  0x1f   : > { %s6095_s27 = scalar_lea.vmem %s7686_s18, 16  ;;  %p6102_p0 = scmp.lt.s32.totalorder %s7686_s18, %s6100_s28 }
  0x20   : > { %p6096_p11 = scmp.ne.s32.totalorder %s7686_s18, %s6095_s27  ;;  %p6103_p1 = scmp.lt.s32.totalorder %s6101_s29, %s6095_s27 }
  0x22   : > { %p6097_p12 = pnand %p6096_p11, %p6257_p5  ;;  %p6104_p2 = por %p6103_p1, %p6102_p0 }
  0x23   : > { %5615 = vmatmul.mubr.msk.bf16.gmra.mrb[4].mxu0 %vm485_vm2, %v6008_v12  ;;  %5635 = vmatmul.mubr.msk.bf16.gmra.mrb[4].mxu1 %vm485_vm2, %v6010_v14 }
  0x24   : > { %5618 = vmatprep.mubr.msk.bf16.mxu0 %vm485_vm2, %v6011_v13  ;;  %5638 = vmatprep.mubr.msk.bf16.mxu1 %vm485_vm2, %v6013_v15  ;;  %p6098_p13 = pneg %p6097_p12 }
  0x26   : > { %p6105_p3 = pnand %p6104_p2, %p6098_p13 }
  0x2b   : > { %5619 = vmatmul.mubr.msk.bf16.gmra.mrb[8].mxu0 %vm485_vm2, %v6012_v16  ;;  %5639 = vmatmul.mubr.msk.bf16.gmra.mrb[8].mxu1 %vm485_vm2, %v6014_v17 }
  0x2c   : > { %5622 = vmatprep.mubr.msk.bf16.mxu0 %vm485_vm2, %v6015_v18 }
  0x33   : > { %5623 = vmatmul.mubr.msk.bf16.gmra.mrb[12].mxu0 %vm485_vm2, %v6016_v19 }
  0x34   : > { %5626 = vmatprep.mubr.msk.bf16.mxu0 %vm485_vm2, %v6017_v20 }
  0x3b   : > { %5627 = vmatmul.mubr.msk.bf16.gmra.mrb[16].mxu0 %vm485_vm2, %v6018_v21  ;;  %vm4316_vm2 = vcmask 519168  }
  0xee   : > { %v5612_v28 = vpop.f32.mrb[0].mxu0  ;;  %v5632_v34 = vpop.f32.mrb[0].mxu1 }
  0xef   : > { %v711_v30 = vmul.f32 %v5612_v28, %v6315_v25  ;;  %v575_v31 = vpop.f32.mrb[1].mxu0  ;;  %v731_v39 = vmul.f32 %v5632_v34, %v6315_v25  ;;  %v655_v40 = vpop.f32.mrb[1].mxu1 }
  0xf0   : > { %v709_v32 = vmul.f32 %v6315_v25, %v575_v31  ;;  %v5613_v33 = vpop.f32.mrb[2].mxu0  ;;  %v729_v43 = vmul.f32 %v6315_v25, %v655_v40  ;;  %v5633_v44 = vpop.f32.mrb[2].mxu1 }
  0xf1   : > { %v750_v35 = vadd.f32 %v6320_v29, %v711_v30  ;;  %v712_v37 = vmul.f32 %v5613_v33, %v6315_v25  ;;  %v578_v38 = vpop.f32.mrb[3].mxu0  ;;  %v770_v47 = vadd.f32 %v6320_v29, %v731_v39  ;;  %v6335_v48 = vmul.f32 %v5633_v44, %v6315_v25  ;;  %v658_v49 = vpop.f32.mrb[3].mxu1 }
  0xf2   : > { %v748_v41 = vadd.f32 %v6320_v29, %v709_v32  ;;  %v710_v42 = vmul.f32 %v6315_v25, %v578_v38  ;;  %v768_v52 = vadd.f32 %v6320_v29, %v729_v43  ;;  %v6340_v53 = vmul.f32 %v6315_v25, %v658_v49 }
  0xf3   : > { %v782_v45 = vmax.f32 %v750_v35, 0.0  ;;  %v751_v46 = vadd.f32 %v6320_v29, %v712_v37  ;;  %v6345_v57 = vmax.f32 %v770_v47, 0.0 }
  0xf4   : > { %v780_v50 = vmax.f32 %v748_v41, 0.0  ;;  %v749_v51 = vadd.f32 %v6320_v29, %v710_v42  ;;  %v6352_v62 = vmax.f32 %v768_v52, 0.0 }
  0xf5   : > { %v878_v54 = vcombine.high %v782_v45, %v782_v45  ;;  %v885_v55 = vrot.slane %v782_v45, %v6325_v36  ;;  %v6343_v56 = vmax.f32 %v751_v46, 0.0 }
  0xf6   : > { %v844_v58 = vcombine.high %v780_v50, %v780_v50  ;;  %v851_v59 = vrot.slane %v780_v50, %v6325_v36  ;;  %v6348_v60 = vmax.f32 %v749_v51, 0.0  ;;  %v6350_v61 = vpop.f32.mrb[4].mxu0  ;;  %v6364_v9 = vpop.f32.mrb[4].mxu1 }
  0xf7   : > { %v892_v63 = vrot.slane %v878_v54, %v6325_v36  ;;  %v893_v0 = vcombine.high %v885_v55, %v885_v55  ;;  %v1573_v1 = vsel %vm1516_vm3, %v885_v55, -inf  ;;  %v895_v2 = vcombine.high %v6343_v56, %v6343_v56  ;;  %v6358_v3 = vpop.f32.mrb[5].mxu0  ;;  %v6370_v15 = vpop.f32.mrb[5].mxu1 }
  0xf8   : > { %v1574_v4 = vrot.slane %v1573_v1, 4  ;;  %v858_v5 = vrot.slane %v844_v58, %v6325_v36  ;;  %v859_v6 = vcombine.high %v851_v59, %v851_v59  ;;  %v1517_v7 = vsel %vm1516_vm3, %v851_v59, -inf  ;;  %v6362_v8 = vpop.f32.mrb[6].mxu0 }
  0xf9   : > { %v894_v10 = vcombine.high %v892_v63, %v892_v63  ;;  %v1580_v11 = vsel %vm1516_vm3, %v893_v0, -inf  ;;  %v1587_v12 = vsel %vm1516_vm3, %v892_v63, -inf  ;;  %v1518_v13 = vrot.slane %v1517_v7, 4  ;;  %v6368_v14 = vpop.f32.mrb[7].mxu0 }
  0xfa   : > { %v1575_v16 = vmax.f32 %v1573_v1, %v1574_v4  ;;  %v1581_v17 = vrot.slane %v1580_v11, 4  ;;  %v1588_v18 = vrot.slane %v1587_v12, 4  ;;  %v860_v19 = vcombine.high %v858_v5, %v858_v5 }
  0xfb   : > { %v1594_v20 = vsel %vm1516_vm3, %v894_v10, -inf  ;;  %v1519_v21 = vmax.f32 %v1517_v7, %v1518_v13  ;;  %v1524_v22 = vsel %vm1516_vm3, %v859_v6, -inf  ;;  %v1531_v23 = vsel %vm1516_vm3, %v858_v5, -inf }
  0xfc   : > { %v1576_v24 = vrot.slane %v1575_v16, 2  ;;  %v1582_v26 = vmax.f32 %v1580_v11, %v1581_v17  ;;  %v1589_v27 = vmax.f32 %v1587_v12, %v1588_v18  ;;  %v1595_v28 = vrot.slane %v1594_v20, 4 }
  0xfd   : > { %v1520_v30 = vrot.slane %v1519_v21, 2  ;;  %v1525_v31 = vrot.slane %v1524_v22, 4  ;;  %v1532_v32 = vrot.slane %v1531_v23, 4  ;;  %v1538_v33 = vsel %vm1516_vm3, %v860_v19, -inf }
  0xfe   : > { %v1577_v34 = vmax.f32 %v1575_v16, %v1576_v24  ;;  %v1583_v35 = vrot.slane %v1582_v26, 2  ;;  %v1590_v37 = vrot.slane %v1589_v27, 2  ;;  %v1596_v38 = vmax.f32 %v1594_v20, %v1595_v28  ;;  %v6376_v39 = vpop.f32.mrb[8].mxu0 }
  0xff   : > { %v1521_v40 = vmax.f32 %v1519_v21, %v1520_v30  ;;  %v1526_v41 = vmax.f32 %v1524_v22, %v1525_v31  ;;  %v1533_v42 = vmax.f32 %v1531_v23, %v1532_v32  ;;  %v1539_v43 = vrot.slane %v1538_v33, 4  ;;  %v6378_v54 = vpop.f32.mrb[9].mxu0 }
 0x100   : > { %v1578_v44 = vrot.slane %v1577_v34, 1  ;;  %v1584_v45 = vmax.f32 %v1582_v26, %v1583_v35  ;;  %v1591_v46 = vmax.f32 %v1589_v27, %v1590_v37  ;;  %v1597_v47 = vrot.slane %v1596_v38, 2 }
 0x101   : > { %v1522_v49 = vrot.slane %v1521_v40, 1  ;;  %v1527_v50 = vrot.slane %v1526_v41, 2  ;;  %v1534_v51 = vrot.slane %v1533_v42, 2  ;;  %v1540_v52 = vmax.f32 %v1538_v33, %v1539_v43 }
 0x102   : > { %v1579_v55 = vmax.f32 %v1577_v34, %v1578_v44  ;;  %v1585_v58 = vrot.slane %v1584_v45, 1  ;;  %v1592_v59 = vrot.slane %v1591_v46, 1  ;;  %v1598_v63 = vmax.f32 %v1596_v38, %v1597_v47  ;;  %v6408_v47 = vpop.f32.mrb[6].mxu1 }
 0x103   : > { %v1523_v0 = vmax.f32 %v1521_v40, %v1522_v49  ;;  %v1528_v1 = vmax.f32 %v1526_v41, %v1527_v50  ;;  %v1535_v4 = vmax.f32 %v1533_v42, %v1534_v51  ;;  %v1541_v5 = vrot.slane %v1540_v52, 2 }
 0x104   : > { %v1586_v6 = vmax.f32 %v1584_v45, %v1585_v58  ;;  %v1593_v7 = vmax.f32 %v1591_v46, %v1592_v59  ;;  %v1599_v10 = vrot.slane %v1598_v63, 1  ;;  %v2415_v11 = vsel %vm2413_vm4, %v1579_v55, -inf }
 0x105   : > { %v1529_v12 = vrot.slane %v1528_v1, 1  ;;  %v1536_v13 = vrot.slane %v1535_v4, 1  ;;  %v1542_v16 = vmax.f32 %v1540_v52, %v1541_v5  ;;  %v2414_v17 = vsel %vm2413_vm4, %v1523_v0, -inf }
 0x106   : > { %v1600_v18 = vmax.f32 %v1598_v63, %v1599_v10  ;;  %v2418_v19 = vsel %vm2413_vm4, %v1586_v6, -inf  ;;  %v2421_v20 = vsel %vm2413_vm4, %v1593_v7, -inf  ;;  %v2416_v21 = vmax.f32 %v2414_v17, %v2415_v11 }
 0x107   : > { %v1530_v22 = vmax.f32 %v1528_v1, %v1529_v12  ;;  %v1537_v23 = vmax.f32 %v1535_v4, %v1536_v13  ;;  %v1543_v24 = vrot.slane %v1542_v16, 1  ;;  %v902_v26 = vrot.slane %v6343_v56, %v6325_v36 }
 0x108   : > { %v6387_v27 = vsel %vm2413_vm4, %v1600_v18, -inf  ;;  %v909_v28 = vrot.slane %v895_v2, %v6325_v36  ;;  %v861_v30 = vcombine.high %v6348_v60, %v6348_v60  ;;  %v868_v31 = vrot.slane %v6348_v60, %v6325_v36 }
 0x109   : > { %v1544_v32 = vmax.f32 %v1542_v16, %v1543_v24  ;;  %v2417_v33 = vsel %vm2413_vm4, %v1530_v22, -inf  ;;  %v2420_v34 = vsel %vm2413_vm4, %v1537_v23, -inf  ;;  %v910_v35 = vcombine.high %v902_v26, %v902_v26 }
 0x10a   : > { %v2419_v37 = vmax.f32 %v2417_v33, %v2418_v19  ;;  %v2422_v38 = vmax.f32 %v2420_v34, %v2421_v20  ;;  %v911_v40 = vcombine.high %v909_v28, %v909_v28  ;;  %v1601_v41 = vsel %vm1516_vm3, %v902_v26, -inf }
 0x10b   : > { %v6401_v56 = vsel %vm2413_vm4, %v1544_v32, -inf  ;;  %v1602_v2 = vrot.slane %v1601_v41, 4  ;;  %v1608_v42 = vsel %vm1516_vm3, %v910_v35, -inf  ;;  %v1615_v43 = vsel %vm1516_vm3, %v909_v28, -inf }
 0x10c   : > { %v2425_v60 = vmax.f32 %v6401_v56, %v6387_v27  ;;  %v2694_v44 = vsel %vm2693_vm5, %v2419_v37, %v2416_v21  ;;  %v1609_v45 = vrot.slane %v1608_v42, 4  ;;  %v1616_v46 = vrot.slane %v1615_v43, 4  ;;  %v6417_v37 = vpop.f32.mrb[10].mxu0 }
 0x10d   : > { %v2696_v49 = vsel %vm2695_vm6, %v2422_v38, %v2694_v44  ;;  %v1603_v50 = vmax.f32 %v1601_v41, %v1602_v2  ;;  %v1622_v51 = vsel %vm1516_vm3, %v911_v40, -inf  ;;  %v875_v52 = vrot.slane %v861_v30, %v6325_v36 }
 0x10e   : > { %v1610_v55 = vmax.f32 %v1608_v42, %v1609_v45  ;;  %v1617_v58 = vmax.f32 %v1615_v43, %v1616_v46  ;;  %v1623_v59 = vrot.slane %v1622_v51, 4  ;;  %v876_v63 = vcombine.high %v868_v31, %v868_v31 }
 0x10f   : > { %v1604_v0 = vrot.slane %v1603_v50, 2  ;;  %v877_v1 = vcombine.high %v875_v52, %v875_v52  ;;  %v1545_v4 = vsel %vm1516_vm3, %v868_v31, -inf  ;;  %v1559_v5 = vsel %vm1516_vm3, %v875_v52, -inf }
 0x110   : > { %v1611_v6 = vrot.slane %v1610_v55, 2  ;;  %v1618_v7 = vrot.slane %v1617_v58, 2  ;;  %v1624_v10 = vmax.f32 %v1622_v51, %v1623_v59  ;;  %v1546_v11 = vrot.slane %v1545_v4, 4 }
 0x111   : > { %v1605_v12 = vmax.f32 %v1603_v50, %v1604_v0  ;;  %v1552_v13 = vsel %vm1516_vm3, %v876_v63, -inf  ;;  %v1560_v16 = vrot.slane %v1559_v5, 4  ;;  %v1566_v17 = vsel %vm1516_vm3, %v877_v1, -inf }
 0x112   : > { %v1612_v18 = vmax.f32 %v1610_v55, %v1611_v6  ;;  %v1619_v19 = vmax.f32 %v1617_v58, %v1618_v7  ;;  %v1625_v20 = vrot.slane %v1624_v10, 2  ;;  %v1547_v21 = vmax.f32 %v1545_v4, %v1546_v11 }
 0x113   : > { %v1606_v22 = vrot.slane %v1605_v12, 1  ;;  %v1553_v23 = vrot.slane %v1552_v13, 4  ;;  %v1561_v24 = vmax.f32 %v1559_v5, %v1560_v16  ;;  %v1567_v26 = vrot.slane %v1566_v17, 4 }
 0x114   : > { %v1613_v27 = vrot.slane %v1612_v18, 1  ;;  %v1620_v28 = vrot.slane %v1619_v19, 1  ;;  %v1626_v30 = vmax.f32 %v1624_v10, %v1625_v20  ;;  %v1548_v31 = vrot.slane %v1547_v21, 2 }
 0x115   : > { %v1607_v32 = vmax.f32 %v1605_v12, %v1606_v22  ;;  %v1554_v33 = vmax.f32 %v1552_v13, %v1553_v23  ;;  %v1562_v34 = vrot.slane %v1561_v24, 2  ;;  %v1568_v35 = vmax.f32 %v1566_v17, %v1567_v26 }
 0x116   : > { %v1614_v38 = vmax.f32 %v1612_v18, %v1613_v27  ;;  %v1621_v40 = vmax.f32 %v1619_v19, %v1620_v28  ;;  %v1627_v41 = vrot.slane %v1626_v30, 1  ;;  %v1549_v56 = vmax.f32 %v1547_v21, %v1548_v31 }
 0x117   : > { %v2427_v2 = vsel %vm2413_vm4, %v1607_v32, -inf  ;;  %v1555_v42 = vrot.slane %v1554_v33, 2  ;;  %v1563_v43 = vmax.f32 %v1561_v24, %v1562_v34  ;;  %v1569_v44 = vrot.slane %v1568_v35, 2  ;;  %v6454_v34 = vpop.f32.mrb[7].mxu1 }
 0x118   : > { %v1628_v45 = vmax.f32 %v1626_v30, %v1627_v41  ;;  %v2430_v46 = vsel %vm2413_vm4, %v1614_v38, -inf  ;;  %v2433_v50 = vsel %vm2413_vm4, %v1621_v40, -inf  ;;  %v1550_v51 = vrot.slane %v1549_v56, 1 }
 0x119   : > { %v1556_v52 = vmax.f32 %v1554_v33, %v1555_v42  ;;  %v1564_v55 = vrot.slane %v1563_v43, 1  ;;  %v1570_v58 = vmax.f32 %v1568_v35, %v1569_v44  ;;  %v2698_v59 = vsel %vm2697_vm7, %v2425_v60, %v2696_v49 }
 0x11a   : > { %v2436_v63 = vsel %vm2413_vm4, %v1628_v45, -inf  ;;  %v1551_v0 = vmax.f32 %v1549_v56, %v1550_v51  ;;  %v715_v1 = vmul.f32 %v6350_v61, %v6315_v25  ;;  %v713_v4 = vmul.f32 %v6315_v25, %v6358_v3 }
 0x11b   : > { %v1557_v5 = vrot.slane %v1556_v52, 1  ;;  %v1565_v6 = vmax.f32 %v1563_v43, %v1564_v55  ;;  %v1571_v7 = vrot.slane %v1570_v58, 1  ;;  %v1218_v10 = vcombine.high %v6345_v57, %v6345_v57 }
 0x11c   : > { %v2426_v11 = vsel %vm2413_vm4, %v1551_v0, -inf  ;;  %v754_v60 = vadd.f32 %v6320_v29, %v715_v1  ;;  %v752_v49 = vadd.f32 %v6320_v29, %v713_v4  ;;  %v6435_v12 = vrot.slane %v6345_v57, %v6325_v36 }
 0x11d   : > { %v1558_v61 = vmax.f32 %v1556_v52, %v1557_v5  ;;  %v1572_v13 = vmax.f32 %v1570_v58, %v1571_v7  ;;  %v2428_v16 = vmax.f32 %v2426_v11, %v2427_v2  ;;  %v2432_v3 = vsel %vm2413_vm4, %v1565_v6, -inf }
 0x11e   : > { %v2434_v17 = vmax.f32 %v2432_v3, %v2433_v50  ;;  %v786_v18 = vmax.f32 %v754_v60, 0.0  ;;  %v784_v19 = vmax.f32 %v752_v49, 0.0  ;;  %v6439_v20 = vrot.slane %v1218_v10, %v6325_v36 }
 0x11f   : > { %v2429_v21 = vsel %vm2413_vm4, %v1558_v61, -inf  ;;  %v2435_v22 = vsel %vm2413_vm4, %v1572_v13, -inf  ;;  %v2700_v23 = vsel %vm2699_vm8, %v2428_v16, %v2698_v59  ;;  %v1233_v57 = vcombine.high %v6435_v12, %v6435_v12 }
 0x120   : > { %v2431_v24 = vmax.f32 %v2429_v21, %v2430_v46  ;;  %v2437_v26 = vmax.f32 %v2435_v22, %v2436_v63  ;;  %v946_v27 = vcombine.high %v786_v18, %v786_v18  ;;  %v953_v28 = vrot.slane %v786_v18, %v6325_v36 }
 0x121   : > { %v912_v30 = vcombine.high %v784_v19, %v784_v19  ;;  %v919_v31 = vrot.slane %v784_v19, %v6325_v36  ;;  %v1234_v32 = vcombine.high %v6439_v20, %v6439_v20  ;;  %v6452_v33 = vsel %vm1516_vm3, %v6435_v12, -inf }
 0x122   : > { %v2702_v35 = vsel %vm2701_vm9, %v2431_v24, %v2700_v23  ;;  %v960_v38 = vrot.slane %v946_v27, %v6325_v36  ;;  %v961_v40 = vcombine.high %v953_v28, %v953_v28  ;;  %v1685_v41 = vsel %vm1516_vm3, %v953_v28, -inf }
 0x123   : > { %v2704_v56 = vsel %vm2703_vm10, %v2434_v17, %v2702_v35  ;;  %v1686_v2 = vrot.slane %v1685_v41, 4  ;;  %v926_v42 = vrot.slane %v912_v30, %v6325_v36  ;;  %v927_v43 = vcombine.high %v919_v31, %v919_v31  ;;  %v6470_v35 = vpop.f32.mrb[11].mxu0 }
 0x124   : > { %v2706_v44 = vsel %vm2705_vm11, %v2437_v26, %v2704_v56  ;;  %v962_v45 = vcombine.high %v960_v38, %v960_v38  ;;  %v1692_v46 = vsel %vm1516_vm3, %v961_v40, -inf  ;;  %v1699_v50 = vsel %vm1516_vm3, %v960_v38, -inf }
 0x125   : > { %2764 = vst.msk [vmem:[#allocation2 + $0x11] sm:$0xff] %vm2413_vm4, %v2706_v44  ;;  %v1687_v51 = vmax.f32 %v1685_v41, %v1686_v2  ;;  %v1693_v52 = vrot.slane %v1692_v46, 4  ;;  %v1700_v55 = vrot.slane %v1699_v50, 4  ;;  %v928_v58 = vcombine.high %v926_v42, %v926_v42 }
 0x126   : > { %v1706_v59 = vsel %vm1516_vm3, %v962_v45, -inf  ;;  %v1629_v63 = vsel %vm1516_vm3, %v919_v31, -inf  ;;  %v1636_v0 = vsel %vm1516_vm3, %v927_v43, -inf  ;;  %v1643_v1 = vsel %vm1516_vm3, %v926_v42, -inf }
 0x127   : > { %v1688_v4 = vrot.slane %v1687_v51, 2  ;;  %v1694_v5 = vmax.f32 %v1692_v46, %v1693_v52  ;;  %v1701_v6 = vmax.f32 %v1699_v50, %v1700_v55  ;;  %v1707_v7 = vrot.slane %v1706_v59, 4 }
 0x128   : > { %v1630_v10 = vrot.slane %v1629_v63, 4  ;;  %v1637_v11 = vrot.slane %v1636_v0, 4  ;;  %v1644_v60 = vrot.slane %v1643_v1, 4  ;;  %v1650_v49 = vsel %vm1516_vm3, %v928_v58, -inf }
 0x129   : > { %v1689_v61 = vmax.f32 %v1687_v51, %v1688_v4  ;;  %v1695_v13 = vrot.slane %v1694_v5, 2  ;;  %v1702_v16 = vrot.slane %v1701_v6, 2  ;;  %v1708_v3 = vmax.f32 %v1706_v59, %v1707_v7 }
 0x12a   : > { %v1631_v17 = vmax.f32 %v1629_v63, %v1630_v10  ;;  %v1638_v18 = vmax.f32 %v1636_v0, %v1637_v11  ;;  %v1645_v19 = vmax.f32 %v1643_v1, %v1644_v60  ;;  %v1651_v21 = vrot.slane %v1650_v49, 4 }
 0x12b   : > { %v1690_v22 = vrot.slane %v1689_v61, 1  ;;  %v1696_v23 = vmax.f32 %v1694_v5, %v1695_v13  ;;  %v1703_v24 = vmax.f32 %v1701_v6, %v1702_v16  ;;  %v1709_v26 = vrot.slane %v1708_v3, 2 }
 0x12c   : > { %v1632_v27 = vrot.slane %v1631_v17, 2  ;;  %v1639_v28 = vrot.slane %v1638_v18, 2  ;;  %v1646_v30 = vrot.slane %v1645_v19, 2  ;;  %v1652_v31 = vmax.f32 %v1650_v49, %v1651_v21 }
 0x12d   : > { %v1691_v38 = vmax.f32 %v1689_v61, %v1690_v22  ;;  %v1697_v40 = vrot.slane %v1696_v23, 1  ;;  %v1704_v41 = vrot.slane %v1703_v24, 1  ;;  %v1710_v56 = vmax.f32 %v1708_v3, %v1709_v26 }
 0x12e   : > { %v1633_v2 = vmax.f32 %v1631_v17, %v1632_v27  ;;  %v1640_v42 = vmax.f32 %v1638_v18, %v1639_v28  ;;  %v1647_v43 = vmax.f32 %v1645_v19, %v1646_v30  ;;  %v1653_v44 = vrot.slane %v1652_v31, 2  ;;  %v6499_v30 = vpop.f32.mrb[8].mxu1 }
 0x12f   : > { %v1698_v45 = vmax.f32 %v1696_v23, %v1697_v40  ;;  %v1705_v46 = vmax.f32 %v1703_v24, %v1704_v41  ;;  %v1711_v50 = vrot.slane %v1710_v56, 1  ;;  %v2439_v51 = vsel %vm2413_vm4, %v1691_v38, -inf }
 0x130   : > { %v1634_v52 = vrot.slane %v1633_v2, 1  ;;  %v1641_v55 = vrot.slane %v1640_v42, 1  ;;  %v1648_v58 = vrot.slane %v1647_v43, 1  ;;  %v1654_v59 = vmax.f32 %v1652_v31, %v1653_v44 }
 0x131   : > { %v1712_v63 = vmax.f32 %v1710_v56, %v1711_v50  ;;  %v2442_v0 = vsel %vm2413_vm4, %v1698_v45, -inf  ;;  %v2445_v1 = vsel %vm2413_vm4, %v1705_v46, -inf  ;;  %v2134_v4 = vrot.slane %v6452_v33, 4 }
 0x132   : > { %v1635_v5 = vmax.f32 %v1633_v2, %v1634_v52  ;;  %v1642_v6 = vmax.f32 %v1640_v42, %v1641_v55  ;;  %v1649_v7 = vmax.f32 %v1647_v43, %v1648_v58  ;;  %v1655_v10 = vrot.slane %v1654_v59, 1 }
 0x133   : > { %v6477_v11 = vsel %vm2413_vm4, %v1712_v63, -inf  ;;  %v2135_v60 = vmax.f32 %v6452_v33, %v2134_v4  ;;  %v2140_v49 = vsel %vm1516_vm3, %v1233_v57, -inf  ;;  %v2147_v61 = vsel %vm1516_vm3, %v6439_v20, -inf }
 0x134   : > { %v1656_v13 = vmax.f32 %v1654_v59, %v1655_v10  ;;  %v2438_v16 = vsel %vm2413_vm4, %v1635_v5, -inf  ;;  %v2441_v3 = vsel %vm2413_vm4, %v1642_v6, -inf  ;;  %v2444_v17 = vsel %vm2413_vm4, %v1649_v7, -inf }
 0x135   : > { %v2440_v18 = vmax.f32 %v2438_v16, %v2439_v51  ;;  %v2443_v19 = vmax.f32 %v2441_v3, %v2442_v0  ;;  %v2446_v21 = vmax.f32 %v2444_v17, %v2445_v1  ;;  %v2136_v22 = vrot.slane %v2135_v60, 2 }
 0x136   : > { %v6490_v33 = vsel %vm2413_vm4, %v1656_v13, -inf  ;;  %v2141_v12 = vrot.slane %v2140_v49, 4  ;;  %v2148_v23 = vrot.slane %v2147_v61, 4  ;;  %v2154_v57 = vsel %vm1516_vm3, %v1234_v32, -inf }
 0x137   : > { %v2449_v24 = vmax.f32 %v6490_v33, %v6477_v11  ;;  %v2707_v26 = vsel %vm2693_vm5, %v2443_v19, %v2440_v18  ;;  %v2137_v27 = vmax.f32 %v2135_v60, %v2136_v22  ;;  %v2155_v28 = vrot.slane %v2154_v57, 4 }
 0x138   : > { %v6502_v31 = vsel %vm2695_vm6, %v2446_v21, %v2707_v26  ;;  %v2142_v38 = vmax.f32 %v2140_v49, %v2141_v12  ;;  %v2149_v40 = vmax.f32 %v2147_v61, %v2148_v23  ;;  %v716_v41 = vmul.f32 %v6362_v8, %v6315_v25 }
 0x139   : > { %v2138_v20 = vrot.slane %v2137_v27, 1  ;;  %v2156_v56 = vmax.f32 %v2154_v57, %v2155_v28  ;;  %v1184_v32 = vcombine.high %v6352_v62, %v6352_v62  ;;  %v1191_v2 = vrot.slane %v6352_v62, %v6325_v36 }
 0x13a   : > { %v2143_v42 = vrot.slane %v2142_v38, 2  ;;  %v2150_v43 = vrot.slane %v2149_v40, 2  ;;  %v755_v44 = vadd.f32 %v6320_v29, %v716_v41  ;;  %v6513_v45 = vmul.f32 %v6315_v25, %v6368_v14 }
 0x13b   : > { %v2139_v46 = vmax.f32 %v2137_v27, %v2138_v20  ;;  %v2157_v50 = vrot.slane %v2156_v56, 2  ;;  %v1198_v8 = vrot.slane %v1184_v32, %v6325_v36  ;;  %v1199_v51 = vcombine.high %v1191_v2, %v1191_v2 }
 0x13c   : > { %v2144_v52 = vmax.f32 %v2142_v38, %v2143_v42  ;;  %v2151_v55 = vmax.f32 %v2149_v40, %v2150_v43  ;;  %v787_v58 = vmax.f32 %v755_v44, 0.0  ;;  %v2077_v59 = vsel %vm1516_vm3, %v1191_v2, -inf  ;;  %v6536_v40 = vpop.f32.mrb[9].mxu1 }
 0x13d   : > { %v2158_v63 = vmax.f32 %v2156_v56, %v2157_v50  ;;  %v6518_v62 = vsel %vm2413_vm4, %v2139_v46, -inf  ;;  %v1200_v0 = vcombine.high %v1198_v8, %v1198_v8  ;;  %v2078_v1 = vrot.slane %v2077_v59, 4 }
 0x13e   : > { %v2145_v4 = vrot.slane %v2144_v52, 1  ;;  %v2152_v5 = vrot.slane %v2151_v55, 1  ;;  %v963_v14 = vcombine.high %v787_v58, %v787_v58  ;;  %v970_v6 = vrot.slane %v787_v58, %v6325_v36 }
 0x13f   : > { %v2159_v7 = vrot.slane %v2158_v63, 1  ;;  %v2079_v10 = vmax.f32 %v2077_v59, %v2078_v1  ;;  %v2084_v60 = vsel %vm1516_vm3, %v1199_v51, -inf  ;;  %v2091_v49 = vsel %vm1516_vm3, %v1198_v8, -inf }
 0x140   : > { %v2146_v61 = vmax.f32 %v2144_v52, %v2145_v4  ;;  %v2153_v13 = vmax.f32 %v2151_v55, %v2152_v5  ;;  %v977_v16 = vrot.slane %v963_v14, %v6325_v36  ;;  %v978_v3 = vcombine.high %v970_v6, %v970_v6 }
 0x141   : > { %v2160_v17 = vmax.f32 %v2158_v63, %v2159_v7  ;;  %v1713_v18 = vsel %vm1516_vm3, %v970_v6, -inf  ;;  %v2080_v19 = vrot.slane %v2079_v10, 2  ;;  %v2085_v21 = vrot.slane %v2084_v60, 4 }
 0x142   : > { %v6526_v22 = vsel %vm2413_vm4, %v2146_v61, -inf  ;;  %v6529_v12 = vsel %vm2413_vm4, %v2153_v13, -inf  ;;  %v979_v23 = vcombine.high %v977_v16, %v977_v16  ;;  %v1714_v57 = vrot.slane %v1713_v18, 4 }
 0x143   : > { %v6532_v26 = vsel %vm2413_vm4, %v2160_v17, -inf  ;;  %v1720_v27 = vsel %vm1516_vm3, %v978_v3, -inf  ;;  %v1727_v28 = vsel %vm1516_vm3, %v977_v16, -inf  ;;  %v2081_v38 = vmax.f32 %v2079_v10, %v2080_v19 }
 0x144   : > { %v1715_v41 = vmax.f32 %v1713_v18, %v1714_v57  ;;  %v1721_v20 = vrot.slane %v1720_v27, 4  ;;  %v1728_v56 = vrot.slane %v1727_v28, 4  ;;  %v1734_v32 = vsel %vm1516_vm3, %v979_v23, -inf }
 0x145   : > { %v1735_v2 = vrot.slane %v1734_v32, 4  ;;  %v2082_v42 = vrot.slane %v2081_v38, 1  ;;  %v2086_v43 = vmax.f32 %v2084_v60, %v2085_v21  ;;  %v2092_v44 = vrot.slane %v2091_v49, 4 }
 0x146   : > { %v1716_v46 = vrot.slane %v1715_v41, 2  ;;  %v1722_v50 = vmax.f32 %v1720_v27, %v1721_v20  ;;  %v1729_v8 = vmax.f32 %v1727_v28, %v1728_v56  ;;  %v2098_v51 = vsel %vm1516_vm3, %v1200_v0, -inf }
 0x147   : > { %v1736_v52 = vmax.f32 %v1734_v32, %v1735_v2  ;;  %v2083_v55 = vmax.f32 %v2081_v38, %v2082_v42  ;;  %v2087_v58 = vrot.slane %v2086_v43, 2  ;;  %v2093_v59 = vmax.f32 %v2091_v49, %v2092_v44  ;;  %v6547_v2 = vpop.f32.mrb[12].mxu0 }
 0x148   : > { %v1717_v63 = vmax.f32 %v1715_v41, %v1716_v46  ;;  %v1723_v1 = vrot.slane %v1722_v50, 2  ;;  %v1730_v4 = vrot.slane %v1729_v8, 2  ;;  %v2099_v5 = vrot.slane %v2098_v51, 4 }
 0x149   : > { %v1737_v14 = vrot.slane %v1736_v52, 2  ;;  %v2088_v6 = vmax.f32 %v2086_v43, %v2087_v58  ;;  %v2094_v7 = vrot.slane %v2093_v59, 2  ;;  %v2534_v10 = vsel %vm2413_vm4, %v2083_v55, -inf }
 0x14a   : > { %v1718_v60 = vrot.slane %v1717_v63, 1  ;;  %v1724_v61 = vmax.f32 %v1722_v50, %v1723_v1  ;;  %v1731_v13 = vmax.f32 %v1729_v8, %v1730_v4  ;;  %v2100_v16 = vmax.f32 %v2098_v51, %v2099_v5 }
 0x14b   : > { %v1738_v3 = vmax.f32 %v1736_v52, %v1737_v14  ;;  %v2089_v17 = vrot.slane %v2088_v6, 1  ;;  %v2095_v0 = vmax.f32 %v2093_v59, %v2094_v7  ;;  %v2536_v18 = vmax.f32 %v2534_v10, %v6518_v62 }
 0x14c   : > { %v1719_v19 = vmax.f32 %v1717_v63, %v1718_v60  ;;  %v1725_v49 = vrot.slane %v1724_v61, 1  ;;  %v1732_v21 = vrot.slane %v1731_v13, 1  ;;  %v2101_v23 = vrot.slane %v2100_v16, 2 }
 0x14d   : > { %v1739_v57 = vrot.slane %v1738_v3, 1  ;;  %v2090_v27 = vmax.f32 %v2088_v6, %v2089_v17  ;;  %v2096_v28 = vrot.slane %v2095_v0, 1  ;;  %v753_v38 = vadd.f32 %v6320_v29, %v6513_v45 }
 0x14e   : > { %v1726_v41 = vmax.f32 %v1724_v61, %v1725_v49  ;;  %v1733_v20 = vmax.f32 %v1731_v13, %v1732_v21  ;;  %v6545_v56 = vsel %vm2413_vm4, %v1719_v19, -inf  ;;  %v2102_v32 = vmax.f32 %v2100_v16, %v2101_v23  ;;  %v6590_v49 = vpop.f32.mrb[13].mxu0 }
 0x14f   : > { %v1740_v42 = vmax.f32 %v1738_v3, %v1739_v57  ;;  %v2097_v62 = vmax.f32 %v2095_v0, %v2096_v28  ;;  %v2537_v43 = vsel %vm2413_vm4, %v2090_v27, -inf  ;;  %v785_v44 = vmax.f32 %v753_v38, 0.0 }
 0x150   : > { %v6551_v46 = vsel %vm2413_vm4, %v1726_v41, -inf  ;;  %v6554_v50 = vsel %vm2413_vm4, %v1733_v20, -inf  ;;  %v2103_v45 = vrot.slane %v2102_v32, 1  ;;  %v2539_v8 = vmax.f32 %v2537_v43, %v6526_v22 }
 0x151   : > { %v6558_v51 = vsel %vm2413_vm4, %v1740_v42, -inf  ;;  %v2540_v52 = vsel %vm2413_vm4, %v2097_v62, -inf  ;;  %v929_v55 = vcombine.high %v785_v44, %v785_v44  ;;  %v936_v58 = vrot.slane %v785_v44, %v6325_v36 }
 0x152   : > { %v2104_v59 = vmax.f32 %v2102_v32, %v2103_v45  ;;  %v2542_v63 = vmax.f32 %v2540_v52, %v6529_v12  ;;  %v2735_v1 = vsel %vm2693_vm5, %v2539_v8, %v2536_v18  ;;  %v6569_v4 = vsel %vm2697_vm7, %v2449_v24, %v6502_v31 }
 0x153   : > { %v943_v22 = vrot.slane %v929_v55, %v6325_v36  ;;  %v944_v5 = vcombine.high %v936_v58, %v936_v58  ;;  %v1657_v14 = vsel %vm1516_vm3, %v936_v58, -inf  ;;  %v771_v6 = vadd.f32 %v6320_v29, %v6335_v48 }
 0x154   : > { %v2543_v7 = vsel %vm2413_vm4, %v2104_v59, -inf  ;;  %v2736_v12 = vsel %vm2695_vm6, %v2542_v63, %v2735_v1  ;;  %v1658_v10 = vrot.slane %v1657_v14, 4  ;;  %v769_v60 = vadd.f32 %v6320_v29, %v6340_v53 }
 0x155   : > { %v2545_v11 = vmax.f32 %v2543_v7, %v6532_v26  ;;  %v945_v33 = vcombine.high %v943_v22, %v943_v22  ;;  %v1664_v24 = vsel %vm1516_vm3, %v944_v5, -inf  ;;  %v1671_v31 = vsel %vm1516_vm3, %v943_v22, -inf }
 0x156   : > { %v1659_v61 = vmax.f32 %v1657_v14, %v1658_v10  ;;  %v1665_v13 = vrot.slane %v1664_v24, 4  ;;  %v1672_v16 = vrot.slane %v1671_v31, 4  ;;  %v803_v3 = vmax.f32 %v771_v6, 0.0 }
 0x157   : > { %v1678_v48 = vsel %vm1516_vm3, %v945_v33, -inf  ;;  %v801_v17 = vmax.f32 %v769_v60, 0.0  ;;  %v6584_v0 = vsel %vm2697_vm7, %v2545_v11, %v2736_v12  ;;  %v6588_v29 = vmul.f32 %v6364_v9, %v6315_v25 }
 0x158   : > { %v1660_v53 = vrot.slane %v1659_v61, 2  ;;  %v1666_v26 = vmax.f32 %v1664_v24, %v1665_v13  ;;  %v1673_v18 = vmax.f32 %v1671_v31, %v1672_v16  ;;  %v1679_v19 = vrot.slane %v1678_v48, 4 }
 0x159   : > { %v1235_v21 = vcombine.high %v803_v3, %v803_v3  ;;  %v1242_v23 = vrot.slane %v803_v3, %v6325_v36  ;;  %v1201_v57 = vcombine.high %v801_v17, %v801_v17  ;;  %v6594_v27 = vrot.slane %v801_v17, %v6325_v36 }
 0x15a   : > { %v1661_v28 = vmax.f32 %v1659_v61, %v1660_v53  ;;  %v1667_v38 = vrot.slane %v1666_v26, 2  ;;  %v1674_v41 = vrot.slane %v1673_v18, 2  ;;  %v1680_v20 = vmax.f32 %v1678_v48, %v1679_v19 }
 0x15b   : > { %v1249_v25 = vrot.slane %v1235_v21, %v6325_v36  ;;  %v1250_v9 = vcombine.high %v1242_v23, %v1242_v23  ;;  %v2161_v32 = vsel %vm1516_vm3, %v1242_v23, -inf  ;;  %v1215_v42 = vrot.slane %v1201_v57, %v6325_v36  ;;  %v6611_v57 = vpop.f32.mrb[10].mxu1 }
 0x15c   : > { %v1662_v62 = vrot.slane %v1661_v28, 1  ;;  %v1668_v43 = vmax.f32 %v1666_v26, %v1667_v38  ;;  %v1675_v44 = vmax.f32 %v1673_v18, %v1674_v41  ;;  %v1681_v45 = vrot.slane %v1680_v20, 2 }
 0x15d   : > { %v1251_v8 = vcombine.high %v1249_v25, %v1249_v25  ;;  %v2162_v52 = vrot.slane %v2161_v32, 4  ;;  %v2168_v55 = vsel %vm1516_vm3, %v1250_v9, -inf  ;;  %v2175_v58 = vsel %vm1516_vm3, %v1249_v25, -inf }
 0x15e   : > { %v1663_v59 = vmax.f32 %v1661_v28, %v1662_v62  ;;  %v1669_v63 = vrot.slane %v1668_v43, 1  ;;  %v1676_v1 = vrot.slane %v1675_v44, 1  ;;  %v1682_v22 = vmax.f32 %v1680_v20, %v1681_v45 }
 0x15f   : > { %v2163_v5 = vmax.f32 %v2161_v32, %v2162_v52  ;;  %v2169_v14 = vrot.slane %v2168_v55, 4  ;;  %v2176_v6 = vrot.slane %v2175_v58, 4  ;;  %v2182_v7 = vsel %vm1516_vm3, %v1251_v8, -inf }
 0x160   : > { %v1670_v12 = vmax.f32 %v1668_v43, %v1669_v63  ;;  %v1677_v10 = vmax.f32 %v1675_v44, %v1676_v1  ;;  %v1683_v60 = vrot.slane %v1682_v22, 1  ;;  %v2450_v11 = vsel %vm2413_vm4, %v1663_v59, -inf }
 0x161   : > { %v2452_v33 = vmax.f32 %v2450_v11, %v6545_v56  ;;  %v2164_v24 = vrot.slane %v2163_v5, 2  ;;  %v2170_v31 = vmax.f32 %v2168_v55, %v2169_v14  ;;  %v2177_v61 = vmax.f32 %v2175_v58, %v2176_v6 }
 0x162   : > { %v1684_v13 = vmax.f32 %v1682_v22, %v1683_v60  ;;  %v2453_v16 = vsel %vm2413_vm4, %v1670_v12, -inf  ;;  %v2456_v3 = vsel %vm2413_vm4, %v1677_v10, -inf  ;;  %v2183_v48 = vrot.slane %v2182_v7, 4  ;;  %v6633_v12 = vld [vmem:[%s7730_s3] ss:$0 sm:$0xff] }
 0x163   : > { %v2455_v17 = vmax.f32 %v2453_v16, %v6551_v46  ;;  %v2458_v53 = vmax.f32 %v2456_v3, %v6554_v50  ;;  %v2710_v26 = vsel %vm2699_vm8, %v2452_v33, %v6569_v4  ;;  %v2165_v18 = vmax.f32 %v2163_v5, %v2164_v24 }
 0x164   : > { %v2459_v19 = vsel %vm2413_vm4, %v1684_v13, -inf  ;;  %v2171_v56 = vrot.slane %v2170_v31, 2  ;;  %v2178_v21 = vrot.slane %v2177_v61, 2  ;;  %v2184_v23 = vmax.f32 %v2182_v7, %v2183_v48  ;;  %v6643_v48 = vld [vmem:[%s7729_s2] ss:$0 sm:$0xff] }
 0x165   : > { %v2461_v28 = vmax.f32 %v2459_v19, %v6558_v51  ;;  %v2711_v38 = vsel %vm2701_vm9, %v2455_v17, %v2710_v26  ;;  %v2166_v41 = vrot.slane %v2165_v18, 1  ;;  %v1216_v46 = vcombine.high %v6594_v27, %v6594_v27 }
 0x166   : > { %v2712_v50 = vsel %vm2703_vm10, %v2458_v53, %v2711_v38  ;;  %v2172_v20 = vmax.f32 %v2170_v31, %v2171_v56  ;;  %v2179_v4 = vmax.f32 %v2177_v61, %v2178_v21  ;;  %v2185_v25 = vrot.slane %v2184_v23, 2 }
 0x167   : > { %v2713_v9 = vsel %vm2705_vm11, %v2461_v28, %v2712_v50  ;;  %v2167_v32 = vmax.f32 %v2165_v18, %v2166_v41  ;;  %v1217_v62 = vcombine.high %v1215_v42, %v1215_v42  ;;  %v2105_v43 = vsel %vm1516_vm3, %v6594_v27, -inf  ;;  %v6628_v27 = vpop.f32.mrb[14].mxu0 }
 0x168   : > { %2765 = vst.msk [vmem:[#allocation2 + $0x21] sm:$0xff] %vm2413_vm4, %v2713_v9  ;;  %v2173_v51 = vrot.slane %v2172_v20, 1  ;;  %v2180_v44 = vrot.slane %v2179_v4, 1  ;;  %v2186_v45 = vmax.f32 %v2184_v23, %v2185_v25  ;;  %v2106_v8 = vrot.slane %v2105_v43, 4 }
 0x169   : > { %v6623_v52 = vsel %vm2413_vm4, %v2167_v32, -inf  ;;  %v2112_v55 = vsel %vm1516_vm3, %v1216_v46, -inf  ;;  %v2119_v58 = vsel %vm1516_vm3, %v1215_v42, -inf  ;;  %v2126_v59 = vsel %vm1516_vm3, %v1217_v62, -inf }
 0x16a   : > { %v2174_v63 = vmax.f32 %v2172_v20, %v2173_v51  ;;  %v2181_v1 = vmax.f32 %v2179_v4, %v2180_v44  ;;  %v2187_v22 = vrot.slane %v2186_v45, 1  ;;  %v2107_v5 = vmax.f32 %v2105_v43, %v2106_v8 }
 0x16b   : > { %v2113_v14 = vrot.slane %v2112_v55, 4  ;;  %v2120_v6 = vrot.slane %v2119_v58, 4  ;;  %v2127_v7 = vrot.slane %v2126_v59, 4  ;;  %v774_v10 = vadd.f32 %v6633_v12, %v6588_v29 }
 0x16c   : > { %v2188_v42 = vmax.f32 %v2186_v45, %v2187_v22  ;;  %v2550_v60 = vsel %vm2413_vm4, %v2174_v63, -inf  ;;  %v2553_v11 = vsel %vm2413_vm4, %v2181_v1, -inf  ;;  %v2108_v33 = vrot.slane %v2107_v5, 2 }
 0x16d   : > { %v2114_v24 = vmax.f32 %v2112_v55, %v2113_v14  ;;  %v2121_v31 = vmax.f32 %v2119_v58, %v2120_v6  ;;  %v2128_v61 = vmax.f32 %v2126_v59, %v2127_v7  ;;  %v806_v13 = vmax.f32 %v774_v10, 0.0 }
 0x16e   : > { %v2556_v16 = vsel %vm2413_vm4, %v2188_v42, -inf  ;;  %v2109_v3 = vmax.f32 %v2107_v5, %v2108_v33  ;;  %v733_v29 = vmul.f32 %v6643_v48, %v6370_v15  ;;  %v719_v17 = vmul.f32 %v6643_v48, %v6376_v39 }
 0x16f   : > { %v2115_v53 = vrot.slane %v2114_v24, 2  ;;  %v2122_v26 = vrot.slane %v2121_v31, 2  ;;  %v2129_v18 = vrot.slane %v2128_v61, 2  ;;  %v1286_v19 = vcombine.high %v806_v13, %v806_v13 }
 0x170   : > { %v2110_v56 = vrot.slane %v2109_v3, 1  ;;  %v1293_v21 = vrot.slane %v806_v13, %v6325_v36  ;;  %v772_v23 = vadd.f32 %v6633_v12, %v733_v29  ;;  %v758_v28 = vadd.f32 %v6633_v12, %v719_v17  ;;  %v6664_v29 = vpop.f32.mrb[11].mxu1 }
 0x171   : > { %v2116_v38 = vmax.f32 %v2114_v24, %v2115_v53  ;;  %v2123_v41 = vmax.f32 %v2121_v31, %v2122_v26  ;;  %v2130_v46 = vmax.f32 %v2128_v61, %v2129_v18  ;;  %v1300_v50 = vrot.slane %v1286_v19, %v6325_v36 }
 0x172   : > { %v2111_v15 = vmax.f32 %v2109_v3, %v2110_v56  ;;  %v1301_v20 = vcombine.high %v1293_v21, %v1293_v21  ;;  %v2245_v39 = vsel %vm1516_vm3, %v1293_v21, -inf  ;;  %v804_v4 = vmax.f32 %v772_v23, 0.0 }
 0x173   : > { %v2117_v25 = vrot.slane %v2116_v38, 1  ;;  %v2124_v9 = vrot.slane %v2123_v41, 1  ;;  %v2131_v32 = vrot.slane %v2130_v46, 1  ;;  %v1302_v62 = vcombine.high %v1300_v50, %v1300_v50 }
 0x174   : > { %v2546_v43 = vsel %vm2413_vm4, %v2111_v15, -inf  ;;  %v2246_v51 = vrot.slane %v2245_v39, 4  ;;  %v2252_v44 = vsel %vm1516_vm3, %v1301_v20, -inf  ;;  %v2259_v45 = vsel %vm1516_vm3, %v1300_v50, -inf }
 0x175   : > { %v2118_v8 = vmax.f32 %v2116_v38, %v2117_v25  ;;  %v2125_v55 = vmax.f32 %v2123_v41, %v2124_v9  ;;  %v2132_v58 = vmax.f32 %v2130_v46, %v2131_v32  ;;  %v2548_v59 = vmax.f32 %v2546_v43, %v6623_v52 }
 0x176   : > { %v2247_v63 = vmax.f32 %v2245_v39, %v2246_v51  ;;  %v2253_v1 = vrot.slane %v2252_v44, 4  ;;  %v2260_v22 = vrot.slane %v2259_v45, 4  ;;  %v2266_v5 = vsel %vm1516_vm3, %v1302_v62, -inf }
 0x177   : > { %v2549_v14 = vsel %vm2413_vm4, %v2118_v8, -inf  ;;  %v2552_v6 = vsel %vm2413_vm4, %v2125_v55, -inf  ;;  %v2555_v7 = vsel %vm2413_vm4, %v2132_v58, -inf  ;;  %v2738_v10 = vsel %vm2699_vm8, %v2548_v59, %v6584_v0 }
 0x178   : > { %v2551_v42 = vmax.f32 %v2549_v14, %v2550_v60  ;;  %v2554_v33 = vmax.f32 %v2552_v6, %v2553_v11  ;;  %v2557_v24 = vmax.f32 %v2555_v7, %v2556_v16  ;;  %v2248_v31 = vrot.slane %v2247_v63, 2 }
 0x179   : > { %v2254_v61 = vmax.f32 %v2252_v44, %v2253_v1  ;;  %v2261_v52 = vmax.f32 %v2259_v45, %v2260_v22  ;;  %v2267_v13 = vrot.slane %v2266_v5, 4  ;;  %v1252_v3 = vcombine.high %v804_v4, %v804_v4 }
 0x17a   : > { %v2739_v17 = vsel %vm2701_vm9, %v2551_v42, %v2738_v10  ;;  %v2249_v53 = vmax.f32 %v2247_v63, %v2248_v31  ;;  %v1259_v26 = vrot.slane %v804_v4, %v6325_v36  ;;  %v790_v18 = vmax.f32 %v758_v28, 0.0  ;;  %v6679_v10 = vpop.f32.mrb[15].mxu0 }
 0x17b   : > { %v2740_v19 = vsel %vm2703_vm10, %v2554_v33, %v2739_v17  ;;  %v2255_v56 = vrot.slane %v2254_v61, 2  ;;  %v2262_v0 = vrot.slane %v2261_v52, 2  ;;  %v2268_v60 = vmax.f32 %v2266_v5, %v2267_v13 }
 0x17c   : > { %v2741_v11 = vsel %vm2705_vm11, %v2557_v24, %v2740_v19  ;;  %v2250_v16 = vrot.slane %v2249_v53, 1  ;;  %v1266_v21 = vrot.slane %v1252_v3, %v6325_v36  ;;  %v1267_v23 = vcombine.high %v1259_v26, %v1259_v26 }
 0x17d   : > { %2769 = vst.msk [vmem:[#allocation2 + $0x61] sm:$0xff] %vm2413_vm4, %v2741_v11  ;;  %v2256_v38 = vmax.f32 %v2254_v61, %v2255_v56  ;;  %v2263_v41 = vmax.f32 %v2261_v52, %v2262_v0  ;;  %v2269_v46 = vrot.slane %v2268_v60, 2  ;;  %v2189_v50 = vsel %vm1516_vm3, %v1259_v26, -inf }
 0x17e   : > { %v2251_v15 = vmax.f32 %v2249_v53, %v2250_v16  ;;  %v1268_v28 = vcombine.high %v1266_v21, %v1266_v21  ;;  %v2190_v20 = vrot.slane %v2189_v50, 4  ;;  %v2196_v39 = vsel %vm1516_vm3, %v1267_v23, -inf }
 0x17f   : > { %v2257_v4 = vrot.slane %v2256_v38, 1  ;;  %v2264_v25 = vrot.slane %v2263_v41, 1  ;;  %v2270_v9 = vmax.f32 %v2268_v60, %v2269_v46  ;;  %v2197_v32 = vrot.slane %v2196_v39, 4 }
 0x180   : > { %v2559_v62 = vsel %vm2413_vm4, %v2251_v15, -inf  ;;  %v2191_v43 = vmax.f32 %v2189_v50, %v2190_v20  ;;  %v2203_v51 = vsel %vm1516_vm3, %v1266_v21, -inf  ;;  %v2210_v44 = vsel %vm1516_vm3, %v1268_v28, -inf }
 0x181   : > { %v2258_v45 = vmax.f32 %v2256_v38, %v2257_v4  ;;  %v2265_v8 = vmax.f32 %v2263_v41, %v2264_v25  ;;  %v2271_v55 = vrot.slane %v2270_v9, 1  ;;  %v2198_v58 = vmax.f32 %v2196_v39, %v2197_v32 }
 0x182   : > { %v2192_v59 = vrot.slane %v2191_v43, 2  ;;  %v2204_v63 = vrot.slane %v2203_v51, 4  ;;  %v2211_v1 = vrot.slane %v2210_v44, 4  ;;  %v1014_v22 = vcombine.high %v790_v18, %v790_v18 }
 0x183   : > { %v2272_v5 = vmax.f32 %v2270_v9, %v2271_v55  ;;  %v2562_v14 = vsel %vm2413_vm4, %v2258_v45, -inf  ;;  %v2565_v6 = vsel %vm2413_vm4, %v2265_v8, -inf  ;;  %v2199_v7 = vrot.slane %v2198_v58, 2 }
 0x184   : > { %v2193_v42 = vmax.f32 %v2191_v43, %v2192_v59  ;;  %v2205_v33 = vmax.f32 %v2203_v51, %v2204_v63  ;;  %v2212_v24 = vmax.f32 %v2210_v44, %v2211_v1  ;;  %v1021_v31 = vrot.slane %v790_v18, %v6325_v36 }
 0x185   : > { %v6683_v61 = vsel %vm2413_vm4, %v2272_v5, -inf  ;;  %v2200_v52 = vmax.f32 %v2198_v58, %v2199_v7  ;;  %v1028_v13 = vrot.slane %v1014_v22, %v6325_v36  ;;  %v717_v3 = vmul.f32 %v6643_v48, %v6378_v54 }
 0x186   : > { %v2194_v17 = vrot.slane %v2193_v42, 1  ;;  %v2206_v53 = vrot.slane %v2205_v33, 2  ;;  %v2213_v26 = vrot.slane %v2212_v24, 2  ;;  %v1029_v19 = vcombine.high %v1021_v31, %v1021_v31 }
 0x187   : > { %v2201_v56 = vrot.slane %v2200_v52, 1  ;;  %v1030_v0 = vcombine.high %v1028_v13, %v1028_v13  ;;  %v1797_v60 = vsel %vm1516_vm3, %v1021_v31, -inf  ;;  %v1811_v11 = vsel %vm1516_vm3, %v1028_v13, -inf }
 0x188   : > { %v2195_v18 = vmax.f32 %v2193_v42, %v2194_v17  ;;  %v2207_v16 = vmax.f32 %v2205_v33, %v2206_v53  ;;  %v2214_v21 = vmax.f32 %v2212_v24, %v2213_v26  ;;  %v1798_v23 = vrot.slane %v1797_v60, 4 }
 0x189   : > { %v2202_v38 = vmax.f32 %v2200_v52, %v2201_v56  ;;  %v1804_v41 = vsel %vm1516_vm3, %v1029_v19, -inf  ;;  %v1812_v46 = vrot.slane %v1811_v11, 4  ;;  %v1818_v54 = vsel %vm1516_vm3, %v1030_v0, -inf }
 0x18a   : > { %v2208_v50 = vrot.slane %v2207_v16, 1  ;;  %v2215_v15 = vrot.slane %v2214_v21, 1  ;;  %v2558_v28 = vsel %vm2413_vm4, %v2195_v18, -inf  ;;  %v1799_v20 = vmax.f32 %v1797_v60, %v1798_v23 }
 0x18b   : > { %v2560_v39 = vmax.f32 %v2558_v28, %v2559_v62  ;;  %v2561_v4 = vsel %vm2413_vm4, %v2202_v38, -inf  ;;  %v1805_v25 = vrot.slane %v1804_v41, 4  ;;  %v1813_v9 = vmax.f32 %v1811_v11, %v1812_v46 }
 0x18c   : > { %v2209_v32 = vmax.f32 %v2207_v16, %v2208_v50  ;;  %v2216_v43 = vmax.f32 %v2214_v21, %v2215_v15  ;;  %v2563_v51 = vmax.f32 %v2561_v4, %v2562_v14  ;;  %v1800_v44 = vrot.slane %v1799_v20, 2 }
 0x18d   : > { %v1806_v45 = vmax.f32 %v1804_v41, %v1805_v25  ;;  %v1814_v8 = vrot.slane %v1813_v9, 2  ;;  %v1819_v55 = vrot.slane %v1818_v54, 4  ;;  %v756_v58 = vadd.f32 %v6633_v12, %v717_v3 }
 0x18e   : > { %v2564_v59 = vsel %vm2413_vm4, %v2209_v32, -inf  ;;  %v6697_v63 = vsel %vm2413_vm4, %v2216_v43, -inf  ;;  %v2742_v62 = vsel %vm2693_vm5, %v2563_v51, %v2560_v39  ;;  %v1801_v1 = vmax.f32 %v1799_v20, %v1800_v44 }
 0x18f   : > { %v2566_v22 = vmax.f32 %v2564_v59, %v2565_v6  ;;  %v2569_v5 = vmax.f32 %v6697_v63, %v6683_v61  ;;  %v1807_v7 = vrot.slane %v1806_v45, 2  ;;  %v1815_v14 = vmax.f32 %v1813_v9, %v1814_v8  ;;  %v6709_v6 = vpop.f32.mrb[16].mxu0 }
 0x190   : > { %v1802_v42 = vrot.slane %v1801_v1, 1  ;;  %v1820_v33 = vmax.f32 %v1818_v54, %v1819_v55  ;;  %v788_v24 = vmax.f32 %v756_v58, 0.0  ;;  %v736_v31 = vmul.f32 %v6643_v48, %v6408_v47 }
 0x191   : > { %v6705_v52 = vsel %vm2695_vm6, %v2566_v22, %v2742_v62  ;;  %v1808_v13 = vmax.f32 %v1806_v45, %v1807_v7  ;;  %v1816_v3 = vrot.slane %v1815_v14, 1  ;;  %v720_v17 = vmul.f32 %v6643_v48, %v6417_v37 }
 0x192   : > { %v1803_v53 = vmax.f32 %v1801_v1, %v1802_v42  ;;  %v1821_v26 = vrot.slane %v1820_v33, 2  ;;  %v980_v19 = vcombine.high %v788_v24, %v788_v24  ;;  %v987_v56 = vrot.slane %v788_v24, %v6325_v36 }
 0x193   : > { %v1809_v0 = vrot.slane %v1808_v13, 1  ;;  %v1817_v60 = vmax.f32 %v1815_v14, %v1816_v3  ;;  %v775_v11 = vadd.f32 %v6633_v12, %v736_v31  ;;  %v759_v47 = vadd.f32 %v6633_v12, %v720_v17  ;;  %v6735_v3 = vpop.f32.mrb[17].mxu0 }
 0x194   : > { %v1822_v18 = vmax.f32 %v1820_v33, %v1821_v26  ;;  %v6715_v16 = vsel %vm2413_vm4, %v1803_v53, -inf  ;;  %v994_v21 = vrot.slane %v980_v19, %v6325_v36  ;;  %v995_v37 = vcombine.high %v987_v56, %v987_v56 }
 0x195   : > { %v1810_v23 = vmax.f32 %v1808_v13, %v1809_v0  ;;  %v6719_v38 = vsel %vm2413_vm4, %v1817_v60, -inf  ;;  %v1741_v41 = vsel %vm1516_vm3, %v987_v56, -inf  ;;  %v807_v46 = vmax.f32 %v775_v11, 0.0 }
 0x196   : > { %v1823_v54 = vrot.slane %v1822_v18, 1  ;;  %v996_v50 = vcombine.high %v994_v21, %v994_v21  ;;  %v1742_v15 = vrot.slane %v1741_v41, 4  ;;  %v1748_v28 = vsel %vm1516_vm3, %v995_v37, -inf }
 0x197   : > { %v6724_v20 = vsel %vm2413_vm4, %v1810_v23, -inf  ;;  %v1749_v39 = vrot.slane %v1748_v28, 4  ;;  %v1755_v4 = vsel %vm1516_vm3, %v994_v21, -inf  ;;  %v1303_v25 = vcombine.high %v807_v46, %v807_v46 }
 0x198   : > { %v1824_v9 = vmax.f32 %v1822_v18, %v1823_v54  ;;  %v1743_v32 = vmax.f32 %v1741_v41, %v1742_v15  ;;  %v1756_v43 = vrot.slane %v1755_v4, 4  ;;  %v1762_v51 = vsel %vm1516_vm3, %v996_v50, -inf }
 0x199   : > { %v1750_v44 = vmax.f32 %v1748_v28, %v1749_v39  ;;  %v1763_v45 = vrot.slane %v1762_v51, 4  ;;  %v1310_v8 = vrot.slane %v807_v46, %v6325_v36  ;;  %v1317_v55 = vrot.slane %v1303_v25, %v6325_v36 }
 0x19a   : > { %v6731_v58 = vsel %vm2413_vm4, %v1824_v9, -inf  ;;  %v1744_v59 = vrot.slane %v1743_v32, 2  ;;  %v1757_v62 = vmax.f32 %v1755_v4, %v1756_v43  ;;  %v791_v1 = vmax.f32 %v759_v47, 0.0 }
 0x19b   : > { %v1751_v22 = vrot.slane %v1750_v44, 2  ;;  %v1764_v7 = vmax.f32 %v1762_v51, %v1763_v45  ;;  %v1318_v14 = vcombine.high %v1310_v8, %v1310_v8  ;;  %v1319_v42 = vcombine.high %v1317_v55, %v1317_v55 }
 0x19c   : > { %v1745_v33 = vmax.f32 %v1743_v32, %v1744_v59  ;;  %v1758_v24 = vrot.slane %v1757_v62, 2  ;;  %v2273_v31 = vsel %vm1516_vm3, %v1310_v8, -inf  ;;  %v2287_v13 = vsel %vm1516_vm3, %v1317_v55, -inf  ;;  %v6742_v8 = vpop.f32.mrb[18].mxu0 }
 0x19d   : > { %v1752_v17 = vmax.f32 %v1750_v44, %v1751_v22  ;;  %v1765_v53 = vrot.slane %v1764_v7, 2  ;;  %v2274_v26 = vrot.slane %v2273_v31, 4  ;;  %v2280_v19 = vsel %vm1516_vm3, %v1318_v14, -inf }
 0x19e   : > { %v1746_v56 = vrot.slane %v1745_v33, 1  ;;  %v1759_v0 = vmax.f32 %v1757_v62, %v1758_v24  ;;  %v2281_v60 = vrot.slane %v2280_v19, 4  ;;  %v2288_v11 = vrot.slane %v2287_v13, 4 }
 0x19f   : > { %v1753_v47 = vrot.slane %v1752_v17, 1  ;;  %v1766_v18 = vmax.f32 %v1764_v7, %v1765_v53  ;;  %v2275_v21 = vmax.f32 %v2273_v31, %v2274_v26  ;;  %v2294_v37 = vsel %vm1516_vm3, %v1319_v42, -inf }
 0x1a0   : > { %v1747_v23 = vmax.f32 %v1745_v33, %v1746_v56  ;;  %v1760_v41 = vrot.slane %v1759_v0, 1  ;;  %v2282_v46 = vmax.f32 %v2280_v19, %v2281_v60  ;;  %v2289_v54 = vmax.f32 %v2287_v13, %v2288_v11 }
 0x1a1   : > { %v1754_v50 = vmax.f32 %v1752_v17, %v1753_v47  ;;  %v1767_v15 = vrot.slane %v1766_v18, 1  ;;  %v2276_v28 = vrot.slane %v2275_v21, 2  ;;  %v2295_v39 = vrot.slane %v2294_v37, 4 }
 0x1a2   : > { %v1761_v4 = vmax.f32 %v1759_v0, %v1760_v41  ;;  %v2462_v25 = vsel %vm2413_vm4, %v1747_v23, -inf  ;;  %v2283_v9 = vrot.slane %v2282_v46, 2  ;;  %v2290_v32 = vrot.slane %v2289_v54, 2 }
 0x1a3   : > { %v1768_v43 = vmax.f32 %v1766_v18, %v1767_v15  ;;  %v2464_v51 = vmax.f32 %v2462_v25, %v6715_v16  ;;  %v2465_v44 = vsel %vm2413_vm4, %v1754_v50, -inf  ;;  %v2277_v45 = vmax.f32 %v2275_v21, %v2276_v28 }
 0x1a4   : > { %v2467_v55 = vmax.f32 %v2465_v44, %v6724_v20  ;;  %v2468_v59 = vsel %vm2413_vm4, %v1761_v4, -inf  ;;  %v2284_v62 = vmax.f32 %v2282_v46, %v2283_v9  ;;  %v2291_v22 = vmax.f32 %v2289_v54, %v2290_v32 }
 0x1a5   : > { %v2470_v7 = vmax.f32 %v2468_v59, %v6719_v38  ;;  %v2471_v14 = vsel %vm2413_vm4, %v1768_v43, -inf  ;;  %v2278_v42 = vrot.slane %v2277_v45, 1  ;;  %v2296_v33 = vmax.f32 %v2294_v37, %v2295_v39 }
 0x1a6   : > { %v2473_v24 = vmax.f32 %v2471_v14, %v6731_v58  ;;  %v2714_v16 = vsel %vm2693_vm5, %v2467_v55, %v2464_v51  ;;  %v2285_v31 = vrot.slane %v2284_v62, 1  ;;  %v2292_v13 = vrot.slane %v2291_v22, 1 }
 0x1a7   : > { %v2715_v17 = vsel %vm2695_vm6, %v2470_v7, %v2714_v16  ;;  %v2279_v53 = vmax.f32 %v2277_v45, %v2278_v42  ;;  %v2297_v20 = vrot.slane %v2296_v33, 2  ;;  %v1031_v26 = vcombine.high %v791_v1, %v791_v1  ;;  %v6790_v42 = vpop.f32.mrb[19].mxu0 }
 0x1a8   : > { %v2286_v19 = vmax.f32 %v2284_v62, %v2285_v31  ;;  %v2293_v56 = vmax.f32 %v2291_v22, %v2292_v13  ;;  %v1038_v0 = vrot.slane %v791_v1, %v6325_v36  ;;  %v734_v38 = vmul.f32 %v6643_v48, %v6454_v34 }
 0x1a9   : > { %v2298_v60 = vmax.f32 %v2296_v33, %v2297_v20  ;;  %v6755_v11 = vsel %vm2413_vm4, %v2279_v53, -inf  ;;  %v1045_v58 = vrot.slane %v1031_v26, %v6325_v36  ;;  %v6763_v47 = vsel %vm2697_vm7, %v2569_v5, %v6705_v52 }
 0x1aa   : > { %v6766_v18 = vsel %vm2413_vm4, %v2286_v19, -inf  ;;  %v6769_v1 = vsel %vm2413_vm4, %v2293_v56, -inf  ;;  %v1046_v34 = vcombine.high %v1038_v0, %v1038_v0  ;;  %v1825_v21 = vsel %vm1516_vm3, %v1038_v0, -inf }
 0x1ab   : > { %v2299_v37 = vrot.slane %v2298_v60, 1  ;;  %v1047_v23 = vcombine.high %v1045_v58, %v1045_v58  ;;  %v1826_v41 = vrot.slane %v1825_v21, 4  ;;  %v1839_v46 = vsel %vm1516_vm3, %v1045_v58, -inf }
 0x1ac   : > { %v1832_v54 = vsel %vm1516_vm3, %v1046_v34, -inf  ;;  %v1840_v61 = vrot.slane %v1839_v46, 4  ;;  %v773_v63 = vadd.f32 %v6633_v12, %v734_v38  ;;  %v718_v5 = vmul.f32 %v6643_v48, %v6470_v35 }
 0x1ad   : > { %v2300_v52 = vmax.f32 %v2298_v60, %v2299_v37  ;;  %v1827_v50 = vmax.f32 %v1825_v21, %v1826_v41  ;;  %v1833_v15 = vrot.slane %v1832_v54, 4  ;;  %v1846_v28 = vsel %vm1516_vm3, %v1047_v23, -inf }
 0x1ae   : > { %v1841_v39 = vmax.f32 %v1839_v46, %v1840_v61  ;;  %v1847_v4 = vrot.slane %v1846_v28, 4  ;;  %v805_v25 = vmax.f32 %v773_v63, 0.0  ;;  %v757_v9 = vadd.f32 %v6633_v12, %v718_v5 }
 0x1af   : > { %v6780_v32 = vsel %vm2413_vm4, %v2300_v52, -inf  ;;  %v1828_v43 = vrot.slane %v1827_v50, 2  ;;  %v1834_v51 = vmax.f32 %v1832_v54, %v1833_v15  ;;  %v6783_v44 = vsel %vm2697_vm7, %v2473_v24, %v2715_v17 }
 0x1b0   : > { %v1842_v45 = vrot.slane %v1841_v39, 2  ;;  %v1848_v35 = vmax.f32 %v1846_v28, %v1847_v4  ;;  %v1269_v55 = vcombine.high %v805_v25, %v805_v25  ;;  %v1276_v59 = vrot.slane %v805_v25, %v6325_v36 }
 0x1b1   : > { %v1829_v62 = vmax.f32 %v1827_v50, %v1828_v43  ;;  %v1835_v22 = vrot.slane %v1834_v51, 2  ;;  %v789_v7 = vmax.f32 %v757_v9, 0.0  ;;  %v6788_v14 = vmul.f32 %v6643_v48, %v6499_v30 }
 0x1b2   : > { %v1843_v33 = vmax.f32 %v1841_v39, %v1842_v45  ;;  %v1849_v16 = vrot.slane %v1848_v35, 2  ;;  %v1283_v31 = vrot.slane %v1269_v55, %v6325_v36  ;;  %v1284_v24 = vcombine.high %v1276_v59, %v1276_v59 }
 0x1b3   : > { %v1830_v13 = vrot.slane %v1829_v62, 1  ;;  %v1836_v17 = vmax.f32 %v1834_v51, %v1835_v22  ;;  %v2217_v53 = vsel %vm1516_vm3, %v1276_v59, -inf  ;;  %v997_v20 = vcombine.high %v789_v7, %v789_v7 }
 0x1b4   : > { %v1844_v26 = vrot.slane %v1843_v33, 1  ;;  %v1850_v19 = vmax.f32 %v1848_v35, %v1849_v16  ;;  %v1285_v56 = vcombine.high %v1283_v31, %v1283_v31  ;;  %v2218_v0 = vrot.slane %v2217_v53, 4 }
 0x1b5   : > { %v1831_v38 = vmax.f32 %v1829_v62, %v1830_v13  ;;  %v1837_v60 = vrot.slane %v1836_v17, 1  ;;  %v2224_v30 = vsel %vm1516_vm3, %v1284_v24, -inf  ;;  %v2231_v58 = vsel %vm1516_vm3, %v1283_v31, -inf }
 0x1b6   : > { %v1845_v34 = vmax.f32 %v1843_v33, %v1844_v26  ;;  %v1851_v21 = vrot.slane %v1850_v19, 1  ;;  %v2219_v37 = vmax.f32 %v2217_v53, %v2218_v0  ;;  %v2225_v23 = vrot.slane %v2224_v30, 4 }
 0x1b7   : > { %v1838_v41 = vmax.f32 %v1836_v17, %v1837_v60  ;;  %v6797_v46 = vsel %vm2413_vm4, %v1831_v38, -inf  ;;  %v2232_v54 = vrot.slane %v2231_v58, 4  ;;  %v2238_v61 = vsel %vm1516_vm3, %v1285_v56, -inf }
 0x1b8   : > { %v1852_v63 = vmax.f32 %v1850_v19, %v1851_v21  ;;  %v6801_v5 = vsel %vm2413_vm4, %v1845_v34, -inf  ;;  %v2220_v52 = vrot.slane %v2219_v37, 2  ;;  %v2226_v50 = vmax.f32 %v2224_v30, %v2225_v23 }
 0x1b9   : > { %v6804_v15 = vsel %vm2413_vm4, %v1838_v41, -inf  ;;  %v2233_v28 = vmax.f32 %v2231_v58, %v2232_v54  ;;  %v2239_v39 = vrot.slane %v2238_v61, 4  ;;  %v1004_v4 = vrot.slane %v789_v7, %v6325_v36 }
 0x1ba   : > { %v6808_v25 = vsel %vm2413_vm4, %v1852_v63, -inf  ;;  %v2221_v9 = vmax.f32 %v2219_v37, %v2220_v52  ;;  %v2227_v43 = vrot.slane %v2226_v50, 2  ;;  %v1011_v51 = vrot.slane %v997_v20, %v6325_v36 }
 0x1bb   : > { %v2234_v45 = vrot.slane %v2233_v28, 2  ;;  %v2240_v35 = vmax.f32 %v2238_v61, %v2239_v39  ;;  %v1012_v55 = vcombine.high %v1004_v4, %v1004_v4  ;;  %v1769_v59 = vsel %vm1516_vm3, %v1004_v4, -inf }
 0x1bc   : > { %v2222_v62 = vrot.slane %v2221_v9, 1  ;;  %v2228_v22 = vmax.f32 %v2226_v50, %v2227_v43  ;;  %v1013_v33 = vcombine.high %v1011_v51, %v1011_v51  ;;  %v1770_v16 = vrot.slane %v1769_v59, 4 }
 0x1bd   : > { %v2235_v31 = vmax.f32 %v2233_v28, %v2234_v45  ;;  %v2241_v24 = vrot.slane %v2240_v35, 2  ;;  %v1776_v7 = vsel %vm1516_vm3, %v1012_v55, -inf  ;;  %v1783_v13 = vsel %vm1516_vm3, %v1011_v51, -inf }
 0x1be   : > { %v2223_v17 = vmax.f32 %v2221_v9, %v2222_v62  ;;  %v2229_v53 = vrot.slane %v2228_v22, 1  ;;  %v1771_v26 = vmax.f32 %v1769_v59, %v1770_v16  ;;  %v1777_v19 = vrot.slane %v1776_v7, 4 }
 0x1bf   : > { %v2236_v20 = vrot.slane %v2235_v31, 1  ;;  %v2242_v56 = vmax.f32 %v2240_v35, %v2241_v24  ;;  %v1784_v0 = vrot.slane %v1783_v13, 4  ;;  %v1790_v38 = vsel %vm1516_vm3, %v1013_v33, -inf }
 0x1c0   : > { %v2230_v60 = vmax.f32 %v2228_v22, %v2229_v53  ;;  %v2570_v30 = vsel %vm2413_vm4, %v2223_v17, -inf  ;;  %v1772_v58 = vrot.slane %v1771_v26, 2  ;;  %v1778_v34 = vmax.f32 %v1776_v7, %v1777_v19  ;;  %v6019_v19 = vld [vmem:[%s7731_s4 + $0x10] sm:$0xff]  }
 0x1c1   : > { %v2237_v21 = vmax.f32 %v2235_v31, %v2236_v20  ;;  %v2243_v37 = vrot.slane %v2242_v56, 1  ;;  %v2572_v23 = vmax.f32 %v2570_v30, %v6755_v11  ;;  %v1785_v41 = vmax.f32 %v1783_v13, %v1784_v0  ;;  %5642 = vmatprep.subr.bf16.mxu1 %v6019_v19 }
 0x1c2   : > { %v2573_v54 = vsel %vm2413_vm4, %v2230_v60, -inf  ;;  %v1773_v61 = vmax.f32 %v1771_v26, %v1772_v58  ;;  %v1779_v63 = vrot.slane %v1778_v34, 2  ;;  %v1791_v52 = vrot.slane %v1790_v38, 4  ;;  %5643 = vmatpush3.bf16.msra.mxu1 %v6019_v19 }
 0x1c3   : > { %v2244_v50 = vmax.f32 %v2242_v56, %v2243_v37  ;;  %v2575_v28 = vmax.f32 %v2573_v54, %v6766_v18  ;;  %v2576_v39 = vsel %vm2413_vm4, %v2237_v21, -inf  ;;  %v2745_v4 = vsel %vm2699_vm8, %v2572_v23, %v6763_v47 }
 0x1c4   : > { %v2578_v9 = vmax.f32 %v2576_v39, %v6769_v1  ;;  %v1774_v43 = vrot.slane %v1773_v61, 1  ;;  %v1780_v51 = vmax.f32 %v1778_v34, %v1779_v63  ;;  %v1786_v45 = vrot.slane %v1785_v41, 2 }
 0x1c5   : > { %v2579_v11 = vsel %vm2413_vm4, %v2244_v50, -inf  ;;  %v2746_v35 = vsel %vm2701_vm9, %v2575_v28, %v2745_v4  ;;  %v1792_v55 = vmax.f32 %v1790_v38, %v1791_v52  ;;  %v778_v59 = vadd.f32 %v6633_v12, %v6788_v14 }
 0x1c6   : > { %v2581_v18 = vmax.f32 %v2579_v11, %v6780_v32  ;;  %v2747_v62 = vsel %vm2703_vm10, %v2578_v9, %v2746_v35  ;;  %v1775_v22 = vmax.f32 %v1773_v61, %v1774_v43  ;;  %v1781_v33 = vrot.slane %v1780_v51, 1 }
 0x1c7   : > { %v1787_v47 = vmax.f32 %v1785_v41, %v1786_v45  ;;  %v1793_v16 = vrot.slane %v1792_v55, 2  ;;  %v810_v1 = vmax.f32 %v778_v59, 0.0  ;;  %v737_v31 = vmul.f32 %v6643_v48, %v6536_v40 }
 0x1c8   : > { %v2748_v24 = vsel %vm2705_vm11, %v2581_v18, %v2747_v62  ;;  %v1782_v7 = vmax.f32 %v1780_v51, %v1781_v33  ;;  %v2474_v13 = vsel %vm2413_vm4, %v1775_v22, -inf  ;;  %v723_v14 = vmul.f32 %v6643_v48, %v6547_v2 }
 0x1c9   : > { %2770 = vst.msk [vmem:[#allocation2 + $0x71] sm:$0xff] %vm2413_vm4, %v2748_v24  ;;  %v1788_v32 = vrot.slane %v1787_v47, 1  ;;  %v1794_v17 = vmax.f32 %v1792_v55, %v1793_v16  ;;  %v2476_v53 = vmax.f32 %v2474_v13, %v6797_v46  ;;  %v1354_v26 = vcombine.high %v810_v1, %v810_v1 }
 0x1ca   : > { %v2477_v40 = vsel %vm2413_vm4, %v1782_v7, -inf  ;;  %v1361_v20 = vrot.slane %v810_v1, %v6325_v36  ;;  %v776_v56 = vadd.f32 %v6633_v12, %v737_v31  ;;  %v762_v0 = vadd.f32 %v6633_v12, %v723_v14 }
 0x1cb   : > { %v1789_v2 = vmax.f32 %v1787_v47, %v1788_v32  ;;  %v1795_v38 = vrot.slane %v1794_v17, 1  ;;  %v2479_v60 = vmax.f32 %v2477_v40, %v6804_v15  ;;  %v2717_v46 = vsel %vm2699_vm8, %v2476_v53, %v6783_v44 }
 0x1cc   : > { %v1368_v30 = vrot.slane %v1354_v26, %v6325_v36  ;;  %v1369_v58 = vcombine.high %v1361_v20, %v1361_v20  ;;  %v2357_v34 = vsel %vm1516_vm3, %v1361_v20, -inf  ;;  %v808_v21 = vmax.f32 %v776_v56, 0.0 }
 0x1cd   : > { %v1796_v37 = vmax.f32 %v1794_v17, %v1795_v38  ;;  %v2480_v23 = vsel %vm2413_vm4, %v1789_v2, -inf  ;;  %v2718_v41 = vsel %vm2701_vm9, %v2479_v60, %v2717_v46  ;;  %v2358_v54 = vrot.slane %v2357_v34, 4  ;;  %v6020_v17 = vld [vmem:[%s7731_s4 + $0x18] sm:$0xff]   ;;  %v6872_v38 = vld [vmem:[%s7731_s4] sm:$0xff]  }
 0x1ce   : > { %v2482_v61 = vmax.f32 %v2480_v23, %v6801_v5  ;;  %v1370_v15 = vcombine.high %v1368_v30, %v1368_v30  ;;  %v2364_v63 = vsel %vm1516_vm3, %v1369_v58, -inf  ;;  %v2371_v44 = vsel %vm1516_vm3, %v1368_v30, -inf  ;;  %5644 = vmatprep.subr.bf16.mxu1 %v6020_v17 }
 0x1cf   : > { %v2483_v52 = vsel %vm2413_vm4, %v1796_v37, -inf  ;;  %v2359_v50 = vmax.f32 %v2357_v34, %v2358_v54  ;;  %v2365_v28 = vrot.slane %v2364_v63, 4  ;;  %v2372_v39 = vrot.slane %v2371_v44, 4  ;;  %5645 = vmatpush3.bf16.msra.mxu1 %v6020_v17 }
 0x1d0   : > { %v2485_v4 = vmax.f32 %v2483_v52, %v6808_v25  ;;  %v2719_v9 = vsel %vm2703_vm10, %v2482_v61, %v2718_v41  ;;  %v2378_v43 = vsel %vm1516_vm3, %v1370_v15, -inf  ;;  %v1320_v51 = vcombine.high %v808_v21, %v808_v21  ;;  %5654 = vmatprep.subr.bf16.mxu1 %v6872_v38 }
 0x1d1   : > { %v2360_v45 = vrot.slane %v2359_v50, 2  ;;  %v2366_v11 = vmax.f32 %v2364_v63, %v2365_v28  ;;  %v2373_v5 = vmax.f32 %v2371_v44, %v2372_v39  ;;  %v2379_v35 = vrot.slane %v2378_v43, 4 }
 0x1d2   : > { %v2720_v55 = vsel %vm2705_vm11, %v2485_v4, %v2719_v9  ;;  %v1327_v59 = vrot.slane %v808_v21, %v6325_v36  ;;  %v1334_v18 = vrot.slane %v1320_v51, %v6325_v36  ;;  %v794_v62 = vmax.f32 %v762_v0, 0.0 }
 0x1d3   : > { %2766 = vst.msk [vmem:[#allocation2 + $0x31] sm:$0xff] %vm2413_vm4, %v2720_v55  ;;  %v2361_v22 = vmax.f32 %v2359_v50, %v2360_v45  ;;  %v2367_v25 = vrot.slane %v2366_v11, 2  ;;  %v2374_v33 = vrot.slane %v2373_v5, 2  ;;  %v2380_v47 = vmax.f32 %v2378_v43, %v2379_v35 }
 0x1d4   : > { %v1335_v16 = vcombine.high %v1327_v59, %v1327_v59  ;;  %v1336_v1 = vcombine.high %v1334_v18, %v1334_v18  ;;  %v2301_v31 = vsel %vm1516_vm3, %v1327_v59, -inf  ;;  %v2315_v24 = vsel %vm1516_vm3, %v1334_v18, -inf }
 0x1d5   : > { %v2362_v7 = vrot.slane %v2361_v22, 1  ;;  %v2368_v13 = vmax.f32 %v2366_v11, %v2367_v25  ;;  %v2375_v14 = vmax.f32 %v2373_v5, %v2374_v33  ;;  %v2381_v32 = vrot.slane %v2380_v47, 2 }
 0x1d6   : > { %v2302_v53 = vrot.slane %v2301_v31, 4  ;;  %v2308_v26 = vsel %vm1516_vm3, %v1335_v16, -inf  ;;  %v2316_v19 = vrot.slane %v2315_v24, 4  ;;  %v2322_v40 = vsel %vm1516_vm3, %v1336_v1, -inf }
 0x1d7   : > { %v2363_v20 = vmax.f32 %v2361_v22, %v2362_v7  ;;  %v2369_v56 = vrot.slane %v2368_v13, 1  ;;  %v2376_v0 = vrot.slane %v2375_v14, 1  ;;  %v2382_v2 = vmax.f32 %v2380_v47, %v2381_v32 }
 0x1d8   : > { %v2303_v60 = vmax.f32 %v2301_v31, %v2302_v53  ;;  %v2309_v46 = vrot.slane %v2308_v26, 4  ;;  %v2317_v30 = vmax.f32 %v2315_v24, %v2316_v19  ;;  %v2323_v58 = vrot.slane %v2322_v40, 4 }
 0x1d9   : > { %v2370_v34 = vmax.f32 %v2368_v13, %v2369_v56  ;;  %v2377_v21 = vmax.f32 %v2375_v14, %v2376_v0  ;;  %v2383_v37 = vrot.slane %v2382_v2, 1  ;;  %v2583_v23 = vsel %vm2413_vm4, %v2363_v20, -inf }
 0x1da   : > { %v2304_v41 = vrot.slane %v2303_v60, 2  ;;  %v2310_v54 = vmax.f32 %v2308_v26, %v2309_v46  ;;  %v2318_v61 = vrot.slane %v2317_v30, 2  ;;  %v2324_v15 = vmax.f32 %v2322_v40, %v2323_v58 }
 0x1db   : > { %v2384_v63 = vmax.f32 %v2382_v2, %v2383_v37  ;;  %v2586_v44 = vsel %vm2413_vm4, %v2370_v34, -inf  ;;  %v2589_v52 = vsel %vm2413_vm4, %v2377_v21, -inf  ;;  %v1082_v50 = vcombine.high %v794_v62, %v794_v62 }
 0x1dc   : > { %v2305_v28 = vmax.f32 %v2303_v60, %v2304_v41  ;;  %v2311_v39 = vrot.slane %v2310_v54, 2  ;;  %v2319_v4 = vmax.f32 %v2317_v30, %v2318_v61  ;;  %v2325_v9 = vrot.slane %v2324_v15, 2 }
 0x1dd   : > { %v6879_v43 = vsel %vm2413_vm4, %v2384_v63, -inf  ;;  %v1089_v51 = vrot.slane %v794_v62, %v6325_v36  ;;  %v1096_v45 = vrot.slane %v1082_v50, %v6325_v36  ;;  %v721_v11 = vmul.f32 %v6643_v48, %v6590_v49 }
 0x1de   : > { %v2306_v5 = vrot.slane %v2305_v28, 1  ;;  %v2312_v35 = vmax.f32 %v2310_v54, %v2311_v39  ;;  %v2320_v55 = vrot.slane %v2319_v4, 1  ;;  %v2326_v59 = vmax.f32 %v2324_v15, %v2325_v9 }
 0x1df   : > { %v1097_v18 = vcombine.high %v1089_v51, %v1089_v51  ;;  %v1098_v22 = vcombine.high %v1096_v45, %v1096_v45  ;;  %v1909_v25 = vsel %vm1516_vm3, %v1089_v51, -inf  ;;  %v1923_v33 = vsel %vm1516_vm3, %v1096_v45, -inf }
 0x1e0   : > { %v2307_v47 = vmax.f32 %v2305_v28, %v2306_v5  ;;  %v2313_v16 = vrot.slane %v2312_v35, 1  ;;  %v2321_v1 = vmax.f32 %v2319_v4, %v2320_v55  ;;  %v2327_v31 = vrot.slane %v2326_v59, 1 }
 0x1e1   : > { %v1910_v62 = vrot.slane %v1909_v25, 4  ;;  %v1916_v24 = vsel %vm1516_vm3, %v1097_v18, -inf  ;;  %v1924_v7 = vrot.slane %v1923_v33, 4  ;;  %v1930_v49 = vsel %vm1516_vm3, %v1098_v22, -inf }
 0x1e2   : > { %v2314_v13 = vmax.f32 %v2312_v35, %v2313_v16  ;;  %v2328_v14 = vmax.f32 %v2326_v59, %v2327_v31  ;;  %v2582_v32 = vsel %vm2413_vm4, %v2307_v47, -inf  ;;  %v2588_v17 = vsel %vm2413_vm4, %v2321_v1, -inf }
 0x1e3   : > { %v2584_v53 = vmax.f32 %v2582_v32, %v2583_v23  ;;  %v2590_v26 = vmax.f32 %v2588_v17, %v2589_v52  ;;  %v1911_v19 = vmax.f32 %v1909_v25, %v1910_v62  ;;  %v1917_v40 = vrot.slane %v1916_v24, 4 }
 0x1e4   : > { %v2585_v20 = vsel %vm2413_vm4, %v2314_v13, -inf  ;;  %v6893_v56 = vsel %vm2413_vm4, %v2328_v14, -inf  ;;  %v1925_v0 = vmax.f32 %v1923_v33, %v1924_v7  ;;  %v1931_v2 = vrot.slane %v1930_v49, 4 }
 0x1e5   : > { %v2587_v60 = vmax.f32 %v2585_v20, %v2586_v44  ;;  %v2593_v46 = vmax.f32 %v6893_v56, %v6879_v43  ;;  %v1912_v30 = vrot.slane %v1911_v19, 2  ;;  %v1918_v58 = vmax.f32 %v1916_v24, %v1917_v40 }
 0x1e6   : > { %v1926_v34 = vrot.slane %v1925_v0, 2  ;;  %v1932_v21 = vmax.f32 %v1930_v49, %v1931_v2  ;;  %v760_v37 = vadd.f32 %v6633_v12, %v721_v11  ;;  %v740_v23 = vmul.f32 %v6643_v48, %v6611_v57  ;;  %v6909_v12 = vld [vmem:[%s7730_s3] ss:$0 sm:$0xff] }
 0x1e7   : > { %v2749_v41 = vsel %vm2693_vm5, %v2587_v60, %v2584_v53  ;;  %v1913_v54 = vmax.f32 %v1911_v19, %v1912_v30  ;;  %v1919_v61 = vrot.slane %v1918_v58, 2  ;;  %v724_v15 = vmul.f32 %v6643_v48, %v6628_v27 }
 0x1e8   : > { %v6904_v63 = vsel %vm2695_vm6, %v2590_v26, %v2749_v41  ;;  %v1927_v44 = vmax.f32 %v1925_v0, %v1926_v34  ;;  %v1933_v52 = vrot.slane %v1932_v21, 2  ;;  %v792_v50 = vmax.f32 %v760_v37, 0.0 }
 0x1e9   : > { %v1914_v28 = vrot.slane %v1913_v54, 1  ;;  %v1920_v39 = vmax.f32 %v1918_v58, %v1919_v61  ;;  %v779_v57 = vadd.f32 %v6909_v12, %v740_v23  ;;  %v763_v4 = vadd.f32 %v6909_v12, %v724_v15 }
 0x1ea   : > { %v1928_v9 = vrot.slane %v1927_v44, 1  ;;  %v1934_v51 = vmax.f32 %v1932_v21, %v1933_v52  ;;  %v1048_v27 = vcombine.high %v792_v50, %v792_v50  ;;  %v1055_v48 = vrot.slane %v792_v50, %v6325_v36 }
 0x1eb   : > { %v1915_v45 = vmax.f32 %v1913_v54, %v1914_v28  ;;  %v1921_v11 = vrot.slane %v1920_v39, 1  ;;  %v811_v5 = vmax.f32 %v779_v57, 0.0  ;;  %v6914_v35 = vmax.f32 %v763_v4, 0.0 }
 0x1ec   : > { %v1929_v55 = vmax.f32 %v1927_v44, %v1928_v9  ;;  %v1935_v59 = vrot.slane %v1934_v51, 1  ;;  %v1062_v18 = vrot.slane %v1048_v27, %v6325_v36  ;;  %v1063_v22 = vcombine.high %v1055_v48, %v1055_v48 }
 0x1ed   : > { %v1922_v25 = vmax.f32 %v1920_v39, %v1921_v11  ;;  %v6918_v33 = vsel %vm2413_vm4, %v1915_v45, -inf  ;;  %v1853_v47 = vsel %vm1516_vm3, %v1055_v48, -inf  ;;  %v1371_v16 = vcombine.high %v811_v5, %v811_v5 }
 0x1ee   : > { %v1936_v1 = vmax.f32 %v1934_v51, %v1935_v59  ;;  %v6922_v31 = vsel %vm2413_vm4, %v1929_v55, -inf  ;;  %v1064_v62 = vcombine.high %v1062_v18, %v1062_v18  ;;  %v1854_v24 = vrot.slane %v1853_v47, 4 }
 0x1ef   : > { %v6925_v7 = vsel %vm2413_vm4, %v1922_v25, -inf  ;;  %v1860_v49 = vsel %vm1516_vm3, %v1063_v22, -inf  ;;  %v1867_v13 = vsel %vm1516_vm3, %v1062_v18, -inf  ;;  %v1378_v14 = vrot.slane %v811_v5, %v6325_v36 }
 0x1f0   : > { %v6931_v32 = vsel %vm2413_vm4, %v1936_v1, -inf  ;;  %v1855_v17 = vmax.f32 %v1853_v47, %v1854_v24  ;;  %v1861_v53 = vrot.slane %v1860_v49, 4  ;;  %v1868_v26 = vrot.slane %v1867_v13, 4 }
 0x1f1   : > { %v1874_v19 = vsel %vm1516_vm3, %v1064_v62, -inf  ;;  %v1385_v40 = vrot.slane %v1371_v16, %v6325_v36  ;;  %v1386_v20 = vcombine.high %v1378_v14, %v1378_v14  ;;  %v2385_v0 = vsel %vm1516_vm3, %v1378_v14, -inf }
 0x1f2   : > { %v1856_v2 = vrot.slane %v1855_v17, 2  ;;  %v1862_v60 = vmax.f32 %v1860_v49, %v1861_v53  ;;  %v1869_v30 = vmax.f32 %v1867_v13, %v1868_v26  ;;  %v1875_v58 = vrot.slane %v1874_v19, 4 }
 0x1f3   : > { %v1387_v34 = vcombine.high %v1385_v40, %v1385_v40  ;;  %v2386_v21 = vrot.slane %v2385_v0, 4  ;;  %v2392_v37 = vsel %vm1516_vm3, %v1386_v20, -inf  ;;  %v2399_v23 = vsel %vm1516_vm3, %v1385_v40, -inf }
 0x1f4   : > { %v1857_v41 = vmax.f32 %v1855_v17, %v1856_v2  ;;  %v1863_v54 = vrot.slane %v1862_v60, 2  ;;  %v1870_v61 = vrot.slane %v1869_v30, 2  ;;  %v1876_v15 = vmax.f32 %v1874_v19, %v1875_v58 }
 0x1f5   : > { %v2387_v44 = vmax.f32 %v2385_v0, %v2386_v21  ;;  %v2393_v52 = vrot.slane %v2392_v37, 4  ;;  %v2400_v50 = vrot.slane %v2399_v23, 4  ;;  %v2406_v28 = vsel %vm1516_vm3, %v1387_v34, -inf }
 0x1f6   : > { %v1858_v39 = vrot.slane %v1857_v41, 1  ;;  %v1864_v57 = vmax.f32 %v1862_v60, %v1863_v54  ;;  %v1871_v4 = vmax.f32 %v1869_v30, %v1870_v61  ;;  %v1877_v9 = vrot.slane %v1876_v15, 2 }
 0x1f7   : > { %v2388_v51 = vrot.slane %v2387_v44, 2  ;;  %v2394_v27 = vmax.f32 %v2392_v37, %v2393_v52  ;;  %v2401_v48 = vmax.f32 %v2399_v23, %v2400_v50  ;;  %v2407_v45 = vrot.slane %v2406_v28, 4 }
 0x1f8   : > { %v1859_v11 = vmax.f32 %v1857_v41, %v1858_v39  ;;  %v1865_v5 = vrot.slane %v1864_v57, 1  ;;  %v1872_v55 = vrot.slane %v1871_v4, 1  ;;  %v1878_v59 = vmax.f32 %v1876_v15, %v1877_v9 }
 0x1f9   : > { %v2389_v18 = vmax.f32 %v2387_v44, %v2388_v51  ;;  %v2395_v22 = vrot.slane %v2394_v27, 2  ;;  %v2402_v25 = vrot.slane %v2401_v48, 2  ;;  %v2408_v47 = vmax.f32 %v2406_v28, %v2407_v45 }
 0x1fa   : > { %v1866_v16 = vmax.f32 %v1864_v57, %v1865_v5  ;;  %v1873_v1 = vmax.f32 %v1871_v4, %v1872_v55  ;;  %v1879_v62 = vrot.slane %v1878_v59, 1  ;;  %v2486_v24 = vsel %vm2413_vm4, %v1859_v11, -inf }
 0x1fb   : > { %v2488_v49 = vmax.f32 %v2486_v24, %v6918_v33  ;;  %v2390_v13 = vrot.slane %v2389_v18, 1  ;;  %v2396_v14 = vmax.f32 %v2394_v27, %v2395_v22  ;;  %v2403_v17 = vmax.f32 %v2401_v48, %v2402_v25 }
 0x1fc   : > { %v1880_v53 = vmax.f32 %v1878_v59, %v1879_v62  ;;  %v2489_v26 = vsel %vm2413_vm4, %v1866_v16, -inf  ;;  %v2492_v19 = vsel %vm2413_vm4, %v1873_v1, -inf  ;;  %v2409_v40 = vrot.slane %v2408_v47, 2 }
 0x1fd   : > { %v2491_v20 = vmax.f32 %v2489_v26, %v6925_v7  ;;  %v2494_v0 = vmax.f32 %v2492_v19, %v6922_v31  ;;  %v2391_v2 = vmax.f32 %v2389_v18, %v2390_v13  ;;  %v2397_v60 = vrot.slane %v2396_v14, 1 }
 0x1fe   : > { %v2495_v30 = vsel %vm2413_vm4, %v1880_v53, -inf  ;;  %v2404_v58 = vrot.slane %v2403_v17, 1  ;;  %v2410_v34 = vmax.f32 %v2408_v47, %v2409_v40  ;;  %v1099_v33 = vcombine.high %v6914_v35, %v6914_v35 }
 0x1ff   : > { %v2497_v21 = vmax.f32 %v2495_v30, %v6931_v32  ;;  %v2721_v37 = vsel %vm2693_vm5, %v2491_v20, %v2488_v49  ;;  %v2398_v23 = vmax.f32 %v2396_v14, %v2397_v60  ;;  %v6951_v41 = vsel %vm2413_vm4, %v2391_v2, -inf  ;;  %v6963_v32 = vld [vmem:[%s7729_s2] ss:$0 sm:$0xff] }
 0x200   : > { %v2722_v7 = vsel %vm2695_vm6, %v2494_v0, %v2721_v37  ;;  %v2405_v31 = vmax.f32 %v2403_v17, %v2404_v58  ;;  %v2411_v54 = vrot.slane %v2410_v34, 1  ;;  %v1106_v61 = vrot.slane %v6914_v35, %v6325_v36 }
 0x201   : > { %v6957_v15 = vsel %vm2413_vm4, %v2398_v23, -inf  ;;  %v1113_v44 = vrot.slane %v1099_v33, %v6325_v36  ;;  %v738_v52 = vmul.f32 %v6963_v32, %v6664_v29  ;;  %v6972_v50 = vsel %vm2697_vm7, %v2593_v46, %v6904_v63 }
 0x202   : > { %v2412_v35 = vmax.f32 %v2410_v34, %v2411_v54  ;;  %v6975_v28 = vsel %vm2413_vm4, %v2405_v31, -inf  ;;  %v1114_v39 = vcombine.high %v1106_v61, %v1106_v61  ;;  %v1937_v57 = vsel %vm1516_vm3, %v1106_v61, -inf }
 0x203   : > { %v1115_v4 = vcombine.high %v1113_v44, %v1113_v44  ;;  %v1938_v9 = vrot.slane %v1937_v57, 4  ;;  %v1951_v51 = vsel %vm1516_vm3, %v1113_v44, -inf  ;;  %v777_v29 = vadd.f32 %v6909_v12, %v738_v52 }
 0x204   : > { %v6981_v27 = vsel %vm2413_vm4, %v2412_v35, -inf  ;;  %v1944_v43 = vsel %vm1516_vm3, %v1114_v39, -inf  ;;  %v1952_v56 = vrot.slane %v1951_v51, 4  ;;  %v722_v46 = vmul.f32 %v6963_v32, %v6679_v10 }
 0x205   : > { %v1939_v63 = vmax.f32 %v1937_v57, %v1938_v9  ;;  %v1945_v48 = vrot.slane %v1944_v43, 4  ;;  %v1958_v45 = vsel %vm1516_vm3, %v1115_v4, -inf  ;;  %v809_v11 = vmax.f32 %v777_v29, 0.0 }
 0x206   : > { %v1953_v5 = vmax.f32 %v1951_v51, %v1952_v56  ;;  %v1959_v55 = vrot.slane %v1958_v45, 4  ;;  %v761_v59 = vadd.f32 %v6909_v12, %v722_v46  ;;  %v6989_v18 = vsel %vm2697_vm7, %v2497_v21, %v2722_v7 }
 0x207   : > { %v1940_v22 = vrot.slane %v1939_v63, 2  ;;  %v1946_v25 = vmax.f32 %v1944_v43, %v1945_v48  ;;  %v1337_v47 = vcombine.high %v809_v11, %v809_v11  ;;  %v1344_v16 = vrot.slane %v809_v11, %v6325_v36 }
 0x208   : > { %v1954_v1 = vrot.slane %v1953_v5, 2  ;;  %v1960_v62 = vmax.f32 %v1958_v45, %v1959_v55  ;;  %v793_v10 = vmax.f32 %v761_v59, 0.0  ;;  %v6994_v24 = vmul.f32 %v6963_v32, %v6709_v6 }
 0x209   : > { %v1941_v49 = vmax.f32 %v1939_v63, %v1940_v22  ;;  %v1947_v13 = vrot.slane %v1946_v25, 2  ;;  %v1351_v14 = vrot.slane %v1337_v47, %v6325_v36  ;;  %v1352_v17 = vcombine.high %v1344_v16, %v1344_v16 }
 0x20a   : > { %v1955_v53 = vmax.f32 %v1953_v5, %v1954_v1  ;;  %v1961_v26 = vrot.slane %v1960_v62, 2  ;;  %v2329_v19 = vsel %vm1516_vm3, %v1344_v16, -inf  ;;  %v1065_v40 = vcombine.high %v793_v10, %v793_v10 }
 0x20b   : > { %v1942_v20 = vrot.slane %v1941_v49, 1  ;;  %v1948_v0 = vmax.f32 %v1946_v25, %v1947_v13  ;;  %v1353_v2 = vcombine.high %v1351_v14, %v1351_v14  ;;  %v2330_v60 = vrot.slane %v2329_v19, 4 }
 0x20c   : > { %v1956_v30 = vrot.slane %v1955_v53, 1  ;;  %v1962_v58 = vmax.f32 %v1960_v62, %v1961_v26  ;;  %v2336_v34 = vsel %vm1516_vm3, %v1352_v17, -inf  ;;  %v2343_v6 = vsel %vm1516_vm3, %v1351_v14, -inf }
 0x20d   : > { %v1943_v33 = vmax.f32 %v1941_v49, %v1942_v20  ;;  %v1949_v21 = vrot.slane %v1948_v0, 1  ;;  %v2331_v37 = vmax.f32 %v2329_v19, %v2330_v60  ;;  %v2337_v23 = vrot.slane %v2336_v34, 4 }
 0x20e   : > { %v1957_v7 = vmax.f32 %v1955_v53, %v1956_v30  ;;  %v1963_v31 = vrot.slane %v1962_v58, 1  ;;  %v2344_v54 = vrot.slane %v2343_v6, 4  ;;  %v2350_v61 = vsel %vm1516_vm3, %v1353_v2, -inf }
 0x20f   : > { %v1950_v44 = vmax.f32 %v1948_v0, %v1949_v21  ;;  %v7002_v52 = vsel %vm2413_vm4, %v1943_v33, -inf  ;;  %v2332_v35 = vrot.slane %v2331_v37, 2  ;;  %v2338_v39 = vmax.f32 %v2336_v34, %v2337_v23 }
 0x210   : > { %v1964_v57 = vmax.f32 %v1962_v58, %v1963_v31  ;;  %v7005_v4 = vsel %vm2413_vm4, %v1957_v7, -inf  ;;  %v2345_v9 = vmax.f32 %v2343_v6, %v2344_v54  ;;  %v2351_v51 = vrot.slane %v2350_v61, 4 }
 0x211   : > { %v7008_v29 = vsel %vm2413_vm4, %v1950_v44, -inf  ;;  %v2333_v43 = vmax.f32 %v2331_v37, %v2332_v35  ;;  %v2339_v56 = vrot.slane %v2338_v39, 2  ;;  %v1072_v46 = vrot.slane %v793_v10, %v6325_v36 }
 0x212   : > { %v7012_v63 = vsel %vm2413_vm4, %v1964_v57, -inf  ;;  %v2346_v48 = vrot.slane %v2345_v9, 2  ;;  %v2352_v45 = vmax.f32 %v2350_v61, %v2351_v51  ;;  %v1079_v11 = vrot.slane %v1065_v40, %v6325_v36 }
 0x213   : > { %v2334_v5 = vrot.slane %v2333_v43, 1  ;;  %v2340_v55 = vmax.f32 %v2338_v39, %v2339_v56  ;;  %v1080_v59 = vcombine.high %v1072_v46, %v1072_v46  ;;  %v1881_v22 = vsel %vm1516_vm3, %v1072_v46, -inf }
 0x214   : > { %v2347_v25 = vmax.f32 %v2345_v9, %v2346_v48  ;;  %v2353_v47 = vrot.slane %v2352_v45, 2  ;;  %v1081_v16 = vcombine.high %v1079_v11, %v1079_v11  ;;  %v1882_v1 = vrot.slane %v1881_v22, 4 }
 0x215   : > { %v2335_v62 = vmax.f32 %v2333_v43, %v2334_v5  ;;  %v2341_v49 = vrot.slane %v2340_v55, 1  ;;  %v1888_v10 = vsel %vm1516_vm3, %v1080_v59, -inf  ;;  %v1895_v13 = vsel %vm1516_vm3, %v1079_v11, -inf }
 0x216   : > { %v2348_v14 = vrot.slane %v2347_v25, 1  ;;  %v2354_v17 = vmax.f32 %v2352_v45, %v2353_v47  ;;  %v1883_v53 = vmax.f32 %v1881_v22, %v1882_v1  ;;  %v1889_v26 = vrot.slane %v1888_v10, 4 }
 0x217   : > { %v2342_v19 = vmax.f32 %v2340_v55, %v2341_v49  ;;  %v2594_v40 = vsel %vm2413_vm4, %v2335_v62, -inf  ;;  %v1896_v20 = vrot.slane %v1895_v13, 4  ;;  %v1902_v0 = vsel %vm1516_vm3, %v1081_v16, -inf }
 0x218   : > { %v2349_v2 = vmax.f32 %v2347_v25, %v2348_v14  ;;  %v2355_v60 = vrot.slane %v2354_v17, 1  ;;  %v2596_v30 = vmax.f32 %v2594_v40, %v6951_v41  ;;  %v1884_v58 = vrot.slane %v1883_v53, 2 }
 0x219   : > { %v2597_v34 = vsel %vm2413_vm4, %v2342_v19, -inf  ;;  %v1890_v6 = vmax.f32 %v1888_v10, %v1889_v26  ;;  %v1897_v33 = vmax.f32 %v1895_v13, %v1896_v20  ;;  %v1903_v21 = vrot.slane %v1902_v0, 4 }
 0x21a   : > { %v2356_v37 = vmax.f32 %v2354_v17, %v2355_v60  ;;  %v2599_v23 = vmax.f32 %v2597_v34, %v6957_v15  ;;  %v2600_v7 = vsel %vm2413_vm4, %v2349_v2, -inf  ;;  %v2752_v31 = vsel %vm2699_vm8, %v2596_v30, %v6972_v50 }
 0x21b   : > { %v2602_v54 = vmax.f32 %v2600_v7, %v6975_v28  ;;  %v1885_v61 = vmax.f32 %v1883_v53, %v1884_v58  ;;  %v1891_v44 = vrot.slane %v1890_v6, 2  ;;  %v1898_v35 = vrot.slane %v1897_v33, 2 }
 0x21c   : > { %v2603_v41 = vsel %vm2413_vm4, %v2356_v37, -inf  ;;  %v2753_v39 = vsel %vm2701_vm9, %v2599_v23, %v2752_v31  ;;  %v1904_v57 = vmax.f32 %v1902_v0, %v1903_v21  ;;  %v766_v9 = vadd.f32 %v6909_v12, %v6994_v24 }
 0x21d   : > { %v2605_v15 = vmax.f32 %v2603_v41, %v6981_v27  ;;  %v2754_v51 = vsel %vm2703_vm10, %v2602_v54, %v2753_v39  ;;  %v1886_v43 = vrot.slane %v1885_v61, 1  ;;  %v1892_v56 = vmax.f32 %v1890_v6, %v1891_v44 }
 0x21e   : > { %v1899_v50 = vmax.f32 %v1897_v33, %v1898_v35  ;;  %v1905_v46 = vrot.slane %v1904_v57, 2  ;;  %v798_v28 = vmax.f32 %v766_v9, 0.0  ;;  %v725_v48 = vmul.f32 %v6963_v32, %v6735_v3 }
 0x21f   : > { %v2755_v45 = vsel %vm2705_vm11, %v2605_v15, %v2754_v51  ;;  %v1887_v11 = vmax.f32 %v1885_v61, %v1886_v43  ;;  %v1893_v5 = vrot.slane %v1892_v56, 1  ;;  %v728_v55 = vmul.f32 %v6963_v32, %v6742_v8 }
 0x220   : > { %2771 = vst.msk [vmem:[#allocation2 + $0x81] sm:$0xff] %vm2413_vm4, %v2755_v45  ;;  %v1900_v27 = vrot.slane %v1899_v50, 1  ;;  %v1906_v24 = vmax.f32 %v1904_v57, %v1905_v46  ;;  %v1150_v59 = vcombine.high %v798_v28, %v798_v28  ;;  %v1157_v22 = vrot.slane %v798_v28, %v6325_v36 }
 0x221   : > { %v1894_v25 = vmax.f32 %v1892_v56, %v1893_v5  ;;  %v2498_v47 = vsel %vm2413_vm4, %v1887_v11, -inf  ;;  %v764_v16 = vadd.f32 %v6909_v12, %v725_v48  ;;  %v7043_v3 = vadd.f32 %v6909_v12, %v728_v55 }
 0x222   : > { %v1901_v1 = vmax.f32 %v1899_v50, %v1900_v27  ;;  %v1907_v62 = vrot.slane %v1906_v24, 1  ;;  %v2500_v49 = vmax.f32 %v2498_v47, %v7002_v52  ;;  %v1164_v8 = vrot.slane %v1150_v59, %v6325_v36 }
 0x223   : > { %v2501_v10 = vsel %vm2413_vm4, %v1894_v25, -inf  ;;  %v1165_v13 = vcombine.high %v1157_v22, %v1157_v22  ;;  %v2021_v14 = vsel %vm1516_vm3, %v1157_v22, -inf  ;;  %v796_v17 = vmax.f32 %v764_v16, 0.0 }
 0x224   : > { %v1908_v53 = vmax.f32 %v1906_v24, %v1907_v62  ;;  %v2503_v26 = vmax.f32 %v2501_v10, %v7008_v29  ;;  %v2504_v19 = vsel %vm2413_vm4, %v1901_v1, -inf  ;;  %v2724_v40 = vsel %vm2699_vm8, %v2500_v49, %v6989_v18 }
 0x225   : > { %v2506_v20 = vmax.f32 %v2504_v19, %v7005_v4  ;;  %v1166_v0 = vcombine.high %v1164_v8, %v1164_v8  ;;  %v2022_v52 = vrot.slane %v2021_v14, 4  ;;  %v2028_v2 = vsel %vm1516_vm3, %v1165_v13, -inf }
 0x226   : > { %v2507_v60 = vsel %vm2413_vm4, %v1908_v53, -inf  ;;  %v2725_v30 = vsel %vm2701_vm9, %v2503_v26, %v2724_v40  ;;  %v2029_v58 = vrot.slane %v2028_v2, 4  ;;  %v2035_v34 = vsel %vm1516_vm3, %v1164_v8, -inf }
 0x227   : > { %v2509_v29 = vmax.f32 %v2507_v60, %v7012_v63  ;;  %v2726_v6 = vsel %vm2703_vm10, %v2506_v20, %v2725_v30  ;;  %v2023_v33 = vmax.f32 %v2021_v14, %v2022_v52  ;;  %v2036_v21 = vrot.slane %v2035_v34, 4 }
 0x228   : > { %v2030_v18 = vmax.f32 %v2028_v2, %v2029_v58  ;;  %v2042_v4 = vsel %vm1516_vm3, %v1166_v0, -inf  ;;  %v1116_v37 = vcombine.high %v796_v17, %v796_v17  ;;  %v1123_v23 = vrot.slane %v796_v17, %v6325_v36 }
 0x229   : > { %v2727_v7 = vsel %vm2705_vm11, %v2509_v29, %v2726_v6  ;;  %v2024_v31 = vrot.slane %v2023_v33, 2  ;;  %v2037_v54 = vmax.f32 %v2035_v34, %v2036_v21  ;;  %v2043_v61 = vrot.slane %v2042_v4, 4 }
 0x22a   : > { %2767 = vst.msk [vmem:[#allocation2 + $0x41] sm:$0xff] %vm2413_vm4, %v2727_v7  ;;  %v2031_v44 = vrot.slane %v2030_v18, 2  ;;  %v1130_v63 = vrot.slane %v1116_v37, %v6325_v36  ;;  %v1131_v35 = vcombine.high %v1123_v23, %v1123_v23  ;;  %v1965_v41 = vsel %vm1516_vm3, %v1123_v23, -inf }
 0x22b   : > { %v2025_v39 = vmax.f32 %v2023_v33, %v2024_v31  ;;  %v2038_v57 = vrot.slane %v2037_v54, 2  ;;  %v2044_v9 = vmax.f32 %v2042_v4, %v2043_v61  ;;  %v1966_v15 = vrot.slane %v1965_v41, 4 }
 0x22c   : > { %v2032_v51 = vmax.f32 %v2030_v18, %v2031_v44  ;;  %v1132_v43 = vcombine.high %v1130_v63, %v1130_v63  ;;  %v1972_v56 = vsel %vm1516_vm3, %v1131_v35, -inf  ;;  %v1979_v50 = vsel %vm1516_vm3, %v1130_v63, -inf }
 0x22d   : > { %v2026_v46 = vrot.slane %v2025_v39, 1  ;;  %v2039_v28 = vmax.f32 %v2037_v54, %v2038_v57  ;;  %v2045_v48 = vrot.slane %v2044_v9, 2  ;;  %v1967_v45 = vmax.f32 %v1965_v41, %v1966_v15 }
 0x22e   : > { %v2033_v11 = vrot.slane %v2032_v51, 1  ;;  %v1973_v5 = vrot.slane %v1972_v56, 4  ;;  %v1980_v55 = vrot.slane %v1979_v50, 4  ;;  %v1986_v27 = vsel %vm1516_vm3, %v1132_v43, -inf }
 0x22f   : > { %v2027_v24 = vmax.f32 %v2025_v39, %v2026_v46  ;;  %v2040_v59 = vrot.slane %v2039_v28, 1  ;;  %v2046_v22 = vmax.f32 %v2044_v9, %v2045_v48  ;;  %v1968_v25 = vrot.slane %v1967_v45, 2 }
 0x230   : > { %v2034_v47 = vmax.f32 %v2032_v51, %v2033_v11  ;;  %v1974_v16 = vmax.f32 %v1972_v56, %v1973_v5  ;;  %v1981_v1 = vmax.f32 %v1979_v50, %v1980_v55  ;;  %v1987_v62 = vrot.slane %v1986_v27, 4 }
 0x231   : > { %v2041_v49 = vmax.f32 %v2039_v28, %v2040_v59  ;;  %v2047_v8 = vrot.slane %v2046_v22, 1  ;;  %v2511_v10 = vsel %vm2413_vm4, %v2027_v24, -inf  ;;  %v1969_v13 = vmax.f32 %v1967_v45, %v1968_v25 }
 0x232   : > { %v2514_v14 = vsel %vm2413_vm4, %v2034_v47, -inf  ;;  %v1975_v17 = vrot.slane %v1974_v16, 2  ;;  %v1982_v53 = vrot.slane %v1981_v1, 2  ;;  %v1988_v26 = vmax.f32 %v1986_v27, %v1987_v62 }
 0x233   : > { %v2048_v19 = vmax.f32 %v2046_v22, %v2047_v8  ;;  %v2517_v40 = vsel %vm2413_vm4, %v2041_v49, -inf  ;;  %v1970_v20 = vrot.slane %v1969_v13, 1  ;;  %v799_v0 = vmax.f32 %v7043_v3, 0.0 }
 0x234   : > { %v1976_v52 = vmax.f32 %v1974_v16, %v1975_v17  ;;  %v1983_v2 = vmax.f32 %v1981_v1, %v1982_v53  ;;  %v1989_v60 = vrot.slane %v1988_v26, 2  ;;  %v726_v30 = vmul.f32 %v6963_v32, %v6790_v42 }
 0x235   : > { %v2520_v58 = vsel %vm2413_vm4, %v2048_v19, -inf  ;;  %v1971_v34 = vmax.f32 %v1969_v13, %v1970_v20  ;;  %v1167_v29 = vcombine.high %v799_v0, %v799_v0  ;;  %v1174_v6 = vrot.slane %v799_v0, %v6325_v36 }
 0x236   : > { %v1977_v33 = vrot.slane %v1976_v52, 1  ;;  %v1984_v21 = vrot.slane %v1983_v2, 1  ;;  %v1990_v18 = vmax.f32 %v1988_v26, %v1989_v60  ;;  %v765_v4 = vadd.f32 %v6909_v12, %v726_v30 }
 0x237   : > { %v2510_v37 = vsel %vm2413_vm4, %v1971_v34, -inf  ;;  %v1181_v3 = vrot.slane %v1167_v29, %v6325_v36  ;;  %v1182_v23 = vcombine.high %v1174_v6, %v1174_v6  ;;  %v2049_v7 = vsel %vm1516_vm3, %v1174_v6, -inf }
 0x238   : > { %v1978_v31 = vmax.f32 %v1976_v52, %v1977_v33  ;;  %v1985_v42 = vmax.f32 %v1983_v2, %v1984_v21  ;;  %v1991_v32 = vrot.slane %v1990_v18, 1  ;;  %v2512_v54 = vmax.f32 %v2510_v37, %v2511_v10  ;;  %v7109_v33 = vld [vmem:[#allocation2 + $0x11] sm:$0xff] }
 0x239   : > { %v1183_v61 = vcombine.high %v1181_v3, %v1181_v3  ;;  %v2050_v44 = vrot.slane %v2049_v7, 4  ;;  %v2056_v63 = vsel %vm1516_vm3, %v1182_v23, -inf  ;;  %v2063_v35 = vsel %vm1516_vm3, %v1181_v3, -inf  ;;  %v7111_v3 = vld [vmem:[#allocation2 + $0x21] sm:$0xff] }
 0x23a   : > { %v1992_v41 = vmax.f32 %v1990_v18, %v1991_v32  ;;  %v2513_v12 = vsel %vm2413_vm4, %v1978_v31, -inf  ;;  %v2516_v39 = vsel %vm2413_vm4, %v1985_v42, -inf  ;;  %v2057_v57 = vrot.slane %v2056_v63, 4 }
 0x23b   : > { %v2515_v9 = vmax.f32 %v2513_v12, %v2514_v14  ;;  %v2518_v15 = vmax.f32 %v2516_v39, %v2517_v40  ;;  %v2051_v51 = vmax.f32 %v2049_v7, %v2050_v44  ;;  %v2064_v43 = vrot.slane %v2063_v35, 4  ;;  %v6022_v12 = vld [vmem:[%s7731_s4 + $0x8] sm:$0xff]  }
 0x23c   : > { %v2519_v56 = vsel %vm2413_vm4, %v1992_v41, -inf  ;;  %v2058_v50 = vmax.f32 %v2056_v63, %v2057_v57  ;;  %v2070_v46 = vsel %vm1516_vm3, %v1183_v61, -inf  ;;  %v797_v28 = vmax.f32 %v765_v4, 0.0 }
 0x23d   : > { %v2521_v48 = vmax.f32 %v2519_v56, %v2520_v58  ;;  %v2728_v45 = vsel %vm2693_vm5, %v2515_v9, %v2512_v54  ;;  %v2052_v11 = vrot.slane %v2051_v51, 2  ;;  %v2065_v5 = vmax.f32 %v2063_v35, %v2064_v43  ;;  %v7107_v58 = vld [vmem:[#allocation2 + $0x31] sm:$0xff] }
 0x23e   : > { %v2729_v55 = vsel %vm2695_vm6, %v2518_v15, %v2728_v45  ;;  %v2059_v27 = vrot.slane %v2058_v50, 2  ;;  %v2071_v24 = vrot.slane %v2070_v46, 4  ;;  %v1133_v59 = vcombine.high %v797_v28, %v797_v28 }
 0x23f   : > { %v2053_v22 = vmax.f32 %v2051_v51, %v2052_v11  ;;  %v2066_v25 = vrot.slane %v2065_v5, 2  ;;  %v1140_v47 = vrot.slane %v797_v28, %v6325_v36  ;;  %v7091_v16 = vsel %vm2697_vm7, %v2521_v48, %v2729_v55 }
 0x240   : > { %v2072_v1 = vmax.f32 %v2070_v46, %v2071_v24  ;;  %v1147_v62 = vrot.slane %v1133_v59, %v6325_v36  ;;  %v6161_v10 = vmov 0.0   ;;  %v2060_v13 = vmax.f32 %v2058_v50, %v2059_v27 }
 0x241   : > { %v1148_v49 = vcombine.high %v1140_v47, %v1140_v47  ;;  %v1993_v8 = vsel %vm1516_vm3, %v1140_v47, -inf  ;;  %2606 = vst.msk [vmem:[#allocation2] sm:$0xff] %vm2413_vm4, %v6161_v10  ;;  %2609 = vst.msk [vmem:[#allocation2 + $0x90] sm:$0xff] %vm2413_vm4, %v6161_v10  ;;  %5750 = vmatprep.subr.bf16.mxu0 %v6161_v10  ;;  %v2054_v26 = vrot.slane %v2053_v22, 1  ;;  %v2067_v19 = vmax.f32 %v2065_v5, %v2066_v25  ;;  %v6023_v5 = vld [vmem:[%s7731_s4 + $0x20] sm:$0xff]  }
 0x242   : > { %2607 = vst.msk [vmem:[#allocation2 + $0x8] sm:$0x3] %vm1516_vm3, %v6161_v10  ;;  %2610 = vst.msk [vmem:[#allocation2 + $0x98] sm:$0x3] %vm1516_vm3, %v6161_v10  ;;  %v2073_v14 = vrot.slane %v2072_v1, 2  ;;  %v1149_v17 = vcombine.high %v1147_v62, %v1147_v62  ;;  %v1994_v53 = vrot.slane %v1993_v8, 4  ;;  %v7115_v32 = vpack.c.bf16 %v7107_v58, %v7111_v3  ;;  %5758 = vmatprep.mubr.msk.bf16.mxu0 %vm6162_vm15, %v6161_v10 }
 0x243   : > { %v2000_v40 = vsel %vm1516_vm3, %v1148_v49, -inf  ;;  %v2007_v20 = vsel %vm1516_vm3, %v1147_v62, -inf  ;;  %v2061_v34 = vrot.slane %v2060_v13, 1  ;;  %v2055_v21 = vmax.f32 %v2053_v22, %v2054_v26  ;;  %2613 = vst.msk [vmem:[#allocation2 + $0x10] sm:$0x1] %vm2612_vm12, %v6161_v10  ;;  %v7176_v26 = vld [vmem:[#allocation2 + $0x41] sm:$0xff] }
 0x244   : > { %v2074_v0 = vmax.f32 %v2072_v1, %v2073_v14  ;;  %v1995_v52 = vmax.f32 %v1993_v8, %v1994_v53  ;;  %v2001_v2 = vrot.slane %v2000_v40, 4  ;;  %v2008_v60 = vrot.slane %v2007_v20, 4  ;;  %2614 = vst.msk [vmem:[#allocation2 + $0x20] sm:$0x1] %vm2612_vm12, %v6161_v10  ;;  %2615 = vst.msk [vmem:[#allocation2 + $0x30] sm:$0x1] %vm2612_vm12, %v6161_v10 }
 0x245   : > { %v2014_v30 = vsel %vm1516_vm3, %v1149_v17, -inf  ;;  %v2068_v18 = vrot.slane %v2067_v19, 1  ;;  %v2062_v63 = vmax.f32 %v2060_v13, %v2061_v34  ;;  %2616 = vst.msk [vmem:[#allocation2 + $0x40] sm:$0x1] %vm2612_vm12, %v6161_v10  ;;  %2617 = vst.msk [vmem:[#allocation2 + $0x50] sm:$0x1] %vm2612_vm12, %v6161_v10  ;;  %v3219_v39 = vpack.c.bf16 %v7111_v3, %v7109_v33 }
 0x246   : > { %v1996_v29 = vrot.slane %v1995_v52, 2  ;;  %v2002_v6 = vmax.f32 %v2000_v40, %v2001_v2  ;;  %v2009_v4 = vmax.f32 %v2007_v20, %v2008_v60  ;;  %v2015_v37 = vrot.slane %v2014_v30, 4  ;;  %2618 = vst.msk [vmem:[#allocation2 + $0x60] sm:$0x1] %vm2612_vm12, %v6161_v10  ;;  %2619 = vst.msk [vmem:[#allocation2 + $0x70] sm:$0x1] %vm2612_vm12, %v6161_v10 }
 0x247   : > { %v2075_v23 = vrot.slane %v2074_v0, 1  ;;  %2620 = vst.msk [vmem:[#allocation2 + $0x80] sm:$0x1] %vm2612_vm12, %v6161_v10  ;;  %2621 = vst.msk [vmem:[#allocation2 + $0x19] sm:$0x1] %vm2612_vm12, %v6161_v10  ;;  %v2069_v57 = vmax.f32 %v2067_v19, %v2068_v18  ;;  %v2523_v43 = vsel %vm2413_vm4, %v2055_v21, -inf }
 0x248   : > { %v1997_v7 = vmax.f32 %v1995_v52, %v1996_v29  ;;  %v2003_v31 = vrot.slane %v2002_v6, 2  ;;  %v2010_v54 = vrot.slane %v2009_v4, 2  ;;  %v2016_v61 = vmax.f32 %v2014_v30, %v2015_v37  ;;  %2622 = vst.msk [vmem:[#allocation2 + $0x29] sm:$0x1] %vm2612_vm12, %v6161_v10  ;;  %2623 = vst.msk [vmem:[#allocation2 + $0x39] sm:$0x1] %vm2612_vm12, %v6161_v10 }
 0x249   : > { %v2788_v42 = vld [vmem:[#allocation2 + $0x1] sm:$0xff]  ;;  %2624 = vst.msk [vmem:[#allocation2 + $0x49] sm:$0x1] %vm2612_vm12, %v6161_v10  ;;  %2625 = vst.msk [vmem:[#allocation2 + $0x59] sm:$0x1] %vm2612_vm12, %v6161_v10  ;;  %v2076_v51 = vmax.f32 %v2074_v0, %v2075_v23  ;;  %v2526_v48 = vsel %vm2413_vm4, %v2062_v63, -inf }
 0x24a   : > { %v2796_v44 = vpack.c.bf16 %v7109_v33, %v2788_v42  ;;  %v1998_v35 = vrot.slane %v1997_v7, 1  ;;  %v2004_v41 = vmax.f32 %v2002_v6, %v2003_v31  ;;  %2626 = vst.msk [vmem:[#allocation2 + $0x69] sm:$0x1] %vm2612_vm12, %v6161_v10  ;;  %2627 = vst.msk [vmem:[#allocation2 + $0x79] sm:$0x1] %vm2612_vm12, %v6161_v10  ;;  %v2011_v9 = vmax.f32 %v2009_v4, %v2010_v54  ;;  %v7178_v19 = vld [vmem:[#allocation2 + $0x61] sm:$0xff] }
 0x24b   : > { %2628 = vst.msk [vmem:[#allocation2 + $0x89] sm:$0x1] %vm2612_vm12, %v6161_v10  ;;  %v2017_v15 = vrot.slane %v2016_v61, 2  ;;  %v2529_v55 = vsel %vm2413_vm4, %v2069_v57, -inf  ;;  %v2532_v22 = vsel %vm2413_vm4, %v2076_v51, -inf  ;;  %v7180_v40 = vld [vmem:[#allocation2 + $0x71] sm:$0xff] }
 0x24c   : > { %5646 = vmatprep.mubr.msk.bf16.mxu1 %vm2413_vm4, %v2796_v44  ;;  %v1999_v56 = vmax.f32 %v1997_v7, %v1998_v35  ;;  %v2005_v50 = vrot.slane %v2004_v41, 1  ;;  %v2012_v46 = vrot.slane %v2011_v9, 1  ;;  %v2772_v20 = vld [vmem:[#allocation2] sm:$0xff]  ;;  %v2773_v0 = vld [vmem:[#allocation2 + $0x10] sm:$0xff]  ;;  %v7190_v2 = vpack.c.bf16 %v7180_v40, %v7178_v19  ;;  %v6024_v18 = vld [vmem:[%s7731_s4 + $0x28] sm:$0xff]  }
 0x24d   : > { %5647 = vmatmul.mubr.msk.bf16.vlgmr.msra.gmra.mrb[12].mxu1 %vm2413_vm4, %v7115_v32  ;;  %v2018_v28 = vmax.f32 %v2016_v61, %v2017_v15  ;;  %v2780_v60 = vpack.c.bf16 %v2773_v0, %v2772_v20  ;;  %v2775_v30 = vld [vmem:[#allocation2 + $0x30] sm:$0xff]  ;;  %v2774_v29 = vld [vmem:[#allocation2 + $0x20] sm:$0xff]  ;;  %v6026_v57 = vld [vmem:[%s7731_s4 + $0x38] sm:$0xff]   ;;  %4271 = vst.msk [vmem:[#allocation3] sm:$0x3f] %vm4270_vm13, %v6161_v10 }
 0x24e   : > { %5655 = vmatpush3.bf16.msra.mxu1 %v6872_v38  ;;  %v2006_v45 = vmax.f32 %v2004_v41, %v2005_v50  ;;  %v2522_v11 = vsel %vm2413_vm4, %v1999_v56, -inf  ;;  %v2013_v27 = vmax.f32 %v2011_v9, %v2012_v46  ;;  %v7197_v6 = vpack.c.bf16 %v2775_v30, %v2774_v29  ;;  %v2776_v21 = vld [vmem:[#allocation2 + $0x40] sm:$0xff]  ;;  %v6025_v37 = vld [vmem:[%s7731_s4 + $0x30] sm:$0xff]   ;;  %4273 = vst.msk [vmem:[#allocation3 + $0x28] sm:$0x3f] %vm4270_vm13, %v6161_v10  ;;  %v6040_v20 = vld [vmem:[%s7734_s7 + $0x38] sm:$0xff]  }
 0x24f   : > { %5656 = vmatprep.subr.bf16.mxu1 %v6022_v12  ;;  %v2019_v24 = vrot.slane %v2018_v28, 1  ;;  %v2524_v59 = vmax.f32 %v2522_v11, %v2523_v43  ;;  %v2778_v23 = vld [vmem:[#allocation2 + $0x60] sm:$0xff]  ;;  %v2779_v7 = vld [vmem:[#allocation2 + $0x70] sm:$0xff]  ;;  %v3105_v50 = vpack.c.bf16 %v2774_v29, %v2773_v0  ;;  %v3106_v46 = vpack.c.bf16 %v2776_v21, %v2775_v30  ;;  %4276 = vst.msk [vmem:[#allocation3 + $0x8] sm:$0x1] %vm4275_vm14, %v6161_v10 }
 0x250   : > { %v2525_v25 = vsel %vm2413_vm4, %v2006_v45, -inf  ;;  %v2528_v1 = vsel %vm2413_vm4, %v2013_v27, -inf  ;;  %v2983_v31 = vld [vmem:[#allocation2 + $0x2] sm:$0xff]  ;;  %v2984_v42 = vld [vmem:[#allocation2 + $0x12] sm:$0xff]  ;;  %v7211_v54 = vpack.c.bf16 %v2779_v7, %v2778_v23  ;;  %4277 = vst.msk [vmem:[#allocation3 + $0x10] sm:$0x1] %vm4275_vm14, %v6161_v10 }
 0x251   : > { %v2020_v38 = vmax.f32 %v2018_v28, %v2019_v24  ;;  %v2527_v47 = vmax.f32 %v2525_v25, %v2526_v48  ;;  %v2731_v62 = vsel %vm2699_vm8, %v2524_v59, %v7091_v16  ;;  %v2530_v49 = vmax.f32 %v2528_v1, %v2529_v55  ;;  %v2986_v44 = vld [vmem:[#allocation2 + $0x32] sm:$0xff]  ;;  %v2985_v35 = vld [vmem:[#allocation2 + $0x22] sm:$0xff]  ;;  %4278 = vst.msk [vmem:[#allocation3 + $0x18] sm:$0x1] %vm4275_vm14, %v6161_v10  ;;  %v7341_v0 = vld [vmem:[%s7732_s5] ss:$0 sm:$0xff] }
 0x252   : > { %5657 = vmatpush3.bf16.msra.mxu1 %v6022_v12  ;;  %v2991_v61 = vpack.c.bf16 %v2984_v42, %v2983_v31  ;;  %v7216_v41 = vpack.c.bf16 %v2986_v44, %v2985_v35  ;;  %v2987_v12 = vld [vmem:[#allocation2 + $0x42] sm:$0xff]  ;;  %v2990_v43 = vld [vmem:[#allocation2 + $0x72] sm:$0xff]  ;;  %v3220_v55 = vpack.c.bf16 %v7176_v26, %v7107_v58  ;;  %4279 = vst.msk [vmem:[#allocation3 + $0x20] sm:$0x1] %vm4275_vm14, %v6161_v10  ;;  %4280 = vst.msk [vmem:[#allocation3 + $0xd] sm:$0x1] %vm4275_vm14, %v6161_v10 }
 0x253   : > { %5666 = vmatprep.subr.bf16.mxu1 %v6023_v5  ;;  %v2531_v8 = vsel %vm2413_vm4, %v2020_v38, -inf  ;;  %v2732_v13 = vsel %vm2701_vm9, %v2527_v47, %v2731_v62  ;;  %v6027_v15 = vld [vmem:[%s7731_s4 + $0x40] sm:$0xff]   ;;  %v6028_v28 = vld [vmem:[%s7731_s4 + $0x48] sm:$0xff]   ;;  %v6029_v45 = vld [vmem:[%s7731_s4 + $0x50] sm:$0xff]   ;;  %v3334_v59 = vpack.c.bf16 %v2987_v12, %v2986_v44  ;;  %4281 = vst.msk [vmem:[#allocation3 + $0x15] sm:$0x1] %vm4275_vm14, %v6161_v10 }
 0x254   : > { %v2533_v14 = vmax.f32 %v2531_v8, %v2532_v22  ;;  %v2733_v17 = vsel %vm2703_vm10, %v2530_v49, %v2732_v13  ;;  %v2989_v51 = vld [vmem:[#allocation2 + $0x62] sm:$0xff]  ;;  %v6030_v27 = vld [vmem:[%s7731_s4 + $0x58] sm:$0xff]   ;;  %v6033_v38 = vld [vmem:[%s7731_s4 + $0x70] sm:$0xff]   ;;  %4282 = vst.msk [vmem:[#allocation3 + $0x1d] sm:$0x1] %vm4275_vm14, %v6161_v10 }
 0x255   : > { %v7230_v56 = vpack.c.bf16 %v2990_v43, %v2989_v51  ;;  %v3104_v11 = vld [vmem:[#allocation2 + $0x80] sm:$0xff]  ;;  %v6032_v22 = vld [vmem:[%s7731_s4 + $0x68] sm:$0xff]   ;;  %v6034_v62 = vld [vmem:[%s7731_s4 + $0x78] sm:$0xff]   ;;  %4283 = vst.msk [vmem:[#allocation3 + $0x25] sm:$0x1] %vm4275_vm14, %v6161_v10 }
 0x256   : > { %v2734_v53 = vsel %vm2705_vm11, %v2533_v14, %v2733_v17  ;;  %v6031_v33 = vld [vmem:[%s7731_s4 + $0x60] sm:$0xff]   ;;  %v3447_v8 = vld [vmem:[#allocation2 + $0x90] sm:$0xff]  ;;  %v6036_v14 = vld [vmem:[%s7731_s4 + $0x88] sm:$0xff]  }
 0x257   : > { %2768 = vst.msk [vmem:[#allocation2 + $0x51] sm:$0xff] %vm2413_vm4, %v2734_v53  ;;  %v3218_v3 = vld [vmem:[#allocation2 + $0x81] sm:$0xff]  ;;  %v3451_v13 = vpack.c.bf16 %v3447_v8, %v3104_v11  ;;  %v3561_v17 = vld [vmem:[#allocation2 + $0x91] sm:$0xff] }
 0x258   : > { %v3222_v58 = vpack.c.bf16 %v3218_v3, %v7180_v40  ;;  %v3332_v47 = vld [vmem:[#allocation2 + $0x82] sm:$0xff]  ;;  %v3565_v53 = vpack.c.bf16 %v3561_v17, %v3218_v3 }
 0x259   : > { %v3336_v1 = vpack.c.bf16 %v3332_v47, %v2990_v43  ;;  %v6035_v49 = vld [vmem:[%s7731_s4 + $0x80] sm:$0xff]   ;;  %v6038_v40 = vld [vmem:[%s7734_s7 + $0x28] sm:$0xff]  }
 0x25e   : > { %v7182_v16 = vld [vmem:[#allocation2 + $0x51] sm:$0xff] }
 0x25f   : > { %v7186_v52 = vpack.c.bf16 %v7182_v16, %v7176_v26  ;;  %v2777_v34 = vld [vmem:[#allocation2 + $0x50] sm:$0xff]  ;;  %v3221_v24 = vpack.c.bf16 %v7178_v19, %v7182_v16  ;;  %v6037_v19 = vld [vmem:[%s7734_s7 + $0x20] sm:$0xff]  }
 0x260   : > { %v7202_v4 = vpack.c.bf16 %v2777_v34, %v2776_v21  ;;  %v2988_v63 = vld [vmem:[#allocation2 + $0x52] sm:$0xff]  ;;  %v3107_v48 = vpack.c.bf16 %v2778_v23, %v2777_v34  ;;  %5751 = vmatpush3.bf16.msra.mxu0 %v6037_v19 }
 0x261   : > { %5650 = vmatprep.mubr.msk.bf16.mxu1 %vm2413_vm4, %v7186_v52  ;;  %v7221_v9 = vpack.c.bf16 %v2988_v63, %v2987_v12  ;;  %v3335_v25 = vpack.c.bf16 %v2989_v51, %v2988_v63  ;;  %5752 = vmatprep.subr.bf16.mxu0 %v6161_v10  ;;  %v6039_v16 = vld [vmem:[%s7734_s7 + $0x30] sm:$0xff]  }
 0x262   : > { %5651 = vmatmul.mubr.msk.bf16.gmra.mrb[16].mxu1 %vm2413_vm4, %v7190_v2 }
 0x263   : > { %5658 = vmatprep.mubr.msk.bf16.mxu1 %vm2413_vm4, %v2780_v60 }
 0x264   : > { %5753 = vmatpush3.bf16.msra.mxu0 %v6038_v40 }
 0x265   : > { %5754 = vmatprep.subr.bf16.mxu0 %v6161_v10 }
 0x268   : > { %5755 = vmatpush3.bf16.msra.mxu0 %v6039_v16 }
 0x269   : > { %5756 = vmatprep.subr.bf16.mxu0 %v6161_v10 }
 0x26a   : > { %5659 = vmatmul.mubr.msk.bf16.vlgmr.msra.gmra.mrb[12].mxu1 %vm2413_vm4, %v7197_v6 }
 0x26b   : > { %5667 = vmatpush3.bf16.msra.mxu1 %v6023_v5  ;;  %5662 = vmatprep.mubr.msk.bf16.mxu1 %vm2413_vm4, %v7202_v4  ;;  %v3108_v5 = vpack.c.bf16 %v3104_v11, %v2779_v7 }
 0x26c   : > { %5668 = vmatprep.subr.bf16.mxu1 %v6024_v18  ;;  %5757 = vmatpush3.bf16.msra.mxu0 %v6040_v20 }
 0x26d   : > { %5762 = vmatprep.subr.bf16.mxu0 %v6161_v10 }
 0x26f   : > { %5669 = vmatpush3.bf16.msra.mxu1 %v6024_v18 }
 0x270   : > { %5678 = vmatprep.subr.bf16.mxu1 %v6025_v37 }
 0x272   : > { %5663 = vmatmul.mubr.msk.bf16.gmra.mrb[16].mxu1 %vm2413_vm4, %v7211_v54 }
 0x273   : > { %5670 = vmatprep.mubr.msk.bf16.mxu1 %vm2413_vm4, %v2991_v61 }
 0x27a   : > { %5671 = vmatmul.mubr.msk.bf16.vlgmr.msra.gmra.mrb[12].mxu1 %vm2413_vm4, %v7216_v41 }
 0x27b   : > { %5679 = vmatpush3.bf16.msra.mxu1 %v6025_v37  ;;  %5674 = vmatprep.mubr.msk.bf16.mxu1 %vm2413_vm4, %v7221_v9 }
 0x27c   : > { %5680 = vmatprep.subr.bf16.mxu1 %v6026_v57 }
 0x27f   : > { %5681 = vmatpush3.bf16.msra.mxu1 %v6026_v57 }
 0x280   : > { %5690 = vmatprep.subr.bf16.mxu1 %v6027_v15 }
 0x282   : > { %5675 = vmatmul.mubr.msk.bf16.gmra.mrb[16].mxu1 %vm2413_vm4, %v7230_v56 }
 0x283   : > { %5682 = vmatprep.mubr.msk.bf16.mxu1 %vm2413_vm4, %v3105_v50 }
 0x28a   : > { %5683 = vmatmul.mubr.msk.bf16.vlgmr.msra.gmra.mrb[12].mxu1 %vm2413_vm4, %v3106_v46 }
 0x28b   : > { %5691 = vmatpush3.bf16.msra.mxu1 %v6027_v15  ;;  %5686 = vmatprep.mubr.msk.bf16.mxu1 %vm2413_vm4, %v3107_v48 }
 0x28c   : > { %5692 = vmatprep.subr.bf16.mxu1 %v6028_v28 }
 0x28f   : > { %5693 = vmatpush3.bf16.msra.mxu1 %v6028_v28 }
 0x290   : > { %5702 = vmatprep.subr.bf16.mxu1 %v6029_v45 }
 0x292   : > { %5687 = vmatmul.mubr.msk.bf16.gmra.mrb[16].mxu1 %vm2413_vm4, %v3108_v5 }
 0x293   : > { %5694 = vmatprep.mubr.msk.bf16.mxu1 %vm2413_vm4, %v3219_v39  ;;  %v3333_v39 = vpack.c.bf16 %v2985_v35, %v2984_v42 }
 0x29a   : > { %5695 = vmatmul.mubr.msk.bf16.vlgmr.msra.gmra.mrb[12].mxu1 %vm2413_vm4, %v3220_v55 }
 0x29b   : > { %5703 = vmatpush3.bf16.msra.mxu1 %v6029_v45  ;;  %5698 = vmatprep.mubr.msk.bf16.mxu1 %vm2413_vm4, %v3221_v24 }
 0x29c   : > { %5704 = vmatprep.subr.bf16.mxu1 %v6030_v27 }
 0x29f   : > { %5705 = vmatpush3.bf16.msra.mxu1 %v6030_v27 }
 0x2a0   : > { %5714 = vmatprep.subr.bf16.mxu1 %v6031_v33 }
 0x2a2   : > { %5699 = vmatmul.mubr.msk.bf16.gmra.mrb[16].mxu1 %vm2413_vm4, %v3222_v58 }
 0x2a3   : > { %5706 = vmatprep.mubr.msk.bf16.mxu1 %vm2413_vm4, %v3333_v39 }
 0x2aa   : > { %5707 = vmatmul.mubr.msk.bf16.vlgmr.msra.gmra.mrb[12].mxu1 %vm2413_vm4, %v3334_v59 }
 0x2ab   : > { %5715 = vmatpush3.bf16.msra.mxu1 %v6031_v33  ;;  %5710 = vmatprep.mubr.msk.bf16.mxu1 %vm2413_vm4, %v3335_v25 }
 0x2ac   : > { %5716 = vmatprep.subr.bf16.mxu1 %v6032_v22 }
 0x2af   : > { %5717 = vmatpush3.bf16.msra.mxu1 %v6032_v22 }
 0x2b0   : > { %5726 = vmatprep.subr.bf16.mxu1 %v6033_v38 }
 0x2b2   : > { %5711 = vmatmul.mubr.msk.bf16.gmra.mrb[16].mxu1 %vm2413_vm4, %v3336_v1 }
 0x2b3   : > { %5718 = vmatprep.mubr.msk.bf16.mxu1 %vm2413_vm4, %v7197_v6 }
 0x2ba   : > { %5719 = vmatmul.mubr.msk.bf16.vlgmr.msra.gmra.mrb[12].mxu1 %vm2413_vm4, %v7202_v4 }
 0x2bb   : > { %5727 = vmatpush3.bf16.msra.mxu1 %v6033_v38  ;;  %5722 = vmatprep.mubr.msk.bf16.mxu1 %vm2413_vm4, %v7211_v54 }
 0x2bc   : > { %5728 = vmatprep.subr.bf16.mxu1 %v6034_v62 }
 0x2bf   : > { %5729 = vmatpush3.bf16.msra.mxu1 %v6034_v62 }
 0x2c0   : > { %5738 = vmatprep.subr.bf16.mxu1 %v6035_v49 }
 0x2c2   : > { %5723 = vmatmul.mubr.msk.bf16.gmra.mrb[16].mxu1 %vm2413_vm4, %v3451_v13 }
 0x2c3   : > { %5730 = vmatprep.mubr.msk.bf16.mxu1 %vm2413_vm4, %v7115_v32  ;;  %v3675_v32 = vld [vmem:[#allocation2 + $0x92] sm:$0xff] }
 0x2c4   : > { %v3679_v26 = vpack.c.bf16 %v3675_v32, %v3332_v47 }
 0x2ca   : > { %5731 = vmatmul.mubr.msk.bf16.vlgmr.msra.gmra.mrb[12].mxu1 %vm2413_vm4, %v7186_v52 }
 0x2cb   : > { %5739 = vmatpush3.bf16.msra.mxu1 %v6035_v49  ;;  %5734 = vmatprep.mubr.msk.bf16.mxu1 %vm2413_vm4, %v7190_v2  ;;  %v7346_v2 = vld [vmem:[%s7733_s6] ss:$0 sm:$0xff] }
 0x2cc   : > { %5740 = vmatprep.subr.bf16.mxu1 %v6036_v14 }
 0x2cf   : > { %5741 = vmatpush3.bf16.msra.mxu1 %v6036_v14 }
 0x2d2   : > { %5735 = vmatmul.mubr.msk.bf16.gmra.mrb[16].mxu1 %vm2413_vm4, %v3565_v53 }
 0x2d3   : > { %5742 = vmatprep.mubr.msk.bf16.mxu1 %vm2413_vm4, %v7216_v41 }
 0x2da   : > { %5743 = vmatmul.mubr.msk.bf16.vlgmr.msra.gmra.mrb[12].mxu1 %vm2413_vm4, %v7221_v9 }
 0x2db   : > { %5746 = vmatprep.mubr.msk.bf16.mxu1 %vm2413_vm4, %v7230_v56 }
 0x2e2   : > { %5747 = vmatmul.mubr.msk.bf16.gmra.mrb[16].mxu1 %vm2413_vm4, %v3679_v26 }
 0x3ad   : > { %v5744_v52 = vpop.f32.mrb[12].mxu1 }
 0x3ae   : > { %v3791_v60 = vmul.f32 %v5744_v52, %v7341_v0  ;;  %v3743_v30 = vpop.f32.mrb[13].mxu1 }
 0x3af   : > { %v3789_v34 = vmul.f32 %v7341_v0, %v3743_v30  ;;  %v5745_v29 = vpop.f32.mrb[14].mxu1 }
 0x3b0   : > { %v3806_v6 = vadd.f32 %v7346_v2, %v3791_v60  ;;  %v3792_v21 = vmul.f32 %v5745_v29, %v7341_v0  ;;  %v3746_v18 = vpop.f32.mrb[15].mxu1 }
 0x3b1   : > { %v3804_v4 = vadd.f32 %v7346_v2, %v3789_v34  ;;  %v3790_v37 = vmul.f32 %v7341_v0, %v3746_v18 }
 0x3b2   : > { %v3814_v23 = vmax.f32 %v3806_v6, 0.0  ;;  %v3807_v7 = vadd.f32 %v7346_v2, %v3792_v21 }
 0x3b3   : > { %v3812_v31 = vmax.f32 %v3804_v4, 0.0  ;;  %v3805_v35 = vadd.f32 %v7346_v2, %v3790_v37 }
 0x3b4   : > { %v3862_v42 = vcombine.high %v3814_v23, %v3814_v23  ;;  %v3869_v54 = vrot.slane %v3814_v23, %v6325_v36  ;;  %v7356_v61 = vmax.f32 %v3807_v7, 0.0 }
 0x3b5   : > { %v3828_v44 = vcombine.high %v3812_v31, %v3812_v31  ;;  %v3835_v63 = vrot.slane %v3812_v31, %v6325_v36  ;;  %v7360_v41 = vpop.f32.mrb[16].mxu1 }
 0x3b6   : > { %v3876_v12 = vrot.slane %v3862_v42, %v6325_v36  ;;  %v3877_v57 = vcombine.high %v3869_v54, %v3869_v54  ;;  %v4053_v9 = vsel %vm3996_vm0, %v3869_v54, -inf  ;;  %v3879_v15 = vcombine.high %v7356_v61, %v7356_v61  ;;  %v7366_v51 = vpop.f32.mrb[17].mxu1 }
 0x3b7   : > { %v4054_v43 = vrot.slane %v4053_v9, 4  ;;  %v3842_v56 = vrot.slane %v3828_v44, %v6325_v36  ;;  %v3843_v50 = vcombine.high %v3835_v63, %v3835_v63  ;;  %v3997_v46 = vsel %vm3996_vm0, %v3835_v63, -inf  ;;  %v7370_v28 = vpop.f32.mrb[18].mxu1 }
 0x3b8   : > { %v3878_v48 = vcombine.high %v3876_v12, %v3876_v12  ;;  %v4060_v45 = vsel %vm3996_vm0, %v3877_v57, -inf  ;;  %v4067_v11 = vsel %vm3996_vm0, %v3876_v12, -inf  ;;  %v3998_v5 = vrot.slane %v3997_v46, 4  ;;  %v7374_v55 = vpop.f32.mrb[19].mxu1 }
 0x3b9   : > { %v4055_v27 = vmax.f32 %v4053_v9, %v4054_v43  ;;  %v4061_v24 = vrot.slane %v4060_v45, 4  ;;  %v4068_v33 = vrot.slane %v4067_v11, 4  ;;  %v3844_v3 = vcombine.high %v3842_v56, %v3842_v56 }
 0x3ba   : > { %v4074_v58 = vsel %vm3996_vm0, %v3878_v48, -inf  ;;  %v3999_v39 = vmax.f32 %v3997_v46, %v3998_v5  ;;  %v4004_v59 = vsel %vm3996_vm0, %v3843_v50, -inf  ;;  %v4011_v22 = vsel %vm3996_vm0, %v3842_v56, -inf }
 0x3bb   : > { %v4056_v25 = vrot.slane %v4055_v27, 2  ;;  %v4062_v38 = vmax.f32 %v4060_v45, %v4061_v24  ;;  %v4069_v47 = vmax.f32 %v4067_v11, %v4068_v33  ;;  %v4075_v1 = vrot.slane %v4074_v58, 4 }
 0x3bc   : > { %v4000_v62 = vrot.slane %v3999_v39, 2  ;;  %v4005_v49 = vrot.slane %v4004_v59, 4  ;;  %v4012_v8 = vrot.slane %v4011_v22, 4  ;;  %v4018_v13 = vsel %vm3996_vm0, %v3844_v3, -inf }
 0x3bd   : > { %v4057_v14 = vmax.f32 %v4055_v27, %v4056_v25  ;;  %v4063_v17 = vrot.slane %v4062_v38, 2  ;;  %v4070_v53 = vrot.slane %v4069_v47, 2  ;;  %v4076_v32 = vmax.f32 %v4074_v58, %v4075_v1 }
 0x3be   : > { %v4001_v26 = vmax.f32 %v3999_v39, %v4000_v62  ;;  %v4006_v19 = vmax.f32 %v4004_v59, %v4005_v49  ;;  %v4013_v40 = vmax.f32 %v4011_v22, %v4012_v8  ;;  %v4019_v16 = vrot.slane %v4018_v13, 4 }
 0x3bf   : > { %v4058_v20 = vrot.slane %v4057_v14, 1  ;;  %v4064_v52 = vmax.f32 %v4062_v38, %v4063_v17  ;;  %v4071_v60 = vmax.f32 %v4069_v47, %v4070_v53  ;;  %v4077_v30 = vrot.slane %v4076_v32, 2 }
 0x3c0   : > { %v4002_v34 = vrot.slane %v4001_v26, 1  ;;  %v4007_v29 = vrot.slane %v4006_v19, 2  ;;  %v4014_v6 = vrot.slane %v4013_v40, 2  ;;  %v4020_v21 = vmax.f32 %v4018_v13, %v4019_v16 }
 0x3c1   : > { %v4059_v18 = vmax.f32 %v4057_v14, %v4058_v20  ;;  %v4065_v4 = vrot.slane %v4064_v52, 1  ;;  %v4072_v37 = vrot.slane %v4071_v60, 1  ;;  %v4078_v23 = vmax.f32 %v4076_v32, %v4077_v30 }
 0x3c2   : > { %v4003_v7 = vmax.f32 %v4001_v26, %v4002_v34  ;;  %v4008_v31 = vmax.f32 %v4006_v19, %v4007_v29  ;;  %v4015_v42 = vmax.f32 %v4013_v40, %v4014_v6  ;;  %v4021_v54 = vrot.slane %v4020_v21, 2 }
 0x3c3   : > { %v4066_v44 = vmax.f32 %v4064_v52, %v4065_v4  ;;  %v4073_v63 = vmax.f32 %v4071_v60, %v4072_v37  ;;  %v4079_v12 = vrot.slane %v4078_v23, 1  ;;  %v3813_v57 = vmax.f32 %v3805_v35, 0.0 }
 0x3c4   : > { %v4009_v9 = vrot.slane %v4008_v31, 1  ;;  %v4016_v43 = vrot.slane %v4015_v42, 1  ;;  %v4022_v56 = vmax.f32 %v4020_v21, %v4021_v54  ;;  %v7381_v46 = vsel %vm4221_vm1, %v4059_v18, -inf }
 0x3c5   : > { %v4080_v50 = vmax.f32 %v4078_v23, %v4079_v12  ;;  %v7384_v48 = vsel %vm4221_vm1, %v4003_v7, -inf  ;;  %v3886_v45 = vrot.slane %v7356_v61, %v6325_v36  ;;  %v7389_v11 = vsel %vm4221_vm1, %v4066_v44, -inf }
 0x3c6   : > { %v4010_v5 = vmax.f32 %v4008_v31, %v4009_v9  ;;  %v4023_v27 = vrot.slane %v4022_v56, 1  ;;  %v3893_v35 = vrot.slane %v3879_v15, %v6325_v36  ;;  %v7396_v24 = vsel %vm4221_vm1, %v4073_v63, -inf }
 0x3c7   : > { %v3894_v33 = vcombine.high %v3886_v45, %v3886_v45  ;;  %v4081_v3 = vsel %vm3996_vm0, %v3886_v45, -inf  ;;  %v3845_v58 = vcombine.high %v3813_v57, %v3813_v57  ;;  %v7400_v39 = vsel %vm4221_vm1, %v4080_v50, -inf }
 0x3c8   : > { %v7402_v59 = vmax.f32 %v4015_v42, %v4016_v43  ;;  %v7404_v22 = vmax.f32 %v4022_v56, %v4023_v27  ;;  %v3895_v25 = vcombine.high %v3893_v35, %v3893_v35  ;;  %v4082_v38 = vrot.slane %v4081_v3, 4 }
 0x3c9   : > { %v4088_v47 = vsel %vm3996_vm0, %v3894_v33, -inf  ;;  %v4095_v61 = vsel %vm3996_vm0, %v3893_v35, -inf  ;;  %v3852_v15 = vrot.slane %v3813_v57, %v6325_v36  ;;  %v7410_v1 = vsel %vm4221_vm1, %v4010_v5, -inf }
 0x3ca   : > { %v4089_v62 = vrot.slane %v4088_v47, 4  ;;  %v4096_v49 = vrot.slane %v4095_v61, 4  ;;  %v4102_v8 = vsel %vm3996_vm0, %v3895_v25, -inf  ;;  %v4083_v13 = vmax.f32 %v4081_v3, %v4082_v38 }
 0x3cb   : > { %v4103_v14 = vrot.slane %v4102_v8, 4  ;;  %v3859_v17 = vrot.slane %v3845_v58, %v6325_v36  ;;  %v3860_v53 = vcombine.high %v3852_v15, %v3852_v15  ;;  %v4025_v19 = vsel %vm3996_vm0, %v3852_v15, -inf }
 0x3cc   : > { %v4090_v32 = vmax.f32 %v4088_v47, %v4089_v62  ;;  %v4097_v26 = vmax.f32 %v4095_v61, %v4096_v49  ;;  %v3795_v40 = vmul.f32 %v7360_v41, %v7341_v0  ;;  %v4084_v16 = vrot.slane %v4083_v13, 2 }
 0x3cd   : > { %v4104_v20 = vmax.f32 %v4102_v8, %v4103_v14  ;;  %v3861_v52 = vcombine.high %v3859_v17, %v3859_v17  ;;  %v4026_v60 = vrot.slane %v4025_v19, 4  ;;  %v4032_v29 = vsel %vm3996_vm0, %v3860_v53, -inf }
 0x3ce   : > { %v4091_v30 = vrot.slane %v4090_v32, 2  ;;  %v4098_v34 = vrot.slane %v4097_v26, 2  ;;  %v4039_v6 = vsel %vm3996_vm0, %v3859_v17, -inf  ;;  %v4085_v21 = vmax.f32 %v4083_v13, %v4084_v16 }
 0x3cf   : > { %v4105_v18 = vrot.slane %v4104_v20, 2  ;;  %v4027_v4 = vmax.f32 %v4025_v19, %v4026_v60  ;;  %v4033_v37 = vrot.slane %v4032_v29, 4  ;;  %v4040_v31 = vrot.slane %v4039_v6, 4 }
 0x3d0   : > { %v4092_v23 = vmax.f32 %v4090_v32, %v4091_v30  ;;  %v4099_v7 = vmax.f32 %v4097_v26, %v4098_v34  ;;  %v4046_v42 = vsel %vm3996_vm0, %v3861_v52, -inf  ;;  %v4086_v41 = vrot.slane %v4085_v21, 1 }
 0x3d1   : > { %v4106_v54 = vmax.f32 %v4104_v20, %v4105_v18  ;;  %v4028_v44 = vrot.slane %v4027_v4, 2  ;;  %v4034_v63 = vmax.f32 %v4032_v29, %v4033_v37  ;;  %v4041_v9 = vmax.f32 %v4039_v6, %v4040_v31 }
 0x3d2   : > { %v4093_v12 = vrot.slane %v4092_v23, 1  ;;  %v4100_v57 = vrot.slane %v4099_v7, 1  ;;  %v4047_v43 = vrot.slane %v4046_v42, 4  ;;  %v4087_v56 = vmax.f32 %v4085_v21, %v4086_v41 }
 0x3d3   : > { %v4107_v50 = vrot.slane %v4106_v54, 1  ;;  %v4029_v45 = vmax.f32 %v4027_v4, %v4028_v44  ;;  %v4035_v5 = vrot.slane %v4034_v63, 2  ;;  %v4042_v33 = vrot.slane %v4041_v9, 2 }
 0x3d4   : > { %v4094_v27 = vmax.f32 %v4092_v23, %v4093_v12  ;;  %v4101_v35 = vmax.f32 %v4099_v7, %v4100_v57  ;;  %v4048_v3 = vmax.f32 %v4046_v42, %v4047_v43  ;;  %v4235_v25 = vsel %vm4221_vm1, %v4087_v56, -inf }
 0x3d5   : > { %v4108_v58 = vmax.f32 %v4106_v54, %v4107_v50  ;;  %v4030_v38 = vrot.slane %v4029_v45, 1  ;;  %v4036_v47 = vmax.f32 %v4034_v63, %v4035_v5  ;;  %v4236_v61 = vmax.f32 %v7381_v46, %v4235_v25 }
 0x3d6   : > { %v4238_v15 = vsel %vm4221_vm1, %v4094_v27, -inf  ;;  %v4241_v62 = vsel %vm4221_vm1, %v4101_v35, -inf  ;;  %v4043_v49 = vmax.f32 %v4041_v9, %v4042_v33  ;;  %v4049_v19 = vrot.slane %v4048_v3, 2 }
 0x3d7   : > { %v4239_v8 = vmax.f32 %v7389_v11, %v4238_v15  ;;  %v4242_v13 = vmax.f32 %v7396_v24, %v4241_v62  ;;  %v4244_v14 = vsel %vm4221_vm1, %v4108_v58, -inf  ;;  %v4031_v17 = vmax.f32 %v4029_v45, %v4030_v38 }
 0x3d8   : > { %v4245_v53 = vmax.f32 %v7400_v39, %v4244_v14  ;;  %v4037_v32 = vrot.slane %v4036_v47, 1  ;;  %v4044_v26 = vrot.slane %v4043_v49, 1  ;;  %v3810_v20 = vadd.f32 %v7346_v2, %v3795_v40 }
 0x3d9   : > { %v4303_v16 = vsel %vm2693_vm5, %v4239_v8, %v4236_v61  ;;  %v4223_v46 = vsel %vm4221_vm1, %v4031_v17, -inf  ;;  %v3793_v52 = vmul.f32 %v7341_v0, %v7366_v51  ;;  %v4050_v30 = vmax.f32 %v4048_v3, %v4049_v19 }
 0x3da   : > { %v4304_v11 = vsel %vm2695_vm6, %v4242_v13, %v4303_v16  ;;  %v4038_v24 = vmax.f32 %v4036_v47, %v4037_v32  ;;  %v4045_v60 = vmax.f32 %v4043_v49, %v4044_v26  ;;  %v4224_v39 = vmax.f32 %v7384_v48, %v4223_v46 }
 0x3db   : > { %v4305_v34 = vsel %vm2697_vm7, %v4245_v53, %v4304_v11  ;;  %v3818_v29 = vmax.f32 %v3810_v20, 0.0  ;;  %v3808_v6 = vadd.f32 %v7346_v2, %v3793_v52  ;;  %v4228_v21 = vsel %vm4221_vm1, %v7402_v59, -inf }
 0x3dc   : > { %4318 = vst.msk [vmem:[#allocation3 + $0x11] sm:$0xf] %vm4316_vm2, %v4305_v34  ;;  %v4051_v40 = vrot.slane %v4050_v30, 1  ;;  %v4226_v51 = vsel %vm4221_vm1, %v4038_v24, -inf  ;;  %v4229_v18 = vsel %vm4221_vm1, %v4045_v60, -inf  ;;  %v4231_v48 = vsel %vm4221_vm1, %v7404_v22, -inf }
 0x3dd   : > { %v4227_v4 = vmax.f32 %v7410_v1, %v4226_v51  ;;  %v4230_v37 = vmax.f32 %v4228_v21, %v4229_v18  ;;  %v3930_v23 = vcombine.high %v3818_v29, %v3818_v29  ;;  %v3937_v7 = vrot.slane %v3818_v29, %v6325_v36 }
 0x3de   : > { %v4052_v31 = vmax.f32 %v4050_v30, %v4051_v40  ;;  %v3816_v42 = vmax.f32 %v3808_v6, 0.0  ;;  %v3796_v59 = vmul.f32 %v7370_v28, %v7341_v0  ;;  %v3794_v40 = vmul.f32 %v7341_v0, %v7374_v55 }
 0x3df   : > { %v4300_v41 = vsel %vm2693_vm5, %v4227_v4, %v4224_v39  ;;  %v3944_v54 = vrot.slane %v3930_v23, %v6325_v36  ;;  %v3945_v44 = vcombine.high %v3937_v7, %v3937_v7  ;;  %v4165_v63 = vsel %vm3996_vm0, %v3937_v7, -inf }
 0x3e0   : > { %v4232_v1 = vsel %vm4221_vm1, %v4052_v31, -inf  ;;  %v4301_v12 = vsel %vm2695_vm6, %v4230_v37, %v4300_v41  ;;  %v4166_v57 = vrot.slane %v4165_v63, 4  ;;  %v3896_v9 = vcombine.high %v3816_v42, %v3816_v42 }
 0x3e1   : > { %v4233_v43 = vmax.f32 %v4231_v48, %v4232_v1  ;;  %v3946_v22 = vcombine.high %v3944_v54, %v3944_v54  ;;  %v4172_v56 = vsel %vm3996_vm0, %v3945_v44, -inf  ;;  %v4179_v50 = vsel %vm3996_vm0, %v3944_v54, -inf }
 0x3e2   : > { %v4167_v28 = vmax.f32 %v4165_v63, %v4166_v57  ;;  %v4173_v45 = vrot.slane %v4172_v56, 4  ;;  %v4180_v5 = vrot.slane %v4179_v50, 4  ;;  %v3903_v27 = vrot.slane %v3816_v42, %v6325_v36 }
 0x3e3   : > { %v4302_v35 = vsel %vm2697_vm7, %v4233_v43, %v4301_v12  ;;  %v4186_v33 = vsel %vm3996_vm0, %v3946_v22, -inf  ;;  %v3910_v3 = vrot.slane %v3896_v9, %v6325_v36  ;;  %v3811_v17 = vadd.f32 %v7346_v2, %v3796_v59 }
 0x3e4   : > { %4317 = vst.msk [vmem:[#allocation3 + $0x9] sm:$0xf] %vm4316_vm2, %v4302_v35  ;;  %v4168_v58 = vrot.slane %v4167_v28, 2  ;;  %v4174_v25 = vmax.f32 %v4172_v56, %v4173_v45  ;;  %v4181_v38 = vmax.f32 %v4179_v50, %v4180_v5  ;;  %v4187_v47 = vrot.slane %v4186_v33, 4 }
 0x3e5   : > { %v3911_v61 = vcombine.high %v3903_v27, %v3903_v27  ;;  %v3912_v15 = vcombine.high %v3910_v3, %v3910_v3  ;;  %v4109_v62 = vsel %vm3996_vm0, %v3903_v27, -inf  ;;  %v4123_v49 = vsel %vm3996_vm0, %v3910_v3, -inf }
 0x3e6   : > { %v4175_v8 = vrot.slane %v4174_v25, 2  ;;  %v4182_v13 = vrot.slane %v4181_v38, 2  ;;  %v4188_v14 = vmax.f32 %v4186_v33, %v4187_v47  ;;  %v4169_v53 = vmax.f32 %v4167_v28, %v4168_v58 }
 0x3e7   : > { %v4110_v32 = vrot.slane %v4109_v62, 4  ;;  %v4124_v26 = vrot.slane %v4123_v49, 4  ;;  %v4116_v19 = vsel %vm3996_vm0, %v3911_v61, -inf  ;;  %v4130_v52 = vsel %vm3996_vm0, %v3912_v15, -inf }
 0x3e8   : > { %v4176_v16 = vmax.f32 %v4174_v25, %v4175_v8  ;;  %v4183_v46 = vmax.f32 %v4181_v38, %v4182_v13  ;;  %v4189_v20 = vrot.slane %v4188_v14, 2  ;;  %v3819_v11 = vmax.f32 %v3811_v17, 0.0 }
 0x3e9   : > { %v4170_v24 = vrot.slane %v4169_v53, 1  ;;  %v4111_v60 = vmax.f32 %v4109_v62, %v4110_v32  ;;  %v4117_v30 = vrot.slane %v4116_v19, 4  ;;  %v4125_v34 = vmax.f32 %v4123_v49, %v4124_v26 }
 0x3ea   : > { %v4131_v39 = vrot.slane %v4130_v52, 4  ;;  %v4177_v29 = vrot.slane %v4176_v16, 1  ;;  %v4184_v6 = vrot.slane %v4183_v46, 1  ;;  %v4190_v21 = vmax.f32 %v4188_v14, %v4189_v20 }
 0x3eb   : > { %v3947_v51 = vcombine.high %v3819_v11, %v3819_v11  ;;  %v4171_v18 = vmax.f32 %v4169_v53, %v4170_v24  ;;  %v4112_v4 = vrot.slane %v4111_v60, 2  ;;  %v4118_v37 = vmax.f32 %v4116_v19, %v4117_v30 }
 0x3ec   : > { %v4126_v23 = vrot.slane %v4125_v34, 2  ;;  %v7467_v7 = vmax.f32 %v4130_v52, %v4131_v39  ;;  %v3954_v48 = vrot.slane %v3819_v11, %v6325_v36  ;;  %v4178_v42 = vmax.f32 %v4176_v16, %v4177_v29 }
 0x3ed   : > { %v3961_v31 = vrot.slane %v3947_v51, %v6325_v36  ;;  %v4185_v59 = vmax.f32 %v4183_v46, %v4184_v6  ;;  %v4191_v41 = vrot.slane %v4190_v21, 1  ;;  %v3809_v54 = vadd.f32 %v7346_v2, %v3794_v40 }
 0x3ee   : > { %v3962_v44 = vcombine.high %v3954_v48, %v3954_v48  ;;  %v4193_v0 = vsel %vm3996_vm0, %v3954_v48, -inf  ;;  %v7475_v1 = vsel %vm4221_vm1, %v4171_v18, -inf  ;;  %v7477_v12 = vmax.f32 %v4111_v60, %v4112_v4 }
 0x3ef   : > { %v3963_v63 = vcombine.high %v3961_v31, %v3961_v31  ;;  %v4207_v55 = vsel %vm3996_vm0, %v3961_v31, -inf  ;;  %v4119_v57 = vrot.slane %v4118_v37, 2  ;;  %v7479_v9 = vmax.f32 %v4125_v34, %v4126_v23 }
 0x3f0   : > { %v4194_v43 = vrot.slane %v4193_v0, 4  ;;  %v4200_v22 = vsel %vm3996_vm0, %v3962_v44, -inf  ;;  %v4208_v56 = vrot.slane %v4207_v55, 4  ;;  %v4192_v50 = vmax.f32 %v4190_v21, %v4191_v41 }
 0x3f1   : > { %v4214_v2 = vsel %vm3996_vm0, %v3963_v63, -inf  ;;  %v4133_v28 = vrot.slane %v7467_v7, 2  ;;  %v4201_v45 = vrot.slane %v4200_v22, 4  ;;  %v4261_v27 = vsel %vm4221_vm1, %v4178_v42, -inf }
 0x3f2   : > { %v4215_v5 = vrot.slane %v4214_v2, 4  ;;  %v4195_v35 = vmax.f32 %v4193_v0, %v4194_v43  ;;  %v4209_v33 = vmax.f32 %v4207_v55, %v4208_v56  ;;  %v3817_v3 = vmax.f32 %v3809_v54, 0.0 }
 0x3f3   : > { %v4264_v58 = vsel %vm4221_vm1, %v4185_v59, -inf  ;;  %v4120_v25 = vmax.f32 %v4118_v37, %v4119_v57  ;;  %v4202_v38 = vmax.f32 %v4200_v22, %v4201_v45  ;;  %v4267_v8 = vsel %vm4221_vm1, %v4192_v50, -inf }
 0x3f4   : > { %v4216_v47 = vmax.f32 %v4214_v2, %v4215_v5  ;;  %v4196_v61 = vrot.slane %v4195_v35, 2  ;;  %v4210_v15 = vrot.slane %v4209_v33, 2  ;;  %v3913_v62 = vcombine.high %v3817_v3, %v3817_v3 }
 0x3f5   : > { %v3920_v49 = vrot.slane %v3817_v3, %v6325_v36  ;;  %v4114_v13 = vrot.slane %v7477_v12, 1  ;;  %v4203_v14 = vrot.slane %v4202_v38, 2  ;;  %v4121_v16 = vrot.slane %v4120_v25, 1 }
 0x3f6   : > { %v4217_v17 = vrot.slane %v4216_v47, 2  ;;  %v4197_v53 = vmax.f32 %v4195_v35, %v4196_v61  ;;  %v4211_v32 = vmax.f32 %v4209_v33, %v4210_v15  ;;  %v3927_v26 = vrot.slane %v3913_v62, %v6325_v36 }
 0x3f7   : > { %v3928_v19 = vcombine.high %v3920_v49, %v3920_v49  ;;  %v4204_v46 = vmax.f32 %v4202_v38, %v4203_v14  ;;  %v4137_v52 = vsel %vm3996_vm0, %v3920_v49, -inf  ;;  %v4134_v22 = vmax.f32 %v7467_v7, %v4133_v28 }
 0x3f8   : > { %v4218_v20 = vmax.f32 %v4216_v47, %v4217_v17  ;;  %v4198_v11 = vrot.slane %v4197_v53, 1  ;;  %v4212_v24 = vrot.slane %v4211_v32, 1  ;;  %v3929_v60 = vcombine.high %v3927_v26, %v3927_v26 }
 0x3f9   : > { %v4138_v30 = vrot.slane %v4137_v52, 4  ;;  %v4205_v34 = vrot.slane %v4204_v46, 1  ;;  %v4144_v29 = vsel %vm3996_vm0, %v3928_v19, -inf  ;;  %v4151_v6 = vsel %vm3996_vm0, %v3927_v26, -inf }
 0x3fa   : > { %v4219_v39 = vrot.slane %v4218_v20, 1  ;;  %v4199_v21 = vmax.f32 %v4197_v53, %v4198_v11  ;;  %v4213_v40 = vmax.f32 %v4211_v32, %v4212_v24  ;;  %v4145_v36 = vrot.slane %v4144_v29, 4 }
 0x3fb   : > { %v4139_v51 = vmax.f32 %v4137_v52, %v4138_v30  ;;  %v4206_v18 = vmax.f32 %v4204_v46, %v4205_v34  ;;  %v4152_v37 = vrot.slane %v4151_v6, 4  ;;  %v4158_v23 = vsel %vm3996_vm0, %v3929_v60, -inf }
 0x3fc   : > { %v4220_v4 = vmax.f32 %v4218_v20, %v4219_v39  ;;  %v4259_v48 = vsel %vm4221_vm1, %v4199_v21, -inf  ;;  %v4265_v31 = vsel %vm4221_vm1, %v4213_v40, -inf  ;;  %v4146_v59 = vmax.f32 %v4144_v29, %v4145_v36  ;;  %v6041_v29 = vld [vmem:[#allocation3 + $0x1] ss:$8 sps:$4 sm:$0xff]   ;;  %v6045_v36 = vld [vmem:[%s7734_s7 + $0x10] sm:$0xff]  }
 0x3fd   : > { %v4140_v42 = vrot.slane %v4139_v51, 2  ;;  %v4260_v41 = vmax.f32 %v7475_v1, %v4259_v48  ;;  %v4262_v54 = vsel %vm4221_vm1, %v4206_v18, -inf  ;;  %v4266_v44 = vmax.f32 %v4264_v58, %v4265_v31  ;;  %v6043_v21 = vld [vmem:[%s7734_s7] sm:$0xff]   ;;  %v6046_v18 = vld [vmem:[%s7734_s7 + $0x18] sm:$0xff]   ;;  %v6050_v31 = vld [vmem:[%s7734_s7 + $0x48] sm:$0xff]  }
 0x3fe   : > { %v4268_v63 = vsel %vm4221_vm1, %v4220_v4, -inf  ;;  %v4263_v0 = vmax.f32 %v4261_v27, %v4262_v54  ;;  %v4147_v43 = vrot.slane %v4146_v59, 2  ;;  %v4153_v56 = vmax.f32 %v4151_v6, %v4152_v37  ;;  %v6047_v37 = vld [vmem:[#allocation3] ss:$8 sps:$4 sm:$0xff]  }
 0x3ff   : > { %v4269_v55 = vmax.f32 %v4267_v8, %v4268_v63  ;;  %v4141_v57 = vmax.f32 %v4139_v51, %v4140_v42  ;;  %v4159_v2 = vrot.slane %v4158_v23, 4  ;;  %v4115_v50 = vmax.f32 %v7477_v12, %v4114_v13  ;;  %v6044_v51 = vld [vmem:[%s7734_s7 + $0x8] sm:$0xff]   ;;  %v6051_v42 = vld [vmem:[%s7734_s7 + $0x50] sm:$0xff]  }
 0x400   : > { %v4309_v45 = vsel %vm2693_vm5, %v4263_v0, %v4260_v41  ;;  %v4148_v35 = vmax.f32 %v4146_v59, %v4147_v43  ;;  %v4128_v1 = vrot.slane %v7479_v9, 1  ;;  %v4154_v3 = vrot.slane %v4153_v56, 2  ;;  %v6052_v59 = vld [vmem:[%s7734_s7 + $0x58] sm:$0xff]   ;;  %v6053_v54 = vld [vmem:[#allocation3 + $0x2] ss:$8 sps:$4 sm:$0xff]  }
 0x401   : > { %v4142_v5 = vrot.slane %v4141_v57, 1  ;;  %v4310_v33 = vsel %vm2695_vm6, %v4266_v44, %v4309_v45  ;;  %v4160_v58 = vmax.f32 %v4158_v23, %v4159_v2  ;;  %v4122_v27 = vmax.f32 %v4120_v25, %v4121_v16  ;;  %v6049_v23 = vld [vmem:[%s7734_s7 + $0x40] sm:$0xff]   ;;  %v6056_v0 = vld [vmem:[%s7734_s7 + $0x68] sm:$0xff]   ;;  %v6063_v45 = vld [vmem:[%s7734_s7 + $0x90] sm:$0xff]  }
 0x402   : > { %v4311_v38 = vsel %vm2697_vm7, %v4269_v55, %v4310_v33  ;;  %v4149_v61 = vrot.slane %v4148_v35, 1  ;;  %v4135_v7 = vrot.slane %v4134_v22, 1  ;;  %v4155_v28 = vmax.f32 %v4153_v56, %v4154_v3  ;;  %v6055_v44 = vld [vmem:[%s7734_s7 + $0x60] sm:$0xff]   ;;  %v6057_v55 = vld [vmem:[%s7734_s7 + $0x70] sm:$0xff]  }
 0x403   : > { %v4143_v47 = vmax.f32 %v4141_v57, %v4142_v5  ;;  %4320 = vst.msk [vmem:[#allocation3 + $0x21] sm:$0xf] %vm4316_vm2, %v4311_v38  ;;  %v4161_v12 = vrot.slane %v4160_v58, 2  ;;  %v4246_v15 = vsel %vm4221_vm1, %v4115_v50, -inf  ;;  %v4129_v8 = vmax.f32 %v7479_v9, %v4128_v1  ;;  %v6058_v57 = vld [vmem:[%s7734_s7 + $0x78] sm:$0xff]   ;;  %v6061_v56 = vld [vmem:[%s7734_s7 + $0x80] sm:$0xff]  }
 0x404   : > { %v4150_v62 = vmax.f32 %v4148_v35, %v4149_v61  ;;  %v4156_v13 = vrot.slane %v4155_v28, 1  ;;  %v4249_v25 = vsel %vm4221_vm1, %v4122_v27, -inf  ;;  %v4136_v32 = vmax.f32 %v4134_v22, %v4135_v7  ;;  %v6059_v22 = vld [vmem:[#allocation3 + $0x8] ss:$8 sps:$4 sm:$0xff]   ;;  %v6064_v5 = vld [vmem:[%s7734_s7 + $0x98] sm:$0xff]   ;;  %v6067_v33 = vld [vmem:[%s7734_s7 + $0xa0] sm:$0xff]  }
 0x405   : > { %v4247_v49 = vsel %vm4221_vm1, %v4143_v47, -inf  ;;  %v4162_v14 = vmax.f32 %v4160_v58, %v4161_v12  ;;  %v4252_v46 = vsel %vm4221_vm1, %v4129_v8, -inf  ;;  %v6062_v50 = vld [vmem:[%s7734_s7 + $0x88] sm:$0xff]   ;;  %v6069_v27 = vld [vmem:[%s7734_s7 + $0xb0] sm:$0xff]   ;;  %v6070_v38 = vld [vmem:[%s7734_s7 + $0xb8] sm:$0xff]  }
 0x406   : > { %v4248_v17 = vmax.f32 %v4246_v15, %v4247_v49  ;;  %v4250_v53 = vsel %vm4221_vm1, %v4150_v62, -inf  ;;  %v4157_v26 = vmax.f32 %v4155_v28, %v4156_v13  ;;  %v4255_v9 = vsel %vm4221_vm1, %v4136_v32, -inf  ;;  %v6065_v1 = vld [vmem:[#allocation3 + $0x9] ss:$8 sps:$4 sm:$0xff]   ;;  %v6073_v7 = vld [vmem:[%s7734_s7 + $0xc0] sm:$0xff]   ;;  %v6076_v62 = vld [vmem:[%s7734_s7 + $0xd8] sm:$0xff]  }
 0x407   : > { %v4163_v19 = vrot.slane %v4162_v14, 1  ;;  %v4251_v16 = vmax.f32 %v4249_v25, %v4250_v53  ;;  %v6068_v58 = vld [vmem:[%s7734_s7 + $0xa8] sm:$0xff]   ;;  %v6075_v15 = vld [vmem:[%s7734_s7 + $0xd0] sm:$0xff]   ;;  %v6079_v13 = vld [vmem:[%s7734_s7 + $0xe0] sm:$0xff]  }
 0x408   : > { %v4253_v52 = vsel %vm4221_vm1, %v4157_v26, -inf  ;;  %v6071_v61 = vld [vmem:[#allocation3 + $0xa] ss:$8 sps:$4 sm:$0xff]   ;;  %v6082_v53 = vld [vmem:[%s7734_s7 + $0xf8] sm:$0xff]  }
 0x409   : > { %v4164_v20 = vmax.f32 %v4162_v14, %v4163_v19  ;;  %v4306_v11 = vsel %vm2693_vm5, %v4251_v16, %v4248_v17  ;;  %v4254_v24 = vmax.f32 %v4252_v46, %v4253_v52  ;;  %v6074_v12 = vld [vmem:[%s7734_s7 + $0xc8] sm:$0xff]   ;;  %v6081_v25 = vld [vmem:[%s7734_s7 + $0xf0] sm:$0xff]   ;;  %v6085_v19 = vld [vmem:[%s7734_s7 + $0x100] sm:$0xff]  }
 0x40a   : > { %v6078_v8 = vld [vmem:[#allocation3 + $0x20] ss:$8 sps:$4 sm:$0xff]   ;;  %v6088_v52 = vld [vmem:[%s7734_s7 + $0x118] sm:$0xff]  }
 0x40b   : > { %v4256_v60 = vsel %vm4221_vm1, %v4164_v20, -inf  ;;  %v4307_v34 = vsel %vm2695_vm6, %v4254_v24, %v4306_v11  ;;  %v6080_v17 = vld [vmem:[%s7734_s7 + $0xe8] sm:$0xff]   ;;  %v6087_v20 = vld [vmem:[%s7734_s7 + $0x110] sm:$0xff]  }
 0x40c   : > { %v4257_v30 = vmax.f32 %v4255_v9, %v4256_v60  ;;  %v6084_v26 = vld [vmem:[#allocation3 + $0x21] ss:$8 sps:$4 sm:$0xff]   ;;  %v5483_v60 = vld [vmem:[%s7735_s8] ss:$0 sm:$0xff] }
 0x40d   : > { %v6086_v46 = vld [vmem:[%s7734_s7 + $0x108] sm:$0xff]  }
 0x40e   : > { %v4308_v39 = vsel %vm2697_vm7, %v4257_v30, %v4307_v34  ;;  %v6090_v24 = vld [vmem:[#allocation3 + $0x22] ss:$8 sps:$4 sm:$0xff]   ;;  %v5484_v34 = vld [vmem:[%s7736_s9] ss:$0 sm:$0xff] }
 0x40f   : > { %4319 = vst.msk [vmem:[#allocation3 + $0x19] sm:$0xf] %vm4316_vm2, %v4308_v39 }
 0x416   : > { %v6042_v6 = vld [vmem:[#allocation3 + $0x11] ss:$8 sps:$4 sm:$0xff]  }
 0x417   : > { %v4354_v40 = vpack.c.bf16 %v6042_v6, %v6041_v29  ;;  %v6048_v4 = vld [vmem:[#allocation3 + $0x10] ss:$8 sps:$4 sm:$0xff]  }
 0x418   : > { %v4333_v48 = vpack.c.bf16 %v6048_v4, %v6047_v37  ;;  %v6054_v41 = vld [vmem:[#allocation3 + $0x12] ss:$8 sps:$4 sm:$0xff]  }
 0x419   : > { %5759 = vmatmul.mubr.msk.bf16.vlgmr.msra.gmra.mrb[20].mxu0 %vm4221_vm1, %v4354_v40  ;;  %v4512_v63 = vpack.c.bf16 %v6054_v41, %v6053_v54  ;;  %v6060_v43 = vld [vmem:[#allocation3 + $0x18] ss:$8 sps:$4 sm:$0xff]  }
 0x41a   : > { %5763 = vmatpush3.bf16.msra.mxu0 %v6043_v21  ;;  %5770 = vmatprep.mubr.msk.bf16.mxu0 %vm6162_vm15, %v6161_v10  ;;  %v4604_v2 = vpack.c.bf16 %v6060_v43, %v6059_v22  ;;  %v6066_v35 = vld [vmem:[#allocation3 + $0x19] ss:$8 sps:$4 sm:$0xff]  }
 0x41b   : > { %5764 = vmatprep.subr.bf16.mxu0 %v6161_v10  ;;  %v4696_v3 = vpack.c.bf16 %v6066_v35, %v6065_v1  ;;  %v6072_v47 = vld [vmem:[#allocation3 + $0x1a] ss:$8 sps:$4 sm:$0xff]  }
 0x41c   : > { %v4788_v28 = vpack.c.bf16 %v6072_v47, %v6071_v61  ;;  %v6077_v49 = vld [vmem:[#allocation3 + $0x10] ss:$8 sps:$4 sm:$0xff]  }
 0x41d   : > { %v4881_v14 = vpack.c.bf16 %v6078_v8, %v6077_v49  ;;  %v6083_v32 = vld [vmem:[#allocation3 + $0x11] ss:$8 sps:$4 sm:$0xff]  }
 0x41e   : > { %5765 = vmatpush3.bf16.msra.mxu0 %v6044_v51  ;;  %v4973_v16 = vpack.c.bf16 %v6084_v26, %v6083_v32  ;;  %v6089_v11 = vld [vmem:[#allocation3 + $0x12] ss:$8 sps:$4 sm:$0xff]  }
 0x41f   : > { %5766 = vmatprep.subr.bf16.mxu0 %v6161_v10  ;;  %v5065_v9 = vpack.c.bf16 %v6090_v24, %v6089_v11 }
 0x422   : > { %5767 = vmatpush3.bf16.msra.mxu0 %v6045_v36 }
 0x423   : > { %5768 = vmatprep.subr.bf16.mxu0 %v6161_v10 }
 0x426   : > { %5769 = vmatpush3.bf16.msra.mxu0 %v6046_v18 }
 0x427   : > { %5774 = vmatprep.subr.bf16.mxu0 %v6161_v10 }
 0x429   : > { %5771 = vmatmul.mubr.msk.bf16.vlgmr.msra.gmra.mrb[20].mxu0 %vm4221_vm1, %v4333_v48 }
 0x42a   : > { %5775 = vmatpush3.bf16.msra.mxu0 %v6049_v23  ;;  %5782 = vmatprep.mubr.msk.bf16.mxu0 %vm6162_vm15, %v6161_v10 }
 0x42b   : > { %5776 = vmatprep.subr.bf16.mxu0 %v6161_v10 }
 0x42e   : > { %5777 = vmatpush3.bf16.msra.mxu0 %v6050_v31 }
 0x42f   : > { %5778 = vmatprep.subr.bf16.mxu0 %v6161_v10 }
 0x432   : > { %5779 = vmatpush3.bf16.msra.mxu0 %v6051_v42 }
 0x433   : > { %5780 = vmatprep.subr.bf16.mxu0 %v6161_v10 }
 0x436   : > { %5781 = vmatpush3.bf16.msra.mxu0 %v6052_v59 }
 0x437   : > { %5786 = vmatprep.subr.bf16.mxu0 %v6161_v10 }
 0x439   : > { %5783 = vmatmul.mubr.msk.bf16.vlgmr.msra.gmra.mrb[20].mxu0 %vm4221_vm1, %v4512_v63 }
 0x43a   : > { %5787 = vmatpush3.bf16.msra.mxu0 %v6055_v44  ;;  %5794 = vmatprep.mubr.msk.bf16.mxu0 %vm6162_vm15, %v6161_v10 }
 0x43b   : > { %5788 = vmatprep.subr.bf16.mxu0 %v6161_v10 }
 0x43e   : > { %5789 = vmatpush3.bf16.msra.mxu0 %v6056_v0 }
 0x43f   : > { %5790 = vmatprep.subr.bf16.mxu0 %v6161_v10 }
 0x442   : > { %5791 = vmatpush3.bf16.msra.mxu0 %v6057_v55 }
 0x443   : > { %5792 = vmatprep.subr.bf16.mxu0 %v6161_v10 }
 0x446   : > { %5793 = vmatpush3.bf16.msra.mxu0 %v6058_v57 }
 0x447   : > { %5798 = vmatprep.subr.bf16.mxu0 %v6161_v10 }
 0x449   : > { %5795 = vmatmul.mubr.msk.bf16.vlgmr.msra.gmra.mrb[20].mxu0 %vm4221_vm1, %v4604_v2 }
 0x44a   : > { %5799 = vmatpush3.bf16.msra.mxu0 %v6061_v56  ;;  %5806 = vmatprep.mubr.msk.bf16.mxu0 %vm6162_vm15, %v6161_v10 }
 0x44b   : > { %5800 = vmatprep.subr.bf16.mxu0 %v6161_v10 }
 0x44e   : > { %5801 = vmatpush3.bf16.msra.mxu0 %v6062_v50 }
 0x44f   : > { %5802 = vmatprep.subr.bf16.mxu0 %v6161_v10 }
 0x452   : > { %5803 = vmatpush3.bf16.msra.mxu0 %v6063_v45 }
 0x453   : > { %5804 = vmatprep.subr.bf16.mxu0 %v6161_v10 }
 0x456   : > { %5805 = vmatpush3.bf16.msra.mxu0 %v6064_v5 }
 0x457   : > { %5810 = vmatprep.subr.bf16.mxu0 %v6161_v10 }
 0x459   : > { %5807 = vmatmul.mubr.msk.bf16.vlgmr.msra.gmra.mrb[20].mxu0 %vm4221_vm1, %v4696_v3 }
 0x45a   : > { %5811 = vmatpush3.bf16.msra.mxu0 %v6067_v33  ;;  %5818 = vmatprep.mubr.msk.bf16.mxu0 %vm6162_vm15, %v6161_v10 }
 0x45b   : > { %5812 = vmatprep.subr.bf16.mxu0 %v6161_v10 }
 0x45e   : > { %5813 = vmatpush3.bf16.msra.mxu0 %v6068_v58 }
 0x45f   : > { %5814 = vmatprep.subr.bf16.mxu0 %v6161_v10 }
 0x462   : > { %5815 = vmatpush3.bf16.msra.mxu0 %v6069_v27 }
 0x463   : > { %5816 = vmatprep.subr.bf16.mxu0 %v6161_v10 }
 0x466   : > { %5817 = vmatpush3.bf16.msra.mxu0 %v6070_v38 }
 0x467   : > { %5822 = vmatprep.subr.bf16.mxu0 %v6161_v10 }
 0x469   : > { %5819 = vmatmul.mubr.msk.bf16.vlgmr.msra.gmra.mrb[20].mxu0 %vm4221_vm1, %v4788_v28 }
 0x46a   : > { %5823 = vmatpush3.bf16.msra.mxu0 %v6073_v7  ;;  %5830 = vmatprep.mubr.msk.bf16.mxu0 %vm6162_vm15, %v6161_v10 }
 0x46b   : > { %5824 = vmatprep.subr.bf16.mxu0 %v6161_v10 }
 0x46e   : > { %5825 = vmatpush3.bf16.msra.mxu0 %v6074_v12 }
 0x46f   : > { %5826 = vmatprep.subr.bf16.mxu0 %v6161_v10 }
 0x472   : > { %5827 = vmatpush3.bf16.msra.mxu0 %v6075_v15 }
 0x473   : > { %5828 = vmatprep.subr.bf16.mxu0 %v6161_v10 }
 0x476   : > { %5829 = vmatpush3.bf16.msra.mxu0 %v6076_v62 }
 0x477   : > { %5834 = vmatprep.subr.bf16.mxu0 %v6161_v10 }
 0x479   : > { %5831 = vmatmul.mubr.msk.bf16.vlgmr.msra.gmra.mrb[20].mxu0 %vm4221_vm1, %v4881_v14 }
 0x47a   : > { %5835 = vmatpush3.bf16.msra.mxu0 %v6079_v13  ;;  %5842 = vmatprep.mubr.msk.bf16.mxu0 %vm6162_vm15, %v6161_v10 }
 0x47b   : > { %5836 = vmatprep.subr.bf16.mxu0 %v6161_v10 }
 0x47e   : > { %5837 = vmatpush3.bf16.msra.mxu0 %v6080_v17 }
 0x47f   : > { %5838 = vmatprep.subr.bf16.mxu0 %v6161_v10 }
 0x482   : > { %5839 = vmatpush3.bf16.msra.mxu0 %v6081_v25 }
 0x483   : > { %5840 = vmatprep.subr.bf16.mxu0 %v6161_v10 }
 0x486   : > { %5841 = vmatpush3.bf16.msra.mxu0 %v6082_v53 }
 0x487   : > { %5846 = vmatprep.subr.bf16.mxu0 %v6161_v10 }
 0x489   : > { %5843 = vmatmul.mubr.msk.bf16.vlgmr.msra.gmra.mrb[20].mxu0 %vm4221_vm1, %v4973_v16 }
 0x48a   : > { %5847 = vmatpush3.bf16.msra.mxu0 %v6085_v19  ;;  %5854 = vmatprep.mubr.msk.bf16.mxu0 %vm6162_vm15, %v6161_v10 }
 0x48b   : > { %5848 = vmatprep.subr.bf16.mxu0 %v6161_v10 }
 0x48e   : > { %5849 = vmatpush3.bf16.msra.mxu0 %v6086_v46 }
 0x48f   : > { %5850 = vmatprep.subr.bf16.mxu0 %v6161_v10 }
 0x492   : > { %5851 = vmatpush3.bf16.msra.mxu0 %v6087_v20 }
 0x493   : > { %5852 = vmatprep.subr.bf16.mxu0 %v6161_v10 }
 0x496   : > { %5853 = vmatpush3.bf16.msra.mxu0 %v6088_v52 }
 0x499   : > { %5855 = vmatmul.mubr.msk.bf16.vlgmr.msra.gmra.mrb[20].mxu0 %vm4221_vm1, %v5065_v9 }
 0x56c   : > { %v5136_v30 = vpop.f32.mrb[20].mxu0 }
 0x56d   : > { %v5152_v39 = vmul.f32 %v5483_v60, %v5136_v30  ;;  %v5856_v29 = vpop.f32.mrb[21].mxu0 }
 0x56e   : > { %v5139_v6 = vpop.f32.mrb[22].mxu0 }
 0x56f   : > { %v5161_v10 = vadd.f32 %v5484_v34, %v5152_v39  ;;  %v5153_v21 = vmul.f32 %v5483_v60, %v5139_v6  ;;  %v5857_v40 = vpop.f32.mrb[23].mxu0 }
 0x571   : > { %v5163_v51 = vmax.f32 %v5161_v10, 0.0  ;;  %v5162_v36 = vadd.f32 %v5484_v34, %v5153_v21 }
 0x573   : > { %v5164_v18 = vmax.f32 %v5162_v36, 0.0  ;;  %v5165_v4 = vsel %vm4221_vm1, %v5163_v51, 0.0 }
 0x575   : > { %v5166_v37 = vsel %vm4221_vm1, %v5164_v18, 0.0 }
 0x576   : > { %v5167_v23 = vadd.f32 %v5166_v37, %v5165_v4 }
 0x578   : > { %v5168_v48 = vrot.slane %v5167_v23, 4 }
 0x57a   : > { %v5169_v31 = vadd.f32 %v5168_v48, %v5167_v23 }
 0x57c   : > { %v5170_v42 = vrot.slane %v5169_v31, 2 }
 0x57e   : > { %v5171_v59 = vadd.f32 %v5170_v42, %v5169_v31 }
 0x580   : > { %v5172_v41 = vrot.slane %v5171_v59, 1 }
 0x582   : > { %v5173_v54 = vadd.f32 %v5172_v41, %v5171_v59 }
 0x584   : > { %v5174_v44 = vmul.f32 0.0625, %v5173_v54 }
 0x586   : > { %5175 = vst.msk [vmem:[%s351_s12] sm:$0x1] %vm4275_vm14, %v5174_v44 }
 0x587   : > { %6108 = shalt.err (!%p6105_p3)
}
 0x588   : > { %s6109_s30 = scalar_lea.hbm %s7684_s25, 16  ;;  %s6113_s20 = scalar_lea.hbm %s7737_s10, 32 }
 0x589   : > { %p6110_p4 = scmp.ne.s32.totalorder %s7684_s25, %s6109_s30  ;;  %p6114_p9 = scmp.lt.u32.totalorder %s7684_s25, %s7737_s10 }
 0x58a   : > { %p6115_p10 = scmp.lt.u32.totalorder %s6113_s20, %s6109_s30  ;;  %p6117_p12 = scmp.lt.u32.totalorder %s6109_s30, %s7684_s25 }
 0x58b   : > { %p6111_p7 = pnand %p6110_p4, %p6257_p5 }
 0x58c   : > { %p6116_p11 = por %p6115_p10, %p6114_p9 }
 0x58d   : > { %p6112_p8 = pneg %p6111_p7 }
 0x58e   : > { %p6118_p13 = por %p6117_p12, %p6116_p11 }
 0x590   : > { %p6119_p0 = pnand %p6118_p13, %p6112_p8 }
 0x592   : > { %6122 = shalt.err (!%p6119_p0)
}
 0x593   : > { %5958 = dma.vmem_to_hbm [thread:$0]  (%p6257_p5), %s7686_s18, 16, %s7684_s25, %s5177_s26  }
 0x594 PF: > { %p5964_p1 = scmp.ge.s32.totalorder %s6157_s16, 2  ;;  %s5201_s27 = sand.u32 1, %s6145_s13  }
 0x595   : > { %s5202_s28 = scalar_lea.sflag [#allocation5], %s5201_s27 }
 0x596   : > { %p5961_p2 = pnand %p5964_p1, %p6261_p6 }
 0x598   : > { %6140 = dma.done.wait (!%p5961_p2), %s5202_s28, 16  }
 0x599   : > { %6142 = vsyncadd (!%p5961_p2), %s5202_s28, 4294967280  ;;  %p20_p3 = scmp.ge.s32.totalorder %s6244_s19, 4   ;;  %s7740_s13 = smov %s6149_s14 }
 0x59a   : > { %s7741_s14 = smov %s6153_s15  ;;  %s7742_s15 = smov %s6255_s22 }
 0x59b   : > { %s7743_s16 = smov %s6244_s19  ;;  %22 = sbr.rel (!%p20_p3) target bundleno = 3 (0x3), region = 117 }
 0x5a2   :  { %5206 = vsyncpa [#allocation5], 1 }
 0x5a3   :  { %5208 = vsyncpa [#allocation5 + $0x1], 1 }

</bundles_post_ra>
